<compile_context>
chip_gen: v6e
topology: v6e:2x2x1
jax: 0.10.0
libtpu: 0.0.40
codegen_flags: <defaults>
</compile_context>

<pallas_src>
import functools

import jax
import jax.numpy as jnp
import numpy as np
from jax.experimental import pallas as pl
from jax.experimental.pallas import tpu as pltpu


EXPANSION = 4
BN_EPS = 1e-5
LANE = 128


def _round_up(x, m):
    return (x + m - 1) // m * m


def _largest_divisor_leq(n, k):
    for d in range(min(n, k), 0, -1):
        if n % d == 0:
            return d
    return 1


def _bn_fold(gamma, beta, mean, var):
    scale = gamma / jnp.sqrt(var + BN_EPS)
    bias = beta - mean * scale
    return (scale.reshape(1, -1).astype(jnp.float32),
            bias.reshape(1, -1).astype(jnp.float32))


def _pad_last(a, target, value=0.0):
    c = a.shape[-1]
    if target == c:
        return a
    pads = [(0, 0)] * (a.ndim - 1) + [(0, target - c)]
    return jnp.pad(a, pads, constant_values=value)


# ----------------------------------------------------------------------------
# Single fused kernel: conv1x1+BN+ReLU -> conv3x3+BN+ReLU -> conv1x1+BN.
# ----------------------------------------------------------------------------
def _bottleneck_kernel(xm_ref, xt_ref, xb_ref,
                       w1_ref, sc1_ref, b1_ref,
                       w2_ref, sc2_ref, b2_ref,
                       w3_ref, sc3_ref, b3_ref,
                       o_ref,
                       *, stride, th, wo, img_h, compute_dtype):
    # xm_ref : (1, TH*stride, W, Cin)  main input rows  [t*THs, (t+1)*THs)
    # xt_ref : (1, 1, W, Cin)          halo row above   (clamped at row 0)
    # xb_ref : (1, 1, W, Cin)          halo row below   (clamped at row H-1)
    # o_ref  : (1, TH, Wo, Cp)
    t = pl.program_id(1)
    ths = th * stride
    w = xm_ref.shape[2]
    cin = xm_ref.shape[3]
    p = w1_ref.shape[1]            # lane-padded planes
    cp = w3_ref.shape[1]           # lane-padded output channels

    def conv1_bn_relu(x2d):
        y = jnp.dot(x2d.astype(compute_dtype), w1_ref[...],
                    preferred_element_type=jnp.float32)
        return jnp.maximum(y * sc1_ref[...] + b1_ref[...], 0.0)

    # conv1 on the main rows and on each halo row separately: only P-wide o1
    # pieces are ever concatenated (never a Cin-wide input window).
    o1_main = conv1_bn_relu(xm_ref[0].reshape(ths * w, cin)).reshape(ths, w, p)
    o1_top = conv1_bn_relu(xt_ref[0].reshape(w, cin)).reshape(1, w, p)
    o1_bot = conv1_bn_relu(xb_ref[0].reshape(w, cin)).reshape(1, w, p)

    # Halo rows that are conv2 zero padding (image rows -1 / H) must be
    # exactly zero (relu(bn1(0)) != 0): mask only on boundary tiles.
    o1_top = jnp.where(t > 0, o1_top, 0.0)
    o1_bot = jnp.where((t + 1) * ths < img_h, o1_bot, 0.0)

    # Assemble the (THs+2, W+2, P) o1 window; the conv2 left/right padding is
    # created as exact zeros directly in VMEM (the raw input is never padded).
    o1 = jnp.concatenate([o1_top, o1_main, o1_bot], axis=0)
    zcol = jnp.zeros((ths + 2, 1, p), jnp.float32)
    o1 = jnp.concatenate([zcol, o1, zcol], axis=1).astype(compute_dtype)

    # conv2 (3x3, pad=1, stride) as one im2col matmul: K = 9P fills the MXU
    # and replaces 9 weight pushes with one.  Accumulate in f32, then bn2+relu.
    taps = []
    for kh in range(3):
        for kw in range(3):
            taps.append(o1[kh:kh + (th - 1) * stride + 1:stride,
                           kw:kw + (wo - 1) * stride + 1:stride, :])
    col = jnp.concatenate(taps, axis=-1).reshape(th * wo, 9 * p)
    acc = jnp.dot(col, w2_ref[...], preferred_element_type=jnp.float32)
    o2 = jnp.maximum(acc * sc2_ref[...] + b2_ref[...], 0.0).astype(compute_dtype)

    # conv3 (1x1) + bn3  (no shortcut, no final relu).
    o3 = jnp.dot(o2, w3_ref[...], preferred_element_type=jnp.float32)
    o3 = o3 * sc3_ref[...] + b3_ref[...]
    o_ref[0] = o3.reshape(th, wo, cp).astype(o_ref.dtype)


# ----------------------------------------------------------------------------
# Wrapper.
# ----------------------------------------------------------------------------
def bottleneck_noshortcut_forward(x_nchw, params, stride=1,
                                  compute_dtype=jnp.bfloat16, out_dtype=None,
                                  row_tile=None, nchw_output=True):
    planes = params["w1"].shape[0]
    in_planes = params["w1"].shape[1]
    out_planes = params["w3"].shape[0]
    out_dtype = compute_dtype if out_dtype is None else out_dtype

    N, C, H, W = x_nchw.shape
    assert C == in_planes
    assert H % stride == 0, "TODO(synk): odd spatial size with stride 2"
    Ho = (H - 1) // stride + 1
    Wo = (W - 1) // stride + 1

    # ---- fold BN; pad channel dims to lane width (128) ---------------------
    P = planes
    Pp = _round_up(P, LANE)
    Cout = out_planes
    Cp = _round_up(Cout, LANE)

    sc1, b1 = _bn_fold(*params["bn1"])
    sc2, b2 = _bn_fold(*params["bn2"])
    sc3, b3 = _bn_fold(*params["bn3"])
    sc1, b1 = _pad_last(sc1, Pp, 1.0), _pad_last(b1, Pp, 0.0)
    sc2, b2 = _pad_last(sc2, Pp, 1.0), _pad_last(b2, Pp, 0.0)
    sc3, b3 = _pad_last(sc3, Cp, 1.0), _pad_last(b3, Cp, 0.0)

    w1 = jnp.transpose(params["w1"][:, :, 0, 0], (1, 0))             # (Cin, P)
    w1 = _pad_last(w1, Pp).astype(compute_dtype)                     # (Cin, Pp)
    w2 = jnp.transpose(params["w2"], (2, 3, 1, 0))                   # (3,3,P,P)
    w2 = jnp.pad(w2, ((0, 0), (0, 0), (0, Pp - P), (0, Pp - P)))
    w2 = w2.reshape(9 * Pp, Pp).astype(compute_dtype)                # (9Pp, Pp)
    w3 = jnp.transpose(params["w3"][:, :, 0, 0], (1, 0))             # (P, Cout)
    w3 = jnp.pad(w3, ((0, Pp - P), (0, Cp - Cout))).astype(compute_dtype)

    # NCHW -> NHWC in the compute dtype.  The input is NOT spatially padded,
    # so x makes exactly one HBM trip.
    x = jnp.transpose(x_nchw, (0, 2, 3, 1)).astype(compute_dtype)
    Cin = in_planes

    cbytes = jnp.dtype(compute_dtype).itemsize
    obytes = jnp.dtype(out_dtype).itemsize

    # ---- tile selection: biggest row tile that fits the VMEM budget --------
    try:
        vmem_cap = pltpu.get_tpu_info().vmem_capacity_bytes
    except Exception:
        vmem_cap = 64 * 1024 * 1024                 # conservative (v7x size)
    vmem_limit = int(min(vmem_cap * 3 // 4, 96 * 1024 * 1024))
    const_bytes = 2 * ((Cin * Pp + 9 * Pp * Pp + Pp * Cp) * cbytes
                       + (4 * Pp + 2 * Cp) * 4)     # resident weights/BN params
    budget = max(vmem_limit // 2 - const_bytes, 1 << 20)

    def _tile_bytes(th):
        ths = th * stride
        return (2 * (ths + 2) * W * Cin * cbytes            # input window (x2 buf)
                + 2 * th * Wo * Cp * obytes                 # output tile (x2 buf)
                + (ths + 2) * (W + 2) * Pp * (4 + cbytes)   # o1 f32 + cast copy
                + th * Wo * 9 * Pp * cbytes                 # im2col tile
                + th * Wo * Pp * 4                          # conv2 acc / o2
                + th * Wo * Cp * 4)                         # conv3 acc

    TH = _largest_divisor_leq(Ho, row_tile if row_tile else Ho)
    while TH > 1 and _tile_bytes(TH) > budget:
        TH = _largest_divisor_leq(Ho, TH - 1)
    if N * (Ho // TH) < 2 and TH > 1:     # keep >= 2 parallel steps (v7x 2 TCs)
        TH = _largest_divisor_leq(Ho, max(1, TH // 2))
    T = Ho // TH
    THs = TH * stride

    kern = functools.partial(_bottleneck_kernel, stride=stride, th=TH, wo=Wo,
                             img_h=H, compute_dtype=compute_dtype)
    const2 = lambda n, t: (0, 0)

    out_p = pl.pallas_call(
        kern,
        out_shape=jax.ShapeDtypeStruct((N, Ho, Wo, Cp), out_dtype),
        grid_spec=pltpu.PrefetchScalarGridSpec(
            num_scalar_prefetch=0,
            grid=(N, T),
            in_specs=[
                # main input rows of this tile
                pl.BlockSpec((1, THs, W, Cin), lambda n, t: (n, t, 0, 0)),
                # 1-row halo above (clamped at top edge, masked in-kernel)
                pl.BlockSpec((1, 1, W, Cin),
                             lambda n, t: (n, jnp.maximum(t * THs - 1, 0), 0, 0)),
                # 1-row halo below (clamped at bottom edge, masked in-kernel)
                pl.BlockSpec((1, 1, W, Cin),
                             lambda n, t: (n, jnp.minimum((t + 1) * THs, H - 1), 0, 0)),
                # weights / folded BN params: constant index maps, stay resident
                pl.BlockSpec((Cin, Pp), const2),
                pl.BlockSpec((1, Pp), const2),
                pl.BlockSpec((1, Pp), const2),
                pl.BlockSpec((9 * Pp, Pp), const2),
                pl.BlockSpec((1, Pp), const2),
                pl.BlockSpec((1, Pp), const2),
                pl.BlockSpec((Pp, Cp), const2),
                pl.BlockSpec((1, Cp), const2),
                pl.BlockSpec((1, Cp), const2),
            ],
            out_specs=pl.BlockSpec((1, TH, Wo, Cp), lambda n, t: (n, t, 0, 0)),
        ),
        compiler_params=pltpu.CompilerParams(
            dimension_semantics=("parallel", "parallel"),
            vmem_limit_bytes=vmem_limit),
    )(x, x, x, w1, sc1, b1, w2, sc2, b2, w3, sc3, b3)

    if not nchw_output:
        # Fast path for a fused NHWC pipeline: keep the lane-padded NHWC slab.
        return out_p
    out = out_p[..., :Cout] if Cp != Cout else out_p
    return jnp.transpose(out, (0, 3, 1, 2))       # NHWC -> NCHW (PyTorch layout)


# ----------------------------------------------------------------------------
# Deterministic parameters + pure-JAX reference for verification.
# ----------------------------------------------------------------------------
def make_params(key, in_planes, planes):
    out_planes = EXPANSION * planes
    ks = jax.random.split(key, 8)

    def conv_w(k, cout, cin, kh, kw):
        fan_in = cin * kh * kw
        bound = 1.0 / np.sqrt(fan_in)
        return jax.random.uniform(k, (cout, cin, kh, kw), jnp.float32, -bound, bound)

    def bn_params(k, c):
        k1, k2, k3, k4 = jax.random.split(k, 4)
        gamma = jax.random.uniform(k1, (c,), jnp.float32, 0.5, 1.5)
        beta = 0.1 * jax.random.normal(k2, (c,), jnp.float32)
        mean = 0.1 * jax.random.normal(k3, (c,), jnp.float32)
        var = jax.random.uniform(k4, (c,), jnp.float32, 0.5, 1.5)
        return gamma, beta, mean, var

    return {
        "w1": conv_w(ks[0], planes, in_planes, 1, 1),
        "bn1": bn_params(ks[1], planes),
        "w2": conv_w(ks[2], planes, planes, 3, 3),
        "bn2": bn_params(ks[3], planes),
        "w3": conv_w(ks[4], out_planes, planes, 1, 1),
        "bn3": bn_params(ks[5], out_planes),
    }


def _conv_ref(x_nhwc, w_oihw, stride, padding):
    w_hwio = jnp.transpose(w_oihw, (2, 3, 1, 0))
    return jax.lax.conv_general_dilated(
        x_nhwc, w_hwio, (stride, stride), padding,
        dimension_numbers=("NHWC", "HWIO", "NHWC"))


def _bn_ref(y, bn):
    gamma, beta, mean, var = bn
    return (y - mean) / jnp.sqrt(var + BN_EPS) * gamma + beta


def bottleneck_reference(x_nchw, params, stride=1):
    x = jnp.transpose(x_nchw, (0, 2, 3, 1)).astype(jnp.float32)
    o = jax.nn.relu(_bn_ref(_conv_ref(x, params["w1"], 1, "VALID"), params["bn1"]))
    o = jax.nn.relu(_bn_ref(_conv_ref(o, params["w2"], stride, [(1, 1), (1, 1)]),
                            params["bn2"]))
    o = _bn_ref(_conv_ref(o, params["w3"], 1, "VALID"), params["bn3"])
    return jnp.transpose(o, (0, 3, 1, 2))


if __name__ == "__main__":
    in_planes, planes = 8, 4
    N, H, W = 2, 16, 16

    key = jax.random.PRNGKey(0)
    kx, kp = jax.random.split(key)
    x = jax.random.normal(kx, (N, in_planes, H, W), jnp.float32)   # NCHW like PyTorch
    params = make_params(kp, in_planes, planes)

    # stride=1: f32 compute path (tight check) + bf16 default perf path.
    ref = jax.block_until_ready(bottleneck_reference(x, params, 1))
    out_f32 = jax.block_until_ready(
        bottleneck_noshortcut_forward(x, params, 1, compute_dtype=jnp.float32))
    np.testing.assert_allclose(np.asarray(out_f32), np.asarray(ref),
                               rtol=1e-3, atol=1e-3)

    out_bf16 = jax.block_until_ready(bottleneck_noshortcut_forward(x, params, 1))
    np.testing.assert_allclose(np.asarray(out_bf16.astype(jnp.float32)),
                               np.asarray(ref), rtol=5e-2, atol=5e-2)

    # stride=2: validates the strided im2col tap geometry and halo masking.
    ref2 = jax.block_until_ready(bottleneck_reference(x, params, 2))
    out2 = jax.block_until_ready(
        bottleneck_noshortcut_forward(x, params, 2, compute_dtype=jnp.float32))
    np.testing.assert_allclose(np.asarray(out2), np.asarray(ref2),
                               rtol=1e-3, atol=1e-3)

    print("KERNEL_OK")
</pallas_src>

<mosaic_0001>
module attributes {stable_mosaic.version = 11 : i64} {
  func.func @_bottleneck_kernel(%arg0: i32, %arg1: i32, %arg2: memref<1x16x16x8xf32, #tpu.memory_space<vmem>>, %arg3: memref<1x1x16x8xf32, #tpu.memory_space<vmem>>, %arg4: memref<1x1x16x8xf32, #tpu.memory_space<vmem>>, %arg5: memref<8x128xf32, #tpu.memory_space<vmem>>, %arg6: memref<1x128xf32, #tpu.memory_space<vmem>>, %arg7: memref<1x128xf32, #tpu.memory_space<vmem>>, %arg8: memref<1152x128xf32, #tpu.memory_space<vmem>>, %arg9: memref<1x128xf32, #tpu.memory_space<vmem>>, %arg10: memref<1x128xf32, #tpu.memory_space<vmem>>, %arg11: memref<128x128xf32, #tpu.memory_space<vmem>>, %arg12: memref<1x128xf32, #tpu.memory_space<vmem>>, %arg13: memref<1x128xf32, #tpu.memory_space<vmem>>, %arg14: memref<1x16x16x128xf32, #tpu.memory_space<vmem>>) attributes {dimension_semantics = [#tpu.dimension_semantics<parallel>, #tpu.dimension_semantics<parallel>], iteration_bounds = array<i64: 2, 1>, scalar_prefetch = 0 : i64, scratch_operands = 0 : i64, tpu.core_type = #tpu.core_type<tc>, window_params = [{transform_indices = @transform_0, window_bounds = array<i64: 1, 16, 16, 8>}, {transform_indices = @transform_1, window_bounds = array<i64: 1, 1, 16, 8>}, {transform_indices = @transform_2, window_bounds = array<i64: 1, 1, 16, 8>}, {pipeline_mode = #tpu.pipeline_mode<synchronous>, transform_indices = @transform_3, window_bounds = array<i64: 8, 128>}, {pipeline_mode = #tpu.pipeline_mode<synchronous>, transform_indices = @transform_4, window_bounds = array<i64: 1, 128>}, {pipeline_mode = #tpu.pipeline_mode<synchronous>, transform_indices = @transform_5, window_bounds = array<i64: 1, 128>}, {pipeline_mode = #tpu.pipeline_mode<synchronous>, transform_indices = @transform_6, window_bounds = array<i64: 1152, 128>}, {pipeline_mode = #tpu.pipeline_mode<synchronous>, transform_indices = @transform_7, window_bounds = array<i64: 1, 128>}, {pipeline_mode = #tpu.pipeline_mode<synchronous>, transform_indices = @transform_8, window_bounds = array<i64: 1, 128>}, {pipeline_mode = #tpu.pipeline_mode<synchronous>, transform_indices = @transform_9, window_bounds = array<i64: 128, 128>}, {pipeline_mode = #tpu.pipeline_mode<synchronous>, transform_indices = @transform_10, window_bounds = array<i64: 1, 128>}, {pipeline_mode = #tpu.pipeline_mode<synchronous>, transform_indices = @transform_11, window_bounds = array<i64: 1, 128>}, {transform_indices = @transform_12, window_bounds = array<i64: 1, 16, 16, 128>}]} {
    %c0 = arith.constant 0 : index
    %c0_0 = arith.constant 0 : index
    %c0_1 = arith.constant 0 : index
    %c0_2 = arith.constant 0 : index
    %0 = vector.load %arg2[%c0, %c0_0, %c0_1, %c0_2] : memref<1x16x16x8xf32, #tpu.memory_space<vmem>>, vector<1x16x16x8xf32>
    %1 = vector.shape_cast %0 : vector<1x16x16x8xf32> to vector<16x16x8xf32>
    %2 = vector.shape_cast %1 : vector<16x16x8xf32> to vector<256x8xf32>
    %c0_3 = arith.constant 0 : index
    %c0_4 = arith.constant 0 : index
    %3 = vector.load %arg5[%c0_3, %c0_4] : memref<8x128xf32, #tpu.memory_space<vmem>>, vector<8x128xf32>
    %cst = arith.constant dense<0.000000e+00> : vector<256x128xf32>
    %4 = tpu.matmul %2, %3, %cst {dimension_numbers = #tpu.dot_dimension_numbers<[1], [0], [0], [1], [0, 0, 1, 1], [], []>} : vector<256x8xf32>, vector<8x128xf32>, vector<256x128xf32> -> vector<256x128xf32>
    %c0_5 = arith.constant 0 : index
    %c0_6 = arith.constant 0 : index
    %5 = vector.load %arg6[%c0_5, %c0_6] : memref<1x128xf32, #tpu.memory_space<vmem>>, vector<1x128xf32>
    %6 = vector.broadcast %5 : vector<1x128xf32> to vector<256x128xf32>
    %7 = arith.mulf %4, %6 : vector<256x128xf32>
    %c0_7 = arith.constant 0 : index
    %c0_8 = arith.constant 0 : index
    %8 = vector.load %arg7[%c0_7, %c0_8] : memref<1x128xf32, #tpu.memory_space<vmem>>, vector<1x128xf32>
    %9 = vector.broadcast %8 : vector<1x128xf32> to vector<256x128xf32>
    %10 = arith.addf %7, %9 : vector<256x128xf32>
    %cst_9 = arith.constant 0.000000e+00 : f32
    %11 = vector.broadcast %cst_9 : f32 to vector<256x128xf32>
    %12 = arith.maximumf %10, %11 : vector<256x128xf32>
    %13 = vector.shape_cast %12 : vector<256x128xf32> to vector<16x16x128xf32>
    %c0_10 = arith.constant 0 : index
    %c0_11 = arith.constant 0 : index
    %c0_12 = arith.constant 0 : index
    %c0_13 = arith.constant 0 : index
    %14 = vector.load %arg3[%c0_10, %c0_11, %c0_12, %c0_13] : memref<1x1x16x8xf32, #tpu.memory_space<vmem>>, vector<1x1x16x8xf32>
    %15 = vector.shape_cast %14 : vector<1x1x16x8xf32> to vector<1x16x8xf32>
    %16 = vector.shape_cast %15 : vector<1x16x8xf32> to vector<16x8xf32>
    %c0_14 = arith.constant 0 : index
    %c0_15 = arith.constant 0 : index
    %17 = vector.load %arg5[%c0_14, %c0_15] : memref<8x128xf32, #tpu.memory_space<vmem>>, vector<8x128xf32>
    %cst_16 = arith.constant dense<0.000000e+00> : vector<16x128xf32>
    %18 = tpu.matmul %16, %17, %cst_16 {dimension_numbers = #tpu.dot_dimension_numbers<[1], [0], [0], [1], [0, 0, 1, 1], [], []>} : vector<16x8xf32>, vector<8x128xf32>, vector<16x128xf32> -> vector<16x128xf32>
    %c0_17 = arith.constant 0 : index
    %c0_18 = arith.constant 0 : index
    %19 = vector.load %arg6[%c0_17, %c0_18] : memref<1x128xf32, #tpu.memory_space<vmem>>, vector<1x128xf32>
    %20 = vector.broadcast %19 : vector<1x128xf32> to vector<16x128xf32>
    %21 = arith.mulf %18, %20 : vector<16x128xf32>
    %c0_19 = arith.constant 0 : index
    %c0_20 = arith.constant 0 : index
    %22 = vector.load %arg7[%c0_19, %c0_20] : memref<1x128xf32, #tpu.memory_space<vmem>>, vector<1x128xf32>
    %23 = vector.broadcast %22 : vector<1x128xf32> to vector<16x128xf32>
    %24 = arith.addf %21, %23 : vector<16x128xf32>
    %cst_21 = arith.constant 0.000000e+00 : f32
    %25 = vector.broadcast %cst_21 : f32 to vector<16x128xf32>
    %26 = arith.maximumf %24, %25 : vector<16x128xf32>
    %27 = vector.shape_cast %26 : vector<16x128xf32> to vector<1x16x128xf32>
    %c0_22 = arith.constant 0 : index
    %c0_23 = arith.constant 0 : index
    %c0_24 = arith.constant 0 : index
    %c0_25 = arith.constant 0 : index
    %28 = vector.load %arg4[%c0_22, %c0_23, %c0_24, %c0_25] : memref<1x1x16x8xf32, #tpu.memory_space<vmem>>, vector<1x1x16x8xf32>
    %29 = vector.shape_cast %28 : vector<1x1x16x8xf32> to vector<1x16x8xf32>
    %30 = vector.shape_cast %29 : vector<1x16x8xf32> to vector<16x8xf32>
    %c0_26 = arith.constant 0 : index
    %c0_27 = arith.constant 0 : index
    %31 = vector.load %arg5[%c0_26, %c0_27] : memref<8x128xf32, #tpu.memory_space<vmem>>, vector<8x128xf32>
    %cst_28 = arith.constant dense<0.000000e+00> : vector<16x128xf32>
    %32 = tpu.matmul %30, %31, %cst_28 {dimension_numbers = #tpu.dot_dimension_numbers<[1], [0], [0], [1], [0, 0, 1, 1], [], []>} : vector<16x8xf32>, vector<8x128xf32>, vector<16x128xf32> -> vector<16x128xf32>
    %c0_29 = arith.constant 0 : index
    %c0_30 = arith.constant 0 : index
    %33 = vector.load %arg6[%c0_29, %c0_30] : memref<1x128xf32, #tpu.memory_space<vmem>>, vector<1x128xf32>
    %34 = vector.broadcast %33 : vector<1x128xf32> to vector<16x128xf32>
    %35 = arith.mulf %32, %34 : vector<16x128xf32>
    %c0_31 = arith.constant 0 : index
    %c0_32 = arith.constant 0 : index
    %36 = vector.load %arg7[%c0_31, %c0_32] : memref<1x128xf32, #tpu.memory_space<vmem>>, vector<1x128xf32>
    %37 = vector.broadcast %36 : vector<1x128xf32> to vector<16x128xf32>
    %38 = arith.addf %35, %37 : vector<16x128xf32>
    %cst_33 = arith.constant 0.000000e+00 : f32
    %39 = vector.broadcast %cst_33 : f32 to vector<16x128xf32>
    %40 = arith.maximumf %38, %39 : vector<16x128xf32>
    %41 = vector.shape_cast %40 : vector<16x128xf32> to vector<1x16x128xf32>
    %c0_i32 = arith.constant 0 : i32
    %42 = arith.cmpi sgt, %arg1, %c0_i32 : i32
    %cst_34 = arith.constant 0.000000e+00 : f32
    %43 = vector.broadcast %cst_34 : f32 to vector<1x16x128xf32>
    %44 = arith.select %42, %27, %43 : vector<1x16x128xf32>
    %c1_i32 = arith.constant 1 : i32
    %45 = arith.addi %arg1, %c1_i32 : i32
    %c16_i32 = arith.constant 16 : i32
    %46 = arith.muli %45, %c16_i32 : i32
    %c16_i32_35 = arith.constant 16 : i32
    %47 = arith.cmpi slt, %46, %c16_i32_35 : i32
    %cst_36 = arith.constant 0.000000e+00 : f32
    %48 = vector.broadcast %cst_36 : f32 to vector<1x16x128xf32>
    %49 = arith.select %47, %41, %48 : vector<1x16x128xf32>
    %50 = tpu.concatenate %44, %13, %49 in 0 : vector<1x16x128xf32>, vector<16x16x128xf32>, vector<1x16x128xf32> -> vector<18x16x128xf32>
    %cst_37 = arith.constant 0.000000e+00 : f32
    %51 = vector.broadcast %cst_37 : f32 to vector<18x1x128xf32>
    %52 = tpu.concatenate %51, %50, %51 in 1 : vector<18x1x128xf32>, vector<18x16x128xf32>, vector<18x1x128xf32> -> vector<18x18x128xf32>
    %53 = vector.extract_strided_slice %52 {offsets = [0, 0, 0], sizes = [16, 16, 128], strides = [1, 1, 1]} : vector<18x18x128xf32> to vector<16x16x128xf32>
    %54 = vector.extract_strided_slice %52 {offsets = [0, 1, 0], sizes = [16, 16, 128], strides = [1, 1, 1]} : vector<18x18x128xf32> to vector<16x16x128xf32>
    %55 = vector.extract_strided_slice %52 {offsets = [0, 2, 0], sizes = [16, 16, 128], strides = [1, 1, 1]} : vector<18x18x128xf32> to vector<16x16x128xf32>
    %56 = vector.extract_strided_slice %52 {offsets = [1, 0, 0], sizes = [16, 16, 128], strides = [1, 1, 1]} : vector<18x18x128xf32> to vector<16x16x128xf32>
    %57 = vector.extract_strided_slice %52 {offsets = [1, 1, 0], sizes = [16, 16, 128], strides = [1, 1, 1]} : vector<18x18x128xf32> to vector<16x16x128xf32>
    %58 = vector.extract_strided_slice %52 {offsets = [1, 2, 0], sizes = [16, 16, 128], strides = [1, 1, 1]} : vector<18x18x128xf32> to vector<16x16x128xf32>
    %59 = vector.extract_strided_slice %52 {offsets = [2, 0, 0], sizes = [16, 16, 128], strides = [1, 1, 1]} : vector<18x18x128xf32> to vector<16x16x128xf32>
    %60 = vector.extract_strided_slice %52 {offsets = [2, 1, 0], sizes = [16, 16, 128], strides = [1, 1, 1]} : vector<18x18x128xf32> to vector<16x16x128xf32>
    %61 = vector.extract_strided_slice %52 {offsets = [2, 2, 0], sizes = [16, 16, 128], strides = [1, 1, 1]} : vector<18x18x128xf32> to vector<16x16x128xf32>
    %62 = tpu.concatenate %53, %54, %55, %56, %57, %58, %59, %60, %61 in 2 : vector<16x16x128xf32>, vector<16x16x128xf32>, vector<16x16x128xf32>, vector<16x16x128xf32>, vector<16x16x128xf32>, vector<16x16x128xf32>, vector<16x16x128xf32>, vector<16x16x128xf32>, vector<16x16x128xf32> -> vector<16x16x1152xf32>
    %63 = vector.shape_cast %62 : vector<16x16x1152xf32> to vector<256x1152xf32>
    %c0_38 = arith.constant 0 : index
    %c0_39 = arith.constant 0 : index
    %64 = vector.load %arg8[%c0_38, %c0_39] : memref<1152x128xf32, #tpu.memory_space<vmem>>, vector<1152x128xf32>
    %cst_40 = arith.constant dense<0.000000e+00> : vector<256x128xf32>
    %65 = tpu.matmul %63, %64, %cst_40 {dimension_numbers = #tpu.dot_dimension_numbers<[1], [0], [0], [1], [0, 0, 1, 1], [], []>} : vector<256x1152xf32>, vector<1152x128xf32>, vector<256x128xf32> -> vector<256x128xf32>
    %c0_41 = arith.constant 0 : index
    %c0_42 = arith.constant 0 : index
    %66 = vector.load %arg9[%c0_41, %c0_42] : memref<1x128xf32, #tpu.memory_space<vmem>>, vector<1x128xf32>
    %67 = vector.broadcast %66 : vector<1x128xf32> to vector<256x128xf32>
    %68 = arith.mulf %65, %67 : vector<256x128xf32>
    %c0_43 = arith.constant 0 : index
    %c0_44 = arith.constant 0 : index
    %69 = vector.load %arg10[%c0_43, %c0_44] : memref<1x128xf32, #tpu.memory_space<vmem>>, vector<1x128xf32>
    %70 = vector.broadcast %69 : vector<1x128xf32> to vector<256x128xf32>
    %71 = arith.addf %68, %70 : vector<256x128xf32>
    %cst_45 = arith.constant 0.000000e+00 : f32
    %72 = vector.broadcast %cst_45 : f32 to vector<256x128xf32>
    %73 = arith.maximumf %71, %72 : vector<256x128xf32>
    %c0_46 = arith.constant 0 : index
    %c0_47 = arith.constant 0 : index
    %74 = vector.load %arg11[%c0_46, %c0_47] : memref<128x128xf32, #tpu.memory_space<vmem>>, vector<128x128xf32>
    %cst_48 = arith.constant dense<0.000000e+00> : vector<256x128xf32>
    %75 = tpu.matmul %73, %74, %cst_48 {dimension_numbers = #tpu.dot_dimension_numbers<[1], [0], [0], [1], [0, 0, 1, 1], [], []>} : vector<256x128xf32>, vector<128x128xf32>, vector<256x128xf32> -> vector<256x128xf32>
    %c0_49 = arith.constant 0 : index
    %c0_50 = arith.constant 0 : index
    %76 = vector.load %arg12[%c0_49, %c0_50] : memref<1x128xf32, #tpu.memory_space<vmem>>, vector<1x128xf32>
    %77 = vector.broadcast %76 : vector<1x128xf32> to vector<256x128xf32>
    %78 = arith.mulf %75, %77 : vector<256x128xf32>
    %c0_51 = arith.constant 0 : index
    %c0_52 = arith.constant 0 : index
    %79 = vector.load %arg13[%c0_51, %c0_52] : memref<1x128xf32, #tpu.memory_space<vmem>>, vector<1x128xf32>
    %80 = vector.broadcast %79 : vector<1x128xf32> to vector<256x128xf32>
    %81 = arith.addf %78, %80 : vector<256x128xf32>
    %82 = vector.shape_cast %81 : vector<256x128xf32> to vector<16x16x128xf32>
    %c0_53 = arith.constant 0 : index
    %c0_54 = arith.constant 0 : index
    %c0_55 = arith.constant 0 : index
    %c0_56 = arith.constant 0 : index
    %83 = vector.load %arg14[%c0_53, %c0_54, %c0_55, %c0_56] : memref<1x16x16x128xf32, #tpu.memory_space<vmem>>, vector<1x16x16x128xf32>
    %84 = vector.shape_cast %83 : vector<1x16x16x128xf32> to vector<16x16x128xf32>
    %85 = vector.shape_cast %82 : vector<16x16x128xf32> to vector<1x16x16x128xf32>
    tpu.vector_store %arg14[%c0_53, %c0_54, %c0_55, %c0_56], %85 {strides = array<i32>} : memref<1x16x16x128xf32, #tpu.memory_space<vmem>>, vector<1x16x16x128xf32>,
    return
  }
  func.func @transform_0(%arg0: i32, %arg1: i32) -> (i32, i32, i32, i32) {
    %c0_i32 = arith.constant 0 : i32
    %c0_i32_0 = arith.constant 0 : i32
    %c0_i32_1 = arith.constant 0 : i32
    return %arg0, %arg1, %c0_i32, %c0_i32_0 : i32, i32, i32, i32
  }
  func.func @transform_1(%arg0: i32, %arg1: i32) -> (i32, i32, i32, i32) {
    %c16_i32 = arith.constant 16 : i32
    %0 = arith.muli %arg1, %c16_i32 : i32
    %c1_i32 = arith.constant 1 : i32
    %1 = arith.subi %0, %c1_i32 : i32
    %c0_i32 = arith.constant 0 : i32
    %2 = arith.maxsi %1, %c0_i32 : i32
    %c0_i32_0 = arith.constant 0 : i32
    %c0_i32_1 = arith.constant 0 : i32
    %c0_i32_2 = arith.constant 0 : i32
    return %arg0, %2, %c0_i32_0, %c0_i32_1 : i32, i32, i32, i32
  }
  func.func @transform_2(%arg0: i32, %arg1: i32) -> (i32, i32, i32, i32) {
    %c1_i32 = arith.constant 1 : i32
    %0 = arith.addi %arg1, %c1_i32 : i32
    %c16_i32 = arith.constant 16 : i32
    %1 = arith.muli %0, %c16_i32 : i32
    %c15_i32 = arith.constant 15 : i32
    %2 = arith.minsi %1, %c15_i32 : i32
    %c0_i32 = arith.constant 0 : i32
    %c0_i32_0 = arith.constant 0 : i32
    %c0_i32_1 = arith.constant 0 : i32
    return %arg0, %2, %c0_i32, %c0_i32_0 : i32, i32, i32, i32
  }
  func.func @transform_3(%arg0: i32, %arg1: i32) -> (i32, i32) {
    %c0_i32 = arith.constant 0 : i32
    %c0_i32_0 = arith.constant 0 : i32
    %c0_i32_1 = arith.constant 0 : i32
    return %c0_i32, %c0_i32_0 : i32, i32
  }
  func.func @transform_4(%arg0: i32, %arg1: i32) -> (i32, i32) {
    %c0_i32 = arith.constant 0 : i32
    %c0_i32_0 = arith.constant 0 : i32
    %c0_i32_1 = arith.constant 0 : i32
    return %c0_i32, %c0_i32_0 : i32, i32
  }
  func.func @transform_5(%arg0: i32, %arg1: i32) -> (i32, i32) {
    %c0_i32 = arith.constant 0 : i32
    %c0_i32_0 = arith.constant 0 : i32
    %c0_i32_1 = arith.constant 0 : i32
    return %c0_i32, %c0_i32_0 : i32, i32
  }
  func.func @transform_6(%arg0: i32, %arg1: i32) -> (i32, i32) {
    %c0_i32 = arith.constant 0 : i32
    %c0_i32_0 = arith.constant 0 : i32
    %c0_i32_1 = arith.constant 0 : i32
    return %c0_i32, %c0_i32_0 : i32, i32
  }
  func.func @transform_7(%arg0: i32, %arg1: i32) -> (i32, i32) {
    %c0_i32 = arith.constant 0 : i32
    %c0_i32_0 = arith.constant 0 : i32
    %c0_i32_1 = arith.constant 0 : i32
    return %c0_i32, %c0_i32_0 : i32, i32
  }
  func.func @transform_8(%arg0: i32, %arg1: i32) -> (i32, i32) {
    %c0_i32 = arith.constant 0 : i32
    %c0_i32_0 = arith.constant 0 : i32
    %c0_i32_1 = arith.constant 0 : i32
    return %c0_i32, %c0_i32_0 : i32, i32
  }
  func.func @transform_9(%arg0: i32, %arg1: i32) -> (i32, i32) {
    %c0_i32 = arith.constant 0 : i32
    %c0_i32_0 = arith.constant 0 : i32
    %c0_i32_1 = arith.constant 0 : i32
    return %c0_i32, %c0_i32_0 : i32, i32
  }
  func.func @transform_10(%arg0: i32, %arg1: i32) -> (i32, i32) {
    %c0_i32 = arith.constant 0 : i32
    %c0_i32_0 = arith.constant 0 : i32
    %c0_i32_1 = arith.constant 0 : i32
    return %c0_i32, %c0_i32_0 : i32, i32
  }
  func.func @transform_11(%arg0: i32, %arg1: i32) -> (i32, i32) {
    %c0_i32 = arith.constant 0 : i32
    %c0_i32_0 = arith.constant 0 : i32
    %c0_i32_1 = arith.constant 0 : i32
    return %c0_i32, %c0_i32_0 : i32, i32
  }
  func.func @transform_12(%arg0: i32, %arg1: i32) -> (i32, i32, i32, i32) {
    %c0_i32 = arith.constant 0 : i32
    %c0_i32_0 = arith.constant 0 : i32
    %c0_i32_1 = arith.constant 0 : i32
    return %arg0, %arg1, %c0_i32, %c0_i32_0 : i32, i32, i32, i32
  }
}

</mosaic_0001>

<bundles_post_ra>
// kernel: tpu_custom_call.1
= control target key start
LH: loop header
LB: loop body
LE: loop exit
PB: predicated region body
PF: predicated region fallthrough
CT: control target
= control target key end

     0   :  { %s6476_s0 = inlined_call_operand.vmem [shape: f32[2,16,16,8], index: 0, kind: input, shape index: {}]   ;;  %s6477_s1 = inlined_call_operand.vmem [shape: f32[2,16,16,8], index: 1, kind: input, shape index: {}]   ;;  %s6478_s2 = inlined_call_operand.vmem [shape: f32[2,16,16,8], index: 2, kind: input, shape index: {}]   ;;  %s6479_s3 = inlined_call_operand.vmem [shape: f32[8,128], index: 3, kind: input, shape index: {}]   ;;  %s6480_s4 = inlined_call_operand.vmem [shape: f32[1,128], index: 4, kind: input, shape index: {}]   ;;  %s6481_s5 = inlined_call_operand.vmem [shape: f32[1,128], index: 5, kind: input, shape index: {}]   ;;  %s6482_s6 = inlined_call_operand.vmem [shape: f32[1152,128], index: 6, kind: input, shape index: {}]   ;;  %s6483_s7 = inlined_call_operand.vmem [shape: f32[1,128], index: 7, kind: input, shape index: {}]   ;;  %s6484_s8 = inlined_call_operand.vmem [shape: f32[1,128], index: 8, kind: input, shape index: {}]   ;;  %s6485_s9 = inlined_call_operand.vmem [shape: f32[128,128], index: 9, kind: input, shape index: {}]   ;;  %s6486_s10 = inlined_call_operand.vmem [shape: f32[1,128], index: 10, kind: input, shape index: {}]   ;;  %s6487_s11 = inlined_call_operand.vmem [shape: f32[1,128], index: 11, kind: input, shape index: {}]   ;;  %s6488_s12 = inlined_call_operand.hbm [shape: f32[2,16,16,128], index: 12, kind: output, shape index: {}]  }
   0x1   :  { %6559 = sst [smem:[#allocation51_spill]] %s6476_s0 }
   0x2   :  { %6560 = sst [smem:[#allocation52_spill]] %s6479_s3 }
   0x3   :  { %17 = vsyncpa [#allocation3], 0 }
   0x4   :  { %19 = vsyncpa [#allocation3 + $0x1], 0  ;;  %s4293_s21 = smov 0   ;;  %s4295_s22 = smov 0  }
   0x5   :  { %s4297_s23 = smov 0   ;;  %s4299_s24 = smov 0  }
   0x6   :  { %s4301_s25 = smov 0   ;;  %s4303_s26 = smov 0  }
   0x7 LB: > { %6561 = sst [smem:[#allocation5_spill]] %s4218_s25  ;;  %s3569_s27 = sadd.s32 4294967295, %s4222_s26   ;;  %s4222_s26 = sphi %s4303_s26, %s25_s26   ;;  %s4218_s25 = sphi %s4301_s25, %s6659_s25   ;;  %s4214_s24 = sphi %s4299_s24, %s6658_s24   ;;  %s4210_s23 = sphi %s4297_s23, %s6662_s23   ;;  %s4206_s22 = sphi %s4295_s22, %s6661_s22   ;;  %s4202_s21 = sphi %s4293_s21, %s6660_s21  }
   0x8   : > { %s3570_s28 = sadd.s32 4294967294, %s4222_s26   ;;  %s37_s29 = sadd.s32 1, %s4218_s25 }
   0x9   : > { %s335_s30 = sadd.s32 1, %s4210_s23  ;;  %p39_p0 = scmp.ge.s32.totalorder %s37_s29, 2 }
   0xa   : > { %p345_p1 = scmp.ne.s32.totalorder %s4210_s23, %s4206_s22  ;;  %p346_p2 = scmp.eq.s32.totalorder %s3569_s27, 1 }
   0xb   : > { %p351_p3 = scmp.ne.s32.totalorder %s4206_s22, %s4202_s21  ;;  %s6664_s29 = smov (%p39_p0, %s37_s29), 0 }
   0xc   : > { %6562 = sst [smem:[#allocation6_spill]] %s6664_s29  ;;  %p4333_p4 = por %p346_p2, %p345_p1 }
   0xd   : > { %p352_p5 = scmp.eq.s32.totalorder %s3570_s28, 1  ;;  %s330_s14 = ssub.s32 %s4218_s25, %s6664_s29 }
   0xe   : > { %p3573_p6 = scmp.ge.s32.totalorder %s4222_s26, 1  ;;  %p333_p7 = scmp.eq.s32.totalorder %s330_s14, 0 }
   0xf   : > { %p4340_p8 = por %p352_p5, %p351_p3  ;;  %p451_p9 = scmp.lt.s32.totalorder %s4222_s26, 3 }
  0x10   : > { %s4346_s16 = scalar_select %p333_p7, %s4210_s23, %s335_s30  }
  0x11   : > { %p452_p10 = pnand %p3573_p6, %p451_p9 }
  0x13   : > { %455 = sbr.rel (%p452_p10) target bundleno = 968 (0x3c8), region = 68 }
  0x18   : > { %s6565_s3 = sld [smem:[#allocation52_spill]]  ;;  %p525_p11 = scmp.lt.s32.totalorder %s4214_s24, 1  ;;  %v6497_v1 = vmov 0.0   ;;  %vm603_vm0 = vcmask 64512   ;;  %v1713_v2 = vld [vmem:[%s6482_s6 + $0x78] sm:$0xff]  ;;  %v1712_v6 = vld [vmem:[%s6482_s6 + $0x70] sm:$0xff] }
  0x19   : > { %s6566_s0 = sld [smem:[#allocation51_spill]]  ;;  %v1711_v9 = vld [vmem:[%s6482_s6 + $0x68] sm:$0xff]  ;;  %v1710_v10 = vld [vmem:[%s6482_s6 + $0x60] sm:$0xff]  ;;  %v1709_v13 = vld [vmem:[%s6482_s6 + $0x58] sm:$0xff]  ;;  %vm1263_vm1 = vcmask 1040384   ;;  %vm1440_vm2 = vcmask 1046528  }
  0x1a   : > { %s526_s19 = scalar_select %p525_p11, %s4214_s24, 1  ;;  %v1708_v20 = vld [vmem:[%s6482_s6 + $0x50] sm:$0xff]  ;;  %v1745_v21 = vld [vmem:[%s6482_s6 + $0x178] sm:$0xff]  ;;  %v1707_v25 = vld [vmem:[%s6482_s6 + $0x48] sm:$0xff]  ;;  %vm1553_vm4 = vcmask 1045504  }
  0x1b   : > { %v1744_v24 = vld [vmem:[%s6482_s6 + $0x170] sm:$0xff]  ;;  %v1743_v26 = vld [vmem:[%s6482_s6 + $0x168] sm:$0xff]  ;;  %v1742_v29 = vld [vmem:[%s6482_s6 + $0x160] sm:$0xff]  ;;  %s521_s18 = sand.u32 1, %s4206_s22  }
  0x1c   : > { %s3724_s20 = sshll.u32 %s526_s19, 8  ;;  %v1706_v30 = vld [vmem:[%s6482_s6 + $0x40] sm:$0xff]  ;;  %v1741_v31 = vld [vmem:[%s6482_s6 + $0x158] sm:$0xff]  ;;  %v1740_v35 = vld [vmem:[%s6482_s6 + $0x150] sm:$0xff]  ;;  %s3574_s28 = sshll.u32 %s521_s18, 8 }
  0x1d   : > { %s3727_s14 = sadd.s32 240, %s3724_s20  ;;  %s547_s27 = scalar_lea.vmem %s6477_s1, %s3724_s20  ;;  %v1705_v34 = vld [vmem:[%s6482_s6 + $0x38] sm:$0xff]  ;;  %v1704_v36 = vld [vmem:[%s6482_s6 + $0x30] sm:$0xff]  ;;  %v1739_v38 = vld [vmem:[%s6482_s6 + $0x148] sm:$0xff] }
  0x1e   : > { %v602_v0 = vld [vmem:[%s6565_s3] sm:$0xff]  ;;  %s564_s29 = scalar_lea.vmem %s6478_s2, %s3727_s14  ;;  %v1036_v16 = vld [vmem:[%s547_s27 + $0x8] sm:$0xff]  ;;  %v1737_v45 = vld [vmem:[%s6482_s6 + $0x138] sm:$0xff]  ;;  %s3728_s3 = sshll.u32 %s4214_s24, 12 }
  0x1f   : > { %3865 = vmatprep.subr.mxu0 %v602_v0  ;;  %3915 = vmatprep.subr.mxu1 %v602_v0  ;;  %s4357_s30 = scalar_lea.vmem %s6566_s0, %s3724_s20  ;;  %v1035_v14 = vld [vmem:[%s547_s27] sm:$0xff]  ;;  %v1125_v19 = vld [vmem:[%s564_s29 + $0x8] sm:$0xff]  ;;  %v1701_v46 = vld [vmem:[%s6482_s6 + $0x18] sm:$0xff]  ;;  %s6325_s0 = scalar_lea.vmem [#allocation2], %s3574_s28 }
  0x20   : > { %3866 = vmatpush3.msra.mxu0 %v602_v0  ;;  %3916 = vmatpush3.msra.mxu1 %v602_v0  ;;  %v570_v3 = vld [vmem:[%s4357_s30] sm:$0xff]  ;;  %v571_v4 = vld [vmem:[%s4357_s30 + $0x8] sm:$0xff]  ;;  %v572_v5 = vld [vmem:[%s4357_s30 + $0x10] sm:$0xff]  ;;  %s3445_s25 = sshll.u32 %s6325_s0, 4  ;;  %s6422_s14 = scalar_lea.hbm %s6488_s12, %s3728_s3  ;;  %s6424_s25 = int_to_ptr.vmem [resolvable:$true] %s3445_s25 }
  0x21   : > { %1842 = vmatprep.subr.mxu0 %v6497_v1  ;;  %3920 = vmatprep.subr.mxu1 %v602_v0  ;;  %v573_v7 = vld [vmem:[%s4357_s30 + $0x18] sm:$0xff]  ;;  %v574_v8 = vld [vmem:[%s4357_s30 + $0x20] sm:$0xff]  ;;  %v575_v11 = vld [vmem:[%s4357_s30 + $0x28] sm:$0xff]  ;;  %s6431_s24 = scalar_lea.sflag [#allocation3], %s521_s18  ;;  %s4146_s19 = scalar_lea.vmem %s6424_s25, 4096 }
  0x22   : > { %3867 = vmatprep.mubr.msk.f32.mxu0 %vm603_vm0, %v570_v3  ;;  %v576_v12 = vld [vmem:[%s4357_s30 + $0x30] sm:$0xff]  ;;  %v577_v15 = vld [vmem:[%s4357_s30 + $0x38] sm:$0xff]  ;;  %3917 = vmatprep.mubr.msk.f32.mxu1 %vm603_vm0, %v1035_v14  ;;  %v1124_v17 = vld [vmem:[%s564_s29] sm:$0xff]  ;;  %p4147_p12 = scmp.ne.s32.totalorder %s6424_s25, %s4146_s19  ;;  %s4225_s27 = smov [#allocation2]  }
  0x23   : > { %3868 = vmatmul.mubr.msk.f32.vlgmr.msra.gmra.mxu0 %vm603_vm0, %v571_v4  ;;  %v578_v18 = vld [vmem:[%s4357_s30 + $0x40] sm:$0xff]  ;;  %3918 = vmatmul.mubr.msk.f32.vlgmr.msra.gmra.mxu1 %vm603_vm0, %v1036_v16  ;;  %v579_v22 = vld [vmem:[%s4357_s30 + $0x48] sm:$0xff]  ;;  %v580_v23 = vld [vmem:[%s4357_s30 + $0x50] sm:$0xff]  ;;  %s4150_s28 = sshll.u32 %s4225_s27, 4  ;;  %s4151_s28 = int_to_ptr.vmem [resolvable:$false] %s4150_s28 }
  0x24   : > { %3870 = vmatprep.mubr.msk.f32.mxu0 %vm603_vm0, %v572_v5  ;;  %1843 = vmatpush1.msra.mxu0 %v1713_v2  ;;  %v581_v27 = vld [vmem:[%s4357_s30 + $0x58] sm:$0xff]  ;;  %v582_v28 = vld [vmem:[%s4357_s30 + $0x60] sm:$0xff]  ;;  %v583_v32 = vld [vmem:[%s4357_s30 + $0x68] sm:$0xff]  ;;  %p4148_p13 = pnand %p4147_p12, %p4333_p4  ;;  %p4153_p1 = scmp.lt.s32.totalorder %s6424_s25, %s4151_s28 }
  0x25   : > { %1844 = vmatprep.subr.mxu0 %v6497_v1  ;;  %3921 = vmatpush3.msra.mxu1 %v602_v0  ;;  %v584_v33 = vld [vmem:[%s4357_s30 + $0x70] sm:$0xff]  ;;  %v585_v37 = vld [vmem:[%s4357_s30 + $0x78] sm:$0xff]  ;;  %v586_v39 = vld [vmem:[%s4357_s30 + $0x80] sm:$0xff] }
  0x26   : > { %1845 = vmatpush1.msra.mxu0 %v1712_v6  ;;  %3922 = vmatprep.mubr.msk.f32.mxu1 %vm603_vm0, %v1124_v17  ;;  %v1703_v40 = vld [vmem:[%s6482_s6 + $0x28] sm:$0xff]  ;;  %v1738_v41 = vld [vmem:[%s6482_s6 + $0x140] sm:$0xff]  ;;  %v588_v43 = vld [vmem:[%s4357_s30 + $0x90] sm:$0xff]  ;;  %p4149_p0 = pneg %p4148_p13 }
  0x27   : > { %3871 = vmatmul.mubr.msk.f32.gmra.mxu0 %vm603_vm0, %v573_v7  ;;  %1846 = vmatprep.subr.mxu0 %v6497_v1  ;;  %v587_v42 = vld [vmem:[%s4357_s30 + $0x88] sm:$0xff]  ;;  %v1702_v44 = vld [vmem:[%s6482_s6 + $0x20] sm:$0xff]  ;;  %v589_v47 = vld [vmem:[%s4357_s30 + $0x98] sm:$0xff] }
  0x28   : > { %3873 = vmatprep.mubr.msk.f32.mxu0 %vm603_vm0, %v574_v8  ;;  %1847 = vmatpush1.msra.mxu0 %v1711_v9  ;;  %v1736_v48 = vld [vmem:[%s6482_s6 + $0x130] sm:$0xff]  ;;  %v590_v49 = vld [vmem:[%s4357_s30 + $0xa0] sm:$0xff]  ;;  %v1735_v51 = vld [vmem:[%s6482_s6 + $0x128] sm:$0xff] }
  0x29   : > { %1848 = vmatprep.subr.mxu0 %v6497_v1  ;;  %2067 = vmatprep.subr.mxu1 %v6497_v1  ;;  %v1700_v50 = vld [vmem:[%s6482_s6 + $0x10] sm:$0xff]  ;;  %v591_v52 = vld [vmem:[%s4357_s30 + $0xa8] sm:$0xff]  ;;  %v1734_v55 = vld [vmem:[%s6482_s6 + $0x120] sm:$0xff] }
  0x2a   : > { %1849 = vmatpush1.msra.mxu0 %v1710_v10  ;;  %3923 = vmatmul.mubr.msk.f32.vlgmr.msra.gmra.mxu1 %vm603_vm0, %v1125_v19  ;;  %v592_v53 = vld [vmem:[%s4357_s30 + $0xb0] sm:$0xff]  ;;  %v1699_v54 = vld [vmem:[%s6482_s6 + $0x8] sm:$0xff]  ;;  %v1698_v56 = vld [vmem:[%s6482_s6] sm:$0xff] }
  0x2b   : > { %3874 = vmatmul.mubr.msk.f32.gmra.mxu0 %vm603_vm0, %v575_v11  ;;  %1850 = vmatprep.subr.mxu0 %v6497_v1  ;;  %v593_v57 = vld [vmem:[%s4357_s30 + $0xb8] sm:$0xff]  ;;  %v594_v59 = vld [vmem:[%s4357_s30 + $0xc0] sm:$0xff]  ;;  %v1732_v61 = vld [vmem:[%s6482_s6 + $0x110] sm:$0xff] }
  0x2c   : > { %3876 = vmatprep.mubr.msk.f32.mxu0 %vm603_vm0, %v576_v12  ;;  %1851 = vmatpush1.msra.mxu0 %v1709_v13  ;;  %v1733_v58 = vld [vmem:[%s6482_s6 + $0x118] sm:$0xff]  ;;  %v595_v62 = vld [vmem:[%s4357_s30 + $0xc8] sm:$0xff]  ;;  %v596_v63 = vld [vmem:[%s4357_s30 + $0xd0] sm:$0xff] }
  0x2d   : > { %1852 = vmatprep.subr.mxu0 %v6497_v1  ;;  %2068 = vmatpush1.msra.mxu1 %v1745_v21  ;;  %v1729_v60 = vld [vmem:[%s6482_s6 + $0xf8] sm:$0xff]  ;;  %v1728_v0 = vld [vmem:[%s6482_s6 + $0xf0] sm:$0xff]  ;;  %v1731_v2 = vld [vmem:[%s6482_s6 + $0x108] sm:$0xff] }
  0x2e   : > { %1853 = vmatpush1.msra.mxu0 %v1708_v20  ;;  %2069 = vmatprep.subr.mxu1 %v6497_v1  ;;  %v1727_v3 = vld [vmem:[%s6482_s6 + $0xe8] sm:$0xff]  ;;  %v597_v4 = vld [vmem:[%s4357_s30 + $0xd8] sm:$0xff]  ;;  %v1730_v5 = vld [vmem:[%s6482_s6 + $0x100] sm:$0xff] }
  0x2f   : > { %3877 = vmatmul.mubr.msk.f32.gmra.mxu0 %vm603_vm0, %v577_v15  ;;  %1854 = vmatprep.subr.mxu0 %v6497_v1  ;;  %v598_v6 = vld [vmem:[%s4357_s30 + $0xe0] sm:$0xff]  ;;  %v1761_v8 = vld [vmem:[%s6482_s6 + $0x1f8] sm:$0xff]  ;;  %v599_v9 = vld [vmem:[%s4357_s30 + $0xe8] sm:$0xff] }
  0x30   : > { %3879 = vmatprep.mubr.msk.f32.mxu0 %vm603_vm0, %v578_v18  ;;  %2070 = vmatpush1.msra.mxu1 %v1744_v24  ;;  %v1726_v7 = vld [vmem:[%s6482_s6 + $0xe0] sm:$0xff]  ;;  %v600_v10 = vld [vmem:[%s4357_s30 + $0xf0] sm:$0xff]  ;;  %v1725_v11 = vld [vmem:[%s6482_s6 + $0xd8] sm:$0xff]  ;;  %v4627_v24 = vrot.slane %v6497_v1, 7 }
  0x31   : > { %2071 = vmatprep.subr.mxu1 %v6497_v1  ;;  %1855 = vmatpush1.msra.mxu0 %v1707_v25  ;;  %v1760_v12 = vld [vmem:[%s6482_s6 + $0x1f0] sm:$0xff]  ;;  %v601_v14 = vld [vmem:[%s4357_s30 + $0xf8] sm:$0xff]  ;;  %v1759_v15 = vld [vmem:[%s6482_s6 + $0x1e8] sm:$0xff]  ;;  %s4152_s30 = scalar_lea.vmem %s4151_s28, 8192 }
  0x32   : > { %2072 = vmatpush1.msra.mxu1 %v1743_v26  ;;  %1856 = vmatprep.subr.mxu0 %v6497_v1  ;;  %v1724_v13 = vld [vmem:[%s6482_s6 + $0xd0] sm:$0xff]  ;;  %v1723_v16 = vld [vmem:[%s6482_s6 + $0xc8] sm:$0xff]  ;;  %v1758_v17 = vld [vmem:[%s6482_s6 + $0x1e0] sm:$0xff]  ;;  %6567 = vst [vmem:[#allocation7_spill] sm:$0xff] %v4627_v24  ;;  %p4154_p2 = scmp.lt.s32.totalorder %s4152_s30, %s4146_s19 }
  0x33   : > { %3880 = vmatmul.mubr.msk.f32.gmra.mxu0 %vm603_vm0, %v579_v22  ;;  %2073 = vmatprep.subr.mxu1 %v6497_v1  ;;  %v1722_v18 = vld [vmem:[%s6482_s6 + $0xc0] sm:$0xff]  ;;  %v1757_v19 = vld [vmem:[%s6482_s6 + $0x1d8] sm:$0xff]  ;;  %v1756_v21 = vld [vmem:[%s6482_s6 + $0x1d0] sm:$0xff] }
  0x34   : > { %3882 = vmatprep.mubr.msk.f32.mxu0 %vm603_vm0, %v580_v23  ;;  %2074 = vmatpush1.msra.mxu1 %v1742_v29  ;;  %v1721_v20 = vld [vmem:[%s6482_s6 + $0xb8] sm:$0xff]  ;;  %v1720_v22 = vld [vmem:[%s6482_s6 + $0xb0] sm:$0xff]  ;;  %v1755_v23 = vld [vmem:[%s6482_s6 + $0x1c8] sm:$0xff]  ;;  %v4647_v29 = vsel %vm1263_vm1, 0.0, %v4627_v24  ;;  %p4155_p3 = por %p4154_p2, %p4153_p1 }
  0x35   : > { %2075 = vmatprep.subr.mxu1 %v6497_v1  ;;  %1857 = vmatpush1.msra.mxu0 %v1706_v30  ;;  %v1719_v25 = vld [vmem:[%s6482_s6 + $0xa8] sm:$0xff]  ;;  %v1754_v26 = vld [vmem:[%s6482_s6 + $0x1c0] sm:$0xff]  ;;  %v1717_v30 = vld [vmem:[%s6482_s6 + $0x98] sm:$0xff] }
  0x36   : > { %2076 = vmatpush1.msra.mxu1 %v1741_v31  ;;  %1858 = vmatprep.subr.mxu0 %v6497_v1  ;;  %v1752_v31 = vld [vmem:[%s6482_s6 + $0x1b0] sm:$0xff]  ;;  %vm4692_vm3 = vmneg %vm1263_vm1  ;;  %p4156_p5 = pnand %p4155_p3, %p4149_p0 }
  0x37   : > { %3883 = vmatmul.mubr.msk.f32.gmra.mxu0 %vm603_vm0, %v581_v27  ;;  %2077 = vmatprep.subr.mxu1 %v6497_v1  ;;  %v1718_v27 = vld [vmem:[%s6482_s6 + $0xa0] sm:$0xff] }
  0x38   : > { %3885 = vmatprep.mubr.msk.f32.mxu0 %vm603_vm0, %v582_v28  ;;  %1859 = vmatpush1.msra.mxu0 %v1705_v34  ;;  %v1753_v28 = vld [vmem:[%s6482_s6 + $0x1b8] sm:$0xff]  ;;  %v1441_v34 = vrot.slane %v4647_v29, 1 }
  0x39   : > { %2078 = vmatpush1.msra.mxu1 %v1740_v35  ;;  %1860 = vmatprep.subr.mxu0 %v6497_v1  ;;  %v1442_v35 = vrot.slane %v4627_v24, 1 }
  0x3a   : > { %2079 = vmatprep.subr.mxu1 %v6497_v1  ;;  %1861 = vmatpush1.msra.mxu0 %v1704_v36  ;;  %v4669_v36 = vsel %vm1263_vm1, %v4627_v24, 0.0 }
  0x3b   : > { %3886 = vmatmul.mubr.msk.f32.gmra.mxu0 %vm603_vm0, %v583_v32  ;;  %2080 = vmatpush1.msra.mxu1 %v1739_v38  ;;  %v1716_v32 = vld [vmem:[%s6482_s6 + $0x90] sm:$0xff]  ;;  %v1750_v38 = vld [vmem:[%s6482_s6 + $0x1a0] sm:$0xff] }
  0x3c   : > { %3888 = vmatprep.mubr.msk.f32.mxu0 %vm603_vm0, %v584_v33  ;;  %1862 = vmatprep.subr.mxu0 %v6497_v1  ;;  %v1751_v33 = vld [vmem:[%s6482_s6 + $0x1a8] sm:$0xff] }
  0x3d   : > { %2081 = vmatprep.subr.mxu1 %v6497_v1  ;;  %1863 = vmatpush1.msra.mxu0 %v1703_v40  ;;  %v4685_v40 = vsel %vm1440_vm2, %v1441_v34, %v1442_v35 }
  0x3e   : > { %2082 = vmatpush1.msra.mxu1 %v1738_v41  ;;  %1864 = vmatprep.subr.mxu0 %v6497_v1  ;;  %6568 = vst [vmem:[#allocation8_spill] sm:$0xff] %v4685_v40  ;;  %v1444_v41 = vrot.slane %v4669_v36, 1 }
  0x3f   : > { %3889 = vmatmul.mubr.msk.f32.gmra.mxu0 %vm603_vm0, %v585_v37  ;;  %2083 = vmatprep.subr.mxu1 %v6497_v1  ;;  %v1715_v37 = vld [vmem:[%s6482_s6 + $0x88] sm:$0xff] }
  0x40   : > { %3891 = vmatprep.mubr.msk.f32.mxu0 %vm603_vm0, %v586_v39  ;;  %1865 = vmatpush1.msra.mxu0 %v1702_v44  ;;  %v1714_v39 = vld [vmem:[%s6482_s6 + $0x80] sm:$0xff]  ;;  %v1748_v44 = vld [vmem:[%s6482_s6 + $0x190] sm:$0xff] }
  0x41   : > { %2084 = vmatpush1.msra.mxu1 %v1737_v45  ;;  %1866 = vmatprep.subr.mxu0 %v6497_v1  ;;  %v1777_v45 = vld [vmem:[%s6482_s6 + $0x278] sm:$0xff] }
  0x42   : > { %2085 = vmatprep.subr.mxu1 %v6497_v1  ;;  %1867 = vmatpush1.msra.mxu0 %v1701_v46  ;;  %v4709_v46 = vsel %vm1440_vm2, %v1442_v35, %v1444_v41 }
  0x43   : > { %3892 = vmatmul.mubr.msk.f32.gmra.mxu0 %vm603_vm0, %v587_v42  ;;  %2086 = vmatpush1.msra.mxu1 %v1736_v48  ;;  %v1749_v42 = vld [vmem:[%s6482_s6 + $0x198] sm:$0xff]  ;;  %6571 = vst [vmem:[#allocation9_spill] sm:$0xff] %v4709_v46  ;;  %v1746_v48 = vld [vmem:[%s6482_s6 + $0x180] sm:$0xff] }
  0x44   : > { %3894 = vmatprep.mubr.msk.f32.mxu0 %vm603_vm0, %v588_v43  ;;  %1868 = vmatprep.subr.mxu0 %v6497_v1 }
  0x45   : > { %2087 = vmatprep.subr.mxu1 %v6497_v1  ;;  %1869 = vmatpush1.msra.mxu0 %v1700_v50  ;;  %v1775_v50 = vld [vmem:[%s6482_s6 + $0x268] sm:$0xff] }
  0x46   : > { %2088 = vmatpush1.msra.mxu1 %v1735_v51  ;;  %1870 = vmatprep.subr.mxu0 %v6497_v1  ;;  %v1774_v51 = vld [vmem:[%s6482_s6 + $0x260] sm:$0xff] }
  0x47   : > { %3895 = vmatmul.mubr.msk.f32.gmra.mxu0 %vm603_vm0, %v589_v47  ;;  %2089 = vmatprep.subr.mxu1 %v6497_v1  ;;  %v1747_v47 = vld [vmem:[%s6482_s6 + $0x188] sm:$0xff] }
  0x48   : > { %3897 = vmatprep.mubr.msk.f32.mxu0 %vm603_vm0, %v590_v49  ;;  %1871 = vmatpush1.msra.mxu0 %v1699_v54  ;;  %v1776_v49 = vld [vmem:[%s6482_s6 + $0x270] sm:$0xff]  ;;  %v1771_v54 = vld [vmem:[%s6482_s6 + $0x248] sm:$0xff] }
  0x49   : > { %2090 = vmatpush1.msra.mxu1 %v1734_v55  ;;  %1872 = vmatprep.subr.mxu0 %v6497_v1  ;;  %v1770_v55 = vld [vmem:[%s6482_s6 + $0x240] sm:$0xff] }
  0x4a   : > { %2091 = vmatprep.subr.mxu1 %v6497_v1  ;;  %1873 = vmatpush1.msra.mxu0 %v1698_v56  ;;  %v1769_v56 = vld [vmem:[%s6482_s6 + $0x238] sm:$0xff] }
  0x4b   : > { %3898 = vmatmul.mubr.msk.f32.gmra.mxu0 %vm603_vm0, %v591_v52  ;;  %2092 = vmatpush1.msra.mxu1 %v1733_v58  ;;  %v1773_v52 = vld [vmem:[%s6482_s6 + $0x258] sm:$0xff]  ;;  %v1767_v58 = vld [vmem:[%s6482_s6 + $0x228] sm:$0xff] }
  0x4c   : > { %3900 = vmatprep.mubr.msk.f32.mxu0 %vm603_vm0, %v592_v53  ;;  %1874 = vmatprep.subr.mxu0 %v6497_v1  ;;  %v1772_v53 = vld [vmem:[%s6482_s6 + $0x250] sm:$0xff] }
  0x4d   : > { %2093 = vmatprep.subr.mxu1 %v6497_v1  ;;  %1875 = vmatpush2.msra.mxu0 %v1729_v60  ;;  %v1765_v60 = vld [vmem:[%s6482_s6 + $0x218] sm:$0xff] }
  0x4e   : > { %2094 = vmatpush1.msra.mxu1 %v1732_v61  ;;  %1876 = vmatprep.subr.mxu0 %v6497_v1  ;;  %v1764_v61 = vld [vmem:[%s6482_s6 + $0x210] sm:$0xff] }
  0x4f   : > { %3901 = vmatmul.mubr.msk.f32.gmra.mxu0 %vm603_vm0, %v593_v57  ;;  %2095 = vmatprep.subr.mxu1 %v6497_v1  ;;  %v1768_v57 = vld [vmem:[%s6482_s6 + $0x230] sm:$0xff] }
  0x50   : > { %3903 = vmatprep.mubr.msk.f32.mxu0 %vm603_vm0, %v594_v59  ;;  %1877 = vmatpush2.msra.mxu0 %v1728_v0  ;;  %v1766_v59 = vld [vmem:[%s6482_s6 + $0x220] sm:$0xff]  ;;  %v1793_v0 = vld [vmem:[%s6482_s6 + $0x2f8] sm:$0xff] }
  0x51   : > { %2096 = vmatpush1.msra.mxu1 %v1731_v2  ;;  %1878 = vmatprep.subr.mxu0 %v6497_v1  ;;  %v1792_v2 = vld [vmem:[%s6482_s6 + $0x2f0] sm:$0xff] }
  0x52   : > { %2097 = vmatprep.subr.mxu1 %v6497_v1  ;;  %1879 = vmatpush2.msra.mxu0 %v1727_v3  ;;  %v1791_v3 = vld [vmem:[%s6482_s6 + $0x2e8] sm:$0xff] }
  0x53   : > { %3904 = vmatmul.mubr.msk.f32.gmra.mxu0 %vm603_vm0, %v595_v62  ;;  %2098 = vmatpush1.msra.mxu1 %v1730_v5  ;;  %v1763_v62 = vld [vmem:[%s6482_s6 + $0x208] sm:$0xff]  ;;  %v1789_v5 = vld [vmem:[%s6482_s6 + $0x2d8] sm:$0xff] }
  0x54   : > { %3906 = vmatprep.mubr.msk.f32.mxu0 %vm603_vm0, %v596_v63  ;;  %1880 = vmatprep.subr.mxu0 %v6497_v1  ;;  %v1762_v63 = vld [vmem:[%s6482_s6 + $0x200] sm:$0xff] }
  0x55   : > { %2099 = vmatprep.subr.mxu1 %v6497_v1  ;;  %1881 = vmatpush2.msra.mxu0 %v1726_v7  ;;  %v1787_v7 = vld [vmem:[%s6482_s6 + $0x2c8] sm:$0xff] }
  0x56   : > { %2100 = vmatpush2.msra.mxu1 %v1761_v8  ;;  %1882 = vmatprep.subr.mxu0 %v6497_v1  ;;  %v1786_v8 = vld [vmem:[%s6482_s6 + $0x2c0] sm:$0xff] }
  0x57   : > { %3907 = vmatmul.mubr.msk.f32.gmra.mxu0 %vm603_vm0, %v597_v4  ;;  %2101 = vmatprep.subr.mxu1 %v6497_v1  ;;  %v1790_v4 = vld [vmem:[%s6482_s6 + $0x2e0] sm:$0xff] }
  0x58   : > { %3909 = vmatprep.mubr.msk.f32.mxu0 %vm603_vm0, %v598_v6  ;;  %1883 = vmatpush2.msra.mxu0 %v1725_v11  ;;  %v1788_v6 = vld [vmem:[%s6482_s6 + $0x2d0] sm:$0xff]  ;;  %v1783_v11 = vld [vmem:[%s6482_s6 + $0x2a8] sm:$0xff] }
  0x59   : > { %2102 = vmatpush2.msra.mxu1 %v1760_v12  ;;  %1884 = vmatprep.subr.mxu0 %v6497_v1  ;;  %v1782_v12 = vld [vmem:[%s6482_s6 + $0x2a0] sm:$0xff] }
  0x5a   : > { %2103 = vmatprep.subr.mxu1 %v6497_v1  ;;  %1885 = vmatpush2.msra.mxu0 %v1724_v13  ;;  %v1781_v13 = vld [vmem:[%s6482_s6 + $0x298] sm:$0xff] }
  0x5b   : > { %3910 = vmatmul.mubr.msk.f32.gmra.mxu0 %vm603_vm0, %v599_v9  ;;  %2104 = vmatpush2.msra.mxu1 %v1759_v15  ;;  %v1785_v9 = vld [vmem:[%s6482_s6 + $0x2b8] sm:$0xff]  ;;  %v4843_v15 = vld [vmem:[%s6480_s4] ss:$0 sm:$0xff] }
  0x5c   : > { %3912 = vmatprep.mubr.msk.f32.mxu0 %vm603_vm0, %v600_v10  ;;  %1886 = vmatprep.subr.mxu0 %v6497_v1  ;;  %v1784_v10 = vld [vmem:[%s6482_s6 + $0x2b0] sm:$0xff] }
  0x5d   : > { %2105 = vmatprep.subr.mxu1 %v6497_v1  ;;  %1887 = vmatpush2.msra.mxu0 %v1723_v16 }
  0x5e   : > { %2106 = vmatpush2.msra.mxu1 %v1758_v17  ;;  %1888 = vmatprep.subr.mxu0 %v6497_v1  ;;  %v4849_v17 = vld [vmem:[%s6481_s5] ss:$0 sm:$0xff] }
  0x5f   : > { %3913 = vmatmul.mubr.msk.f32.gmra.mxu0 %vm603_vm0, %v601_v14  ;;  %2107 = vmatprep.subr.mxu1 %v6497_v1  ;;  %v1780_v14 = vld [vmem:[%s6482_s6 + $0x290] sm:$0xff] }
  0x60   : > { %1889 = vmatpush2.msra.mxu0 %v1722_v18  ;;  %2108 = vmatpush2.msra.mxu1 %v1757_v19  ;;  %v1779_v18 = vld [vmem:[%s6482_s6 + $0x288] sm:$0xff] }
  0x61   : > { %1890 = vmatprep.subr.mxu0 %v6497_v1  ;;  %2109 = vmatprep.subr.mxu1 %v6497_v1 }
  0x62   : > { %1891 = vmatpush2.msra.mxu0 %v1721_v20  ;;  %2110 = vmatpush2.msra.mxu1 %v1756_v21 }
  0x63   : > { %1892 = vmatprep.subr.mxu0 %v6497_v1  ;;  %2111 = vmatprep.subr.mxu1 %v6497_v1 }
  0x64   : > { %1893 = vmatpush2.msra.mxu0 %v1720_v22  ;;  %2112 = vmatpush2.msra.mxu1 %v1755_v23 }
  0x65   : > { %1894 = vmatprep.subr.mxu0 %v6497_v1  ;;  %2113 = vmatprep.subr.mxu1 %v6497_v1 }
  0x66   : > { %1895 = vmatpush2.msra.mxu0 %v1719_v25  ;;  %2114 = vmatpush2.msra.mxu1 %v1754_v26  ;;  %v1554_v25 = vrot.slane %v4647_v29, 2  ;;  %v1778_v26 = vld [vmem:[%s6482_s6 + $0x280] sm:$0xff]  ;;  %v1557_v29 = vrot.slane %v4669_v36, 2 }
  0x67   : > { %1896 = vmatprep.subr.mxu0 %v6497_v1  ;;  %2115 = vmatprep.subr.mxu1 %v6497_v1 }
  0x68   : > { %1897 = vmatpush2.msra.mxu0 %v1718_v27  ;;  %2116 = vmatpush2.msra.mxu1 %v1753_v28 }
  0x69   : > { %1898 = vmatprep.subr.mxu0 %v6497_v1  ;;  %2117 = vmatprep.subr.mxu1 %v6497_v1 }
  0x6a   : > { %1899 = vmatpush2.msra.mxu0 %v1717_v30  ;;  %2118 = vmatpush2.msra.mxu1 %v1752_v31  ;;  %v1555_v31 = vrot.slane %v4627_v24, 2 }
  0x6b   : > { %1900 = vmatprep.subr.mxu0 %v6497_v1  ;;  %2119 = vmatprep.subr.mxu1 %v6497_v1 }
  0x6c   : > { %1901 = vmatpush2.msra.mxu0 %v1716_v32  ;;  %2120 = vmatpush2.msra.mxu1 %v1751_v33  ;;  %v1841_v32 = vld [vmem:[%s6482_s6 + $0x478] sm:$0xff] }
  0x6d   : > { %1902 = vmatprep.subr.mxu0 %v6497_v1  ;;  %2121 = vmatprep.subr.mxu1 %v6497_v1 }
  0x6e   : > { %1903 = vmatpush2.msra.mxu0 %v1715_v37  ;;  %2122 = vmatpush2.msra.mxu1 %v1750_v38 }
  0x6f   : > { %1904 = vmatprep.subr.mxu0 %v6497_v1  ;;  %2123 = vmatprep.subr.mxu1 %v6497_v1 }
  0x70   : > { %1905 = vmatpush2.msra.mxu0 %v1714_v39  ;;  %1906 = vmatprep.mubr.f32.mxu0 %v4685_v40 }
  0x71   : > { %2124 = vmatpush2.msra.mxu1 %v1749_v42  ;;  %3620 = vmatmul.mubr.msk.f32.vlgmr.msra.gmra.mxu0 %vm4692_vm3, %v4627_v24 }
  0x72   : > { %2125 = vmatprep.subr.mxu1 %v6497_v1  ;;  %2292 = vmatprep.subr.mxu0 %v6497_v1 }
  0x73   : > { %2126 = vmatpush2.msra.mxu1 %v1748_v44  ;;  %2293 = vmatpush1.msra.mxu0 %v1777_v45  ;;  %v4873_v45 = vsel %vm1553_vm4, %v1554_v25, %v1555_v31 }
  0x74   : > { %2127 = vmatprep.subr.mxu1 %v6497_v1  ;;  %1911 = vmatprep.mubr.f32.mxu0 %v4709_v46  ;;  %6572 = vst [vmem:[#allocation10_spill] sm:$0xff] %v4873_v45 }
  0x75   : > { %2128 = vmatpush2.msra.mxu1 %v1747_v47  ;;  %1912 = vmatmul.mubr.f32.gmra.mxu0 %v4627_v24 }
  0x76   : > { %2129 = vmatprep.subr.mxu1 %v6497_v1  ;;  %2294 = vmatprep.subr.mxu0 %v6497_v1 }
  0x77   : > { %2130 = vmatpush2.msra.mxu1 %v1746_v48  ;;  %2295 = vmatpush1.msra.mxu0 %v1776_v49  ;;  %v4880_v49 = vsel %vm1553_vm4, %v1555_v31, %v1557_v29 }
  0x78   : > { %2296 = vmatprep.subr.mxu0 %v6497_v1  ;;  %2517 = vmatprep.subr.mxu1 %v6497_v1  ;;  %6573 = vst [vmem:[#allocation11_spill] sm:$0xff] %v4880_v49 }
  0x79   : > { %2297 = vmatpush1.msra.mxu0 %v1775_v50  ;;  %v1809_v50 = vld [vmem:[%s6482_s6 + $0x378] sm:$0xff] }
  0x7a   : > { %2298 = vmatprep.subr.mxu0 %v6497_v1 }
  0x7b   : > { %2299 = vmatpush1.msra.mxu0 %v1774_v51 }
  0x7c   : > { %2300 = vmatprep.subr.mxu0 %v6497_v1 }
  0x7d   : > { %2301 = vmatpush1.msra.mxu0 %v1773_v52 }
  0x7e   : > { %2302 = vmatprep.subr.mxu0 %v6497_v1 }
  0x7f   : > { %2303 = vmatpush1.msra.mxu0 %v1772_v53 }
  0x80   : > { %2304 = vmatprep.subr.mxu0 %v6497_v1 }
  0x81   : > { %2305 = vmatpush1.msra.mxu0 %v1771_v54 }
  0x82   : > { %2306 = vmatprep.subr.mxu0 %v6497_v1 }
  0x83   : > { %2307 = vmatpush1.msra.mxu0 %v1770_v55 }
  0x84   : > { %2308 = vmatprep.subr.mxu0 %v6497_v1 }
  0x85   : > { %2309 = vmatpush1.msra.mxu0 %v1769_v56 }
  0x86   : > { %2310 = vmatprep.subr.mxu0 %v6497_v1 }
  0x87   : > { %2311 = vmatpush1.msra.mxu0 %v1768_v57 }
  0x88   : > { %2312 = vmatprep.subr.mxu0 %v6497_v1 }
  0x89   : > { %2313 = vmatpush1.msra.mxu0 %v1767_v58 }
  0x8a   : > { %2314 = vmatprep.subr.mxu0 %v6497_v1 }
  0x8b   : > { %2315 = vmatpush1.msra.mxu0 %v1766_v59 }
  0x8c   : > { %2316 = vmatprep.subr.mxu0 %v6497_v1 }
  0x8d   : > { %2317 = vmatpush1.msra.mxu0 %v1765_v60 }
  0x8e   : > { %2318 = vmatprep.subr.mxu0 %v6497_v1 }
  0x8f   : > { %2319 = vmatpush1.msra.mxu0 %v1764_v61  ;;  %v1808_v61 = vld [vmem:[%s6482_s6 + $0x370] sm:$0xff] }
  0x90   : > { %2320 = vmatprep.subr.mxu0 %v6497_v1 }
  0x91   : > { %2321 = vmatpush1.msra.mxu0 %v1763_v62 }
  0x92   : > { %2322 = vmatprep.subr.mxu0 %v6497_v1 }
  0x93   : > { %2323 = vmatpush1.msra.mxu0 %v1762_v63 }
  0x94   : > { %2324 = vmatprep.subr.mxu0 %v6497_v1 }
  0x95   : > { %2325 = vmatpush2.msra.mxu0 %v1793_v0 }
  0x96   : > { %2326 = vmatprep.subr.mxu0 %v6497_v1 }
  0x97   : > { %2327 = vmatpush2.msra.mxu0 %v1792_v2 }
  0x98   : > { %2328 = vmatprep.subr.mxu0 %v6497_v1 }
  0x99   : > { %2329 = vmatpush2.msra.mxu0 %v1791_v3 }
  0x9a   : > { %2330 = vmatprep.subr.mxu0 %v6497_v1 }
  0x9b   : > { %2331 = vmatpush2.msra.mxu0 %v1790_v4 }
  0x9c   : > { %2332 = vmatprep.subr.mxu0 %v6497_v1 }
  0x9d   : > { %2333 = vmatpush2.msra.mxu0 %v1789_v5 }
  0x9e   : > { %2334 = vmatprep.subr.mxu0 %v6497_v1 }
  0x9f   : > { %2335 = vmatpush2.msra.mxu0 %v1788_v6 }
  0xa0   : > { %2336 = vmatprep.subr.mxu0 %v6497_v1 }
  0xa1   : > { %2337 = vmatpush2.msra.mxu0 %v1787_v7 }
  0xa2   : > { %2338 = vmatprep.subr.mxu0 %v6497_v1 }
  0xa3   : > { %2339 = vmatpush2.msra.mxu0 %v1786_v8 }
  0xa4   : > { %2340 = vmatprep.subr.mxu0 %v6497_v1 }
  0xa5   : > { %2341 = vmatpush2.msra.mxu0 %v1785_v9 }
  0xa6   : > { %2342 = vmatprep.subr.mxu0 %v6497_v1 }
  0xa7   : > { %2343 = vmatpush2.msra.mxu0 %v1784_v10 }
  0xa8   : > { %2344 = vmatprep.subr.mxu0 %v6497_v1 }
  0xa9   : > { %2345 = vmatpush2.msra.mxu0 %v1783_v11 }
  0xaa   : > { %2346 = vmatprep.subr.mxu0 %v6497_v1 }
  0xab   : > { %2347 = vmatpush2.msra.mxu0 %v1782_v12 }
  0xac   : > { %2348 = vmatprep.subr.mxu0 %v6497_v1 }
  0xad   : > { %2349 = vmatpush2.msra.mxu0 %v1781_v13 }
  0xae   : > { %2350 = vmatprep.subr.mxu0 %v6497_v1 }
  0xaf   : > { %2351 = vmatpush2.msra.mxu0 %v1780_v14 }
  0xb0   : > { %2352 = vmatprep.subr.mxu0 %v6497_v1 }
  0xb1   : > { %2353 = vmatpush2.msra.mxu0 %v1779_v18 }
  0xb2   : > { %2354 = vmatprep.subr.mxu0 %v6497_v1 }
  0xb3   : > { %2355 = vmatpush2.msra.mxu0 %v1778_v26 }
  0xb4   : > { %3925 = vmatprep.subr.mxu0 %v1841_v32 }
  0xe3   : > { %v3869_v16 = vpop.f32.mrf.mxu0  ;;  %v3919_v51 = vpop.f32.mrf.mxu1 }
  0xe4   : > { %v933_v19 = vmul.f32 %v3869_v16, %v4843_v15 }
  0xe5   : > { %v766_v20 = vpop.f32.mrf.mxu0  ;;  %v1109_v62 = vpop.f32.mrf.mxu1 }
  0xe6   : > { %v972_v21 = vadd.f32 %v4849_v17, %v933_v19  ;;  %v932_v22 = vmul.f32 %v4843_v15, %v766_v20 }
  0xe7   : > { %v3872_v23 = vpop.f32.mrf.mxu0 }
  0xe8   : > { %v1004_v27 = vmax.f32 %v972_v21, 0.0  ;;  %v971_v28 = vadd.f32 %v4849_v17, %v932_v22  ;;  %v935_v30 = vmul.f32 %v3872_v23, %v4843_v15  ;;  %v1807_v21 = vld [vmem:[%s6482_s6 + $0x368] sm:$0xff] }
  0xe9   : > { %v776_v33 = vpop.f32.mrf.mxu0 }
  0xea   : > { %v1268_v34 = vrot.slane %v1004_v27, 7  ;;  %v1003_v35 = vmax.f32 %v971_v28, 0.0  ;;  %v974_v37 = vadd.f32 %v4849_v17, %v935_v30  ;;  %v934_v38 = vmul.f32 %v4843_v15, %v776_v33  ;;  %v3924_v9 = vpop.f32.mrf.mxu1 }
  0xeb   : > { %v3875_v39 = vpop.f32.mrf.mxu0 }
  0xec   : > { %v1267_v41 = vrot.slane %v1003_v35, 7  ;;  %v1006_v42 = vmax.f32 %v974_v37, 0.0  ;;  %v973_v44 = vadd.f32 %v4849_v17, %v934_v38  ;;  %v4876_v47 = vsel %vm1263_vm1, %v1268_v34, 0.0  ;;  %v1198_v22 = vpop.f32.mrf.mxu1 }
  0xed   : > { %v937_v36 = vmul.f32 %v3875_v39, %v4843_v15  ;;  %v786_v48 = vpop.f32.mrf.mxu0  ;;  %v1449_v2 = vrot.slane %v4876_v47, 1  ;;  %v1806_v39 = vld [vmem:[%s6482_s6 + $0x360] sm:$0xff] }
  0xee   : > { %v1271_v52 = vrot.slane %v1006_v42, 7  ;;  %v1005_v53 = vmax.f32 %v973_v44, 0.0  ;;  %3652 = vmatprep.mubr.msk.f32.mxu1 %vm4692_vm3, %v1267_v41  ;;  %v4888_v54 = vsel %vm1263_vm1, %v1267_v41, %v1268_v34  ;;  %v1373_v55 = vsel %vm1263_vm1, 0.0, %v1267_v41 }
  0xef   : > { %2132 = vmatmul.mubr.f32.vlgmr.msra.gmra.mxu1 %v4873_v45  ;;  %v976_v56 = vadd.f32 %v4849_v17, %v937_v36  ;;  %v1446_v57 = vrot.slane %v1373_v55, 1  ;;  %v1447_v58 = vrot.slane %v4888_v54, 1  ;;  %v936_v59 = vmul.f32 %v4843_v15, %v786_v48  ;;  %v3878_v60 = vpop.f32.mrf.mxu0 }
  0xf0   : > { %v4899_v63 = vsel %vm1263_vm1, %v1271_v52, 0.0  ;;  %v4901_v0 = vrot.slane %v1005_v53, 7  ;;  %2136 = vmatprep.mubr.f32.mxu1 %v4888_v54  ;;  %v1559_v3 = vrot.slane %v1373_v55, 2  ;;  %2518 = vmatpush1.msra.mxu1 %v1809_v50  ;;  %v1560_v7 = vrot.slane %v4888_v54, 2 }
  0xf1   : > { %v1008_v4 = vmax.f32 %v976_v56, 0.0  ;;  %v4906_v5 = vsel %vm1440_vm2, %v1446_v57, %v1447_v58  ;;  %v975_v6 = vadd.f32 %v4849_v17, %v936_v59  ;;  %v796_v8 = vpop.f32.mrf.mxu0  ;;  %2519 = vmatprep.subr.mxu1 %v6497_v1  ;;  %v4913_v10 = vsel %vm1440_vm2, %v1447_v58, %v1449_v2  ;;  %v1805_v58 = vld [vmem:[%s6482_s6 + $0x358] sm:$0xff] }
  0xf2   : > { %1916 = vmatprep.mubr.f32.mxu0 %v4906_v5  ;;  %v4917_v11 = vsel %vm1263_vm1, %v4901_v0, %v1271_v52  ;;  %v1374_v12 = vsel %vm1263_vm1, 0.0, %v4901_v0  ;;  %v939_v13 = vmul.f32 %v3878_v60, %v4843_v15  ;;  %2520 = vmatpush1.msra.mxu1 %v1808_v61  ;;  %v938_v25 = vmul.f32 %v4843_v15, %v796_v8 }
  0xf3   : > { %v1274_v14 = vrot.slane %v1008_v4, 7  ;;  %v1007_v16 = vmax.f32 %v975_v6, 0.0  ;;  %3622 = vmatmul.mubr.msk.f32.gmra.mxu0 %vm4692_vm3, %v1267_v41  ;;  %2137 = vmatmul.mubr.f32.gmra.mxu1 %v4880_v49  ;;  %v1451_v18 = vrot.slane %v1374_v12, 1  ;;  %v1452_v19 = vrot.slane %v4917_v11, 1  ;;  %v3881_v20 = vpop.f32.mrf.mxu0 }
  0xf4   : > { %1921 = vmatprep.mubr.f32.mxu0 %v4913_v10  ;;  %3654 = vmatprep.mubr.msk.f32.mxu1 %vm4692_vm3, %v4901_v0  ;;  %v978_v23 = vadd.f32 %v4849_v17, %v939_v13  ;;  %v4942_v30 = vsel %vm1553_vm4, %v1559_v3, %v1560_v7  ;;  %v977_v32 = vadd.f32 %v4849_v17, %v938_v25  ;;  %v1454_v33 = vrot.slane %v4899_v63, 1  ;;  %v1804_v13 = vld [vmem:[%s6482_s6 + $0x350] sm:$0xff] }
  0xf5   : > { %v4935_v26 = vrot.slane %v1007_v16, 7  ;;  %v4938_v27 = vsel %vm1440_vm2, %v1451_v18, %v1452_v19  ;;  %v806_v28 = vpop.f32.mrf.mxu0  ;;  %2521 = vmatprep.subr.mxu1 %v6497_v1  ;;  %v941_v35 = vmul.f32 %v3881_v20, %v4843_v15  ;;  %v1562_v42 = vrot.slane %v4876_v47, 2 }
  0xf6   : > { %v1010_v31 = vmax.f32 %v978_v23, 0.0  ;;  %2522 = vmatpush1.msra.mxu1 %v1807_v21  ;;  %v940_v37 = vmul.f32 %v4843_v15, %v806_v28  ;;  %v1009_v41 = vmax.f32 %v977_v32, 0.0  ;;  %v1564_v44 = vrot.slane %v1374_v12, 2  ;;  %v1803_v32 = vld [vmem:[%s6482_s6 + $0x348] sm:$0xff] }
  0xf7   : > { %1922 = vmatmul.mubr.f32.gmra.mxu0 %v4888_v54  ;;  %2142 = vmatmul.mubr.f32.gmra.mxu1 %v4942_v30  ;;  %v4950_v29 = vsel %vm1263_vm1, %v4935_v26, %v1274_v14  ;;  %v4954_v34 = vsel %vm1263_vm1, 0.0, %v4935_v26  ;;  %v3884_v38 = vpop.f32.mrf.mxu0  ;;  %v1565_v36 = vrot.slane %v4917_v11, 2  ;;  %v980_v51 = vadd.f32 %v4849_v17, %v941_v35 }
  0xf8   : > { %1926 = vmatprep.mubr.f32.mxu0 %v4938_v27  ;;  %2146 = vmatprep.mubr.f32.mxu1 %v4917_v11  ;;  %v1456_v48 = vrot.slane %v4954_v34, 1  ;;  %v1457_v50 = vrot.slane %v4950_v29, 1  ;;  %v979_v52 = vadd.f32 %v4849_v17, %v940_v37  ;;  %v1277_v54 = vrot.slane %v1010_v31, 7 }
  0xf9   : > { %v816_v53 = vpop.f32.mrf.mxu0  ;;  %2523 = vmatprep.subr.mxu1 %v6497_v1  ;;  %v4970_v55 = vrot.slane %v1009_v41, 7  ;;  %v4973_v56 = vsel %vm1553_vm4, %v1560_v7, %v1562_v42  ;;  %v4980_v47 = vsel %vm1440_vm2, %v1452_v19, %v1454_v33  ;;  %v4986_v59 = vsel %vm1263_vm1, %v1274_v14, 0.0 }
  0xfa   : > { %2524 = vmatpush1.msra.mxu1 %v1806_v39  ;;  %v4993_v60 = vsel %vm1553_vm4, %v1564_v44, %v1565_v36  ;;  %v4996_v61 = vsel %vm1440_vm2, %v1456_v48, %v1457_v50  ;;  %v1012_v62 = vmax.f32 %v980_v51, 0.0  ;;  %v1011_v2 = vmax.f32 %v979_v52, 0.0  ;;  %v1802_v51 = vld [vmem:[%s6482_s6 + $0x340] sm:$0xff] }
  0xfb   : > { %3624 = vmatmul.mubr.msk.f32.gmra.mxu0 %vm4692_vm3, %v4901_v0  ;;  %2147 = vmatmul.mubr.f32.gmra.mxu1 %v4973_v56  ;;  %v3887_v57 = vpop.f32.mrf.mxu0  ;;  %v1567_v3 = vrot.slane %v4899_v63, 2  ;;  %v5002_v6 = vsel %vm1263_vm1, %v4970_v55, %v1277_v54  ;;  %v5006_v7 = vsel %vm1263_vm1, 0.0, %v4970_v55  ;;  %v943_v8 = vmul.f32 %v3884_v38, %v4843_v15 }
  0xfc   : > { %1931 = vmatprep.mubr.f32.mxu0 %v4980_v47  ;;  %3656 = vmatprep.mubr.msk.f32.mxu1 %vm4692_vm3, %v4935_v26  ;;  %v942_v9 = vmul.f32 %v4843_v15, %v816_v53  ;;  %v1459_v63 = vrot.slane %v4986_v59, 1  ;;  %v1569_v14 = vrot.slane %v4954_v34, 2  ;;  %v1570_v18 = vrot.slane %v4950_v29, 2 }
  0xfd   : > { %v826_v4 = vpop.f32.mrf.mxu0  ;;  %2525 = vmatprep.subr.mxu1 %v6497_v1  ;;  %v5022_v16 = vsel %vm1553_vm4, %v1565_v36, %v1567_v3  ;;  %v1461_v19 = vrot.slane %v5006_v7, 1  ;;  %v1462_v20 = vrot.slane %v5002_v6, 1  ;;  %v1280_v21 = vrot.slane %v1012_v62, 7 }
  0xfe   : > { %2526 = vmatpush1.msra.mxu1 %v1805_v58  ;;  %v5028_v22 = vrot.slane %v1011_v2, 7  ;;  %v982_v23 = vadd.f32 %v4849_v17, %v943_v8  ;;  %v981_v25 = vadd.f32 %v4849_v17, %v942_v9  ;;  %v5037_v31 = vsel %vm1440_vm2, %v1457_v50, %v1459_v63  ;;  %v1801_v9 = vld [vmem:[%s6482_s6 + $0x338] sm:$0xff] }
  0xff   : > { %1932 = vmatmul.mubr.f32.gmra.mxu0 %v4917_v11  ;;  %2152 = vmatmul.mubr.f32.gmra.mxu1 %v4993_v60  ;;  %v5013_v12 = vpop.f32.mrf.mxu0  ;;  %v5043_v33 = vsel %vm1263_vm1, %v1277_v54, 0.0  ;;  %v945_v34 = vmul.f32 %v3887_v57, %v4843_v15  ;;  %v5053_v37 = vsel %vm1553_vm4, %v1569_v14, %v1570_v18  ;;  %v5056_v38 = vsel %vm1440_vm2, %v1461_v19, %v1462_v20 }
 0x100   : > { %1936 = vmatprep.mubr.f32.mxu0 %v4996_v61  ;;  %2156 = vmatprep.mubr.f32.mxu1 %v4950_v29  ;;  %v1572_v39 = vrot.slane %v4986_v59, 2  ;;  %v944_v41 = vmul.f32 %v4843_v15, %v826_v4  ;;  %v1014_v42 = vmax.f32 %v982_v23, 0.0  ;;  %v1013_v44 = vmax.f32 %v981_v25, 0.0 }
 0x101   : > { %2527 = vmatprep.subr.mxu1 %v6497_v1  ;;  %v836_v28 = vpop.f32.mrf.mxu0  ;;  %v5063_v36 = vsel %vm1263_vm1, %v5028_v22, %v1280_v21  ;;  %v5067_v48 = vsel %vm1263_vm1, 0.0, %v5028_v22  ;;  %v1464_v50 = vrot.slane %v5043_v33, 1  ;;  %v1574_v52 = vrot.slane %v5006_v7, 2 }
 0x102   : > { %2528 = vmatpush1.msra.mxu1 %v1804_v13  ;;  %6574 = vst [vmem:[#allocation12_spill] sm:$0xff] %v5063_v36  ;;  %v984_v53 = vadd.f32 %v4849_v17, %v945_v34  ;;  %v1575_v57 = vrot.slane %v5002_v6, 2  ;;  %v1466_v58 = vrot.slane %v5067_v48, 1  ;;  %v1467_v59 = vrot.slane %v5063_v36, 1 }
 0x103   : > { %3626 = vmatmul.mubr.msk.f32.gmra.mxu0 %vm4692_vm3, %v4935_v26  ;;  %2157 = vmatmul.mubr.f32.gmra.mxu1 %v5022_v16  ;;  %v5050_v35 = vpop.f32.mrf.mxu0  ;;  %v983_v62 = vadd.f32 %v4849_v17, %v944_v41  ;;  %v1283_v2 = vrot.slane %v1014_v42, 7  ;;  %v5086_v3 = vrot.slane %v1013_v44, 7  ;;  %v5089_v4 = vsel %vm1553_vm4, %v1570_v18, %v1572_v39 }
 0x104   : > { %1941 = vmatprep.mubr.f32.mxu0 %v5037_v31  ;;  %3658 = vmatprep.mubr.msk.f32.mxu1 %vm4692_vm3, %v4970_v55  ;;  %v5098_v8 = vsel %vm1440_vm2, %v1462_v20, %v1464_v50  ;;  %v5104_v63 = vsel %vm1263_vm1, %v1280_v21, 0.0  ;;  %v1016_v13 = vmax.f32 %v984_v53, 0.0  ;;  %v5111_v14 = vsel %vm1553_vm4, %v1574_v52, %v1575_v57 }
 0x105   : > { %2529 = vmatprep.subr.mxu1 %v6497_v1  ;;  %v5079_v54 = vpop.f32.mrf.mxu0  ;;  %6575 = vst [vmem:[#allocation13_spill] sm:$0xff] %v5086_v3  ;;  %v5114_v18 = vsel %vm1440_vm2, %v1466_v58, %v1467_v59  ;;  %v1015_v19 = vmax.f32 %v983_v62, 0.0  ;;  %v947_v20 = vmul.f32 %v5013_v12, %v4843_v15  ;;  %v1577_v21 = vrot.slane %v5043_v33, 2  ;;  %v1800_v33 = vld [vmem:[%s6482_s6 + $0x330] sm:$0xff]  ;;  %v1799_v62 = vld [vmem:[%s6482_s6 + $0x328] sm:$0xff] }
 0x106   : > { %2530 = vmatpush1.msra.mxu1 %v1803_v32  ;;  %v5122_v23 = vsel %vm1263_vm1, %v5086_v3, %v1283_v2  ;;  %v5126_v25 = vsel %vm1263_vm1, 0.0, %v5086_v3  ;;  %v946_v32 = vmul.f32 %v4843_v15, %v836_v28  ;;  %v1469_v12 = vrot.slane %v5104_v63, 1 }
 0x107   : > { %1942 = vmatmul.mubr.f32.gmra.mxu0 %v4950_v29  ;;  %2162 = vmatmul.mubr.f32.gmra.mxu1 %v5053_v37  ;;  %v5091_v7 = vpop.f32.mrf.mxu0  ;;  %6576 = vst [vmem:[#allocation14_spill] sm:$0xff] %v5122_v23  ;;  %v1286_v39 = vrot.slane %v1016_v13, 7  ;;  %v1579_v28 = vrot.slane %v5067_v48, 2  ;;  %v1580_v41 = vrot.slane %v5063_v36, 2  ;;  %v5143_v44 = vrot.slane %v1015_v19, 7 }
 0x108   : > { %1946 = vmatprep.mubr.f32.mxu0 %v5056_v38  ;;  %2166 = vmatprep.mubr.f32.mxu1 %v5002_v6  ;;  %v1471_v50 = vrot.slane %v5126_v25, 1  ;;  %v986_v52 = vadd.f32 %v4849_v17, %v947_v20  ;;  %v5150_v53 = vsel %vm1553_vm4, %v1575_v57, %v1577_v21  ;;  %v985_v58 = vadd.f32 %v4849_v17, %v946_v32 }
 0x109   : > { %2531 = vmatprep.subr.mxu1 %v6497_v1  ;;  %v5129_v34 = vpop.f32.mrf.mxu0  ;;  %6577 = vst [vmem:[#allocation15_spill] sm:$0xff] %v5143_v44  ;;  %v5158_v48 = vsel %vm1440_vm2, %v1467_v59, %v1469_v12  ;;  %v5171_v57 = vsel %vm1553_vm4, %v1579_v28, %v1580_v41  ;;  %v1582_v20 = vrot.slane %v5104_v63, 2  ;;  %v5186_v32 = vsel %vm1263_vm1, 0.0, %v5143_v44 }
 0x10a   : > { %2532 = vmatpush1.msra.mxu1 %v1802_v51  ;;  %v1472_v51 = vrot.slane %v5122_v23, 1  ;;  %v1018_v19 = vmax.f32 %v986_v52, 0.0  ;;  %v1017_v21 = vmax.f32 %v985_v58, 0.0  ;;  %v949_v12 = vmul.f32 %v5050_v35, %v4843_v15 }
 0x10b   : > { %3628 = vmatmul.mubr.msk.f32.gmra.mxu0 %vm4692_vm3, %v4970_v55  ;;  %2167 = vmatmul.mubr.f32.gmra.mxu1 %v5089_v4  ;;  %v5141_v42 = vpop.f32.mrf.mxu0  ;;  %v1584_v35 = vrot.slane %v5126_v25, 2  ;;  %v5205_v52 = vsel %vm1553_vm4, %v1580_v41, %v1582_v20  ;;  %v1476_v58 = vrot.slane %v5186_v32, 1  ;;  %v1797_v41 = vld [vmem:[%s6482_s6 + $0x318] sm:$0xff] }
 0x10c   : > { %1951 = vmatprep.mubr.f32.mxu0 %v5098_v8  ;;  %3660 = vmatprep.mubr.msk.f32.mxu1 %vm4692_vm3, %v5028_v22  ;;  %v5176_v59 = vsel %vm1440_vm2, %v1471_v50, %v1472_v51  ;;  %v1798_v50 = vld [vmem:[%s6482_s6 + $0x320] sm:$0xff]  ;;  %6580 = vst [vmem:[#allocation18_spill] sm:$0xff] %v5205_v52  ;;  %v1289_v49 = vrot.slane %v1018_v19, 7  ;;  %v5210_v45 = vrot.slane %v1017_v21, 7  ;;  %v988_v46 = vadd.f32 %v4849_v17, %v949_v12 }
 0x10d   : > { %2533 = vmatprep.subr.mxu1 %v6497_v1  ;;  %v5173_v13 = vpop.f32.mrf.mxu0  ;;  %6578 = vst [vmem:[#allocation16_spill] sm:$0xff] %v5176_v59  ;;  %v5227_v19 = vsel %vm1263_vm1, %v1286_v39, 0.0 }
 0x10e   : > { %2534 = vmatpush1.msra.mxu1 %v1801_v9  ;;  %v5164_v9 = vsel %vm1263_vm1, %v1283_v2, 0.0  ;;  %v5181_v2 = vsel %vm1263_vm1, %v5143_v44, %v1286_v39  ;;  %6581 = vst [vmem:[#allocation19_spill] sm:$0xff] %v5210_v45  ;;  %v951_v39 = vmul.f32 %v5091_v7, %v4843_v15  ;;  %v1479_v7 = vrot.slane %v5227_v19, 1 }
 0x10f   : > { %1952 = vmatmul.mubr.f32.gmra.mxu0 %v5002_v6  ;;  %2172 = vmatmul.mubr.f32.gmra.mxu1 %v5111_v14  ;;  %6579 = vst [vmem:[#allocation17_spill] sm:$0xff] %v5181_v2  ;;  %v5192_v28 = vpop.f32.mrf.mxu0  ;;  %v1474_v63 = vrot.slane %v5164_v9, 1  ;;  %v1587_v12 = vrot.slane %v5164_v9, 2 }
 0x110   : > { %1956 = vmatprep.mubr.f32.mxu0 %v5114_v18  ;;  %2176 = vmatprep.mubr.f32.mxu1 %v5063_v36 }
 0x111   : > { %2535 = vmatprep.subr.mxu1 %v6497_v1  ;;  %v5214_v40 = vpop.f32.mrf.mxu0  ;;  %v5221_v25 = vsel %vm1440_vm2, %v1472_v51, %v1474_v63  ;;  %v1020_v63 = vmax.f32 %v988_v46, 0.0  ;;  %v1796_v46 = vld [vmem:[%s6482_s6 + $0x310] sm:$0xff] }
 0x112   : > { %2536 = vmatpush1.msra.mxu1 %v1800_v33  ;;  %v948_v33 = vmul.f32 %v4843_v15, %v5079_v54  ;;  %v1585_v54 = vrot.slane %v5122_v23, 2  ;;  %6582 = vst [vmem:[#allocation20_spill] sm:$0xff] %v5221_v25 }
 0x113   : > { %3630 = vmatmul.mubr.msk.f32.gmra.mxu0 %vm4692_vm3, %v5028_v22  ;;  %2177 = vmatmul.mubr.f32.gmra.mxu1 %v5150_v53  ;;  %v5236_v21 = vpop.f32.mrf.mxu0 }
 0x114   : > { %1961 = vmatprep.mubr.f32.mxu0 %v5158_v48  ;;  %3662 = vmatprep.mubr.msk.f32.mxu1 %vm4692_vm3, %v5086_v3  ;;  %v987_v24 = vadd.f32 %v4849_v17, %v948_v33  ;;  %v5234_v20 = vsel %vm1553_vm4, %v1584_v35, %v1585_v54  ;;  %v950_v33 = vmul.f32 %v4843_v15, %v5129_v34 }
 0x115   : > { %2537 = vmatprep.subr.mxu1 %v6497_v1  ;;  %6583 = vst [vmem:[#allocation21_spill] sm:$0xff] %v5234_v20  ;;  %v5249_v35 = vsel %vm1263_vm1, %v5210_v45, %v1289_v49  ;;  %v5264_v34 = vpop.f32.mrf.mxu0 }
 0x116   : > { %2538 = vmatpush1.msra.mxu1 %v1799_v62  ;;  %v1477_v62 = vrot.slane %v5181_v2, 1  ;;  %6585 = vst [vmem:[#allocation23_spill] sm:$0xff] %v5249_v35 }
 0x117   : > { %1962 = vmatmul.mubr.f32.gmra.mxu0 %v5063_v36  ;;  %2182 = vmatmul.mubr.f32.gmra.mxu1 %v5171_v57 }
 0x118   : > { %1966 = vmatprep.mubr.f32.mxu0 %v5176_v59  ;;  %2186 = vmatprep.mubr.f32.mxu1 %v5122_v23  ;;  %v5239_v51 = vsel %vm1440_vm2, %v1476_v58, %v1477_v62  ;;  %v5253_v58 = vsel %vm1263_vm1, 0.0, %v5210_v45  ;;  %v5277_v59 = vpop.f32.mrf.mxu0 }
 0x119   : > { %2539 = vmatprep.subr.mxu1 %v6497_v1  ;;  %6584 = vst [vmem:[#allocation22_spill] sm:$0xff] %v5239_v51  ;;  %v1481_v9 = vrot.slane %v5253_v58, 1 }
 0x11a   : > { %2540 = vmatpush1.msra.mxu1 %v1798_v50  ;;  %v1019_v50 = vmax.f32 %v987_v24, 0.0  ;;  %v1589_v24 = vrot.slane %v5186_v32, 2  ;;  %v1590_v32 = vrot.slane %v5181_v2, 2 }
 0x11b   : > { %3632 = vmatmul.mubr.msk.f32.gmra.mxu0 %vm4692_vm3, %v5086_v3  ;;  %2187 = vmatmul.mubr.f32.gmra.mxu1 %v5205_v52 }
 0x11c   : > { %1971 = vmatprep.mubr.f32.mxu0 %v5221_v25  ;;  %3664 = vmatprep.mubr.msk.f32.mxu1 %vm4692_vm3, %v5143_v44  ;;  %v6586_v25 = vmov 0.0   ;;  %v5271_v3 = vrot.slane %v1019_v50, 7 }
 0x11d   : > { %2541 = vmatprep.subr.mxu1 %v6497_v1  ;;  %v990_v1 = vadd.f32 %v4849_v17, %v951_v39  ;;  %v5284_v39 = vsel %vm1440_vm2, %v1477_v62, %v1479_v7  ;;  %v952_v62 = vmul.f32 %v4843_v15, %v5173_v13  ;;  %v5316_v13 = vpop.f32.mrf.mxu0 }
 0x11e   : > { %2542 = vmatpush1.msra.mxu1 %v1797_v41  ;;  %v1482_v41 = vrot.slane %v5249_v35, 1  ;;  %6587 = vst [vmem:[#allocation24_spill] sm:$0xff] %v5271_v3  ;;  %6589 = vst [vmem:[#allocation26_spill] sm:$0xff] %v5284_v39 }
 0x11f   : > { %1972 = vmatmul.mubr.f32.gmra.mxu0 %v5122_v23  ;;  %2192 = vmatmul.mubr.f32.gmra.mxu1 %v5234_v20  ;;  %v989_v23 = vadd.f32 %v4849_v17, %v950_v33  ;;  %v1292_v20 = vrot.slane %v1020_v63, 7  ;;  %v1795_v33 = vld [vmem:[%s6482_s6 + $0x308] sm:$0xff]  ;;  %v1022_v50 = vmax.f32 %v990_v1, 0.0 }
 0x120   : > { %1976 = vmatprep.mubr.f32.mxu0 %v5239_v51  ;;  %2196 = vmatprep.mubr.f32.mxu1 %v5181_v2  ;;  %v5274_v51 = vsel %vm1553_vm4, %v1585_v54, %v1587_v12  ;;  %v5290_v54 = vsel %vm1263_vm1, %v1289_v49, 0.0  ;;  %v953_v12 = vmul.f32 %v5141_v42, %v4843_v15  ;;  %v5301_v63 = vsel %vm1440_vm2, %v1481_v9, %v1482_v41  ;;  %v5328_v9 = vpop.f32.mrf.mxu0 }
 0x121   : > { %2543 = vmatprep.subr.mxu1 %v6586_v25  ;;  %6588 = vst [vmem:[#allocation25_spill] sm:$0xff] %v5274_v51  ;;  %6590 = vst [vmem:[#allocation27_spill] sm:$0xff] %v5301_v63  ;;  %v1021_v7 = vmax.f32 %v989_v23, 0.0  ;;  %v5305_v49 = vsel %vm1553_vm4, %v1589_v24, %v1590_v32  ;;  %v5314_v42 = vsel %vm1263_vm1, 0.0, %v5271_v3  ;;  %v1484_v1 = vrot.slane %v5290_v54, 1  ;;  %v1794_v23 = vld [vmem:[%s6482_s6 + $0x300] sm:$0xff] }
 0x122   : > { %2544 = vmatpush1.msra.mxu1 %v1796_v46  ;;  %6591 = vst [vmem:[#allocation28_spill] sm:$0xff] %v5305_v49  ;;  %v1592_v46 = vrot.slane %v5227_v19, 2  ;;  %v992_v19 = vadd.f32 %v4849_v17, %v953_v12  ;;  %v991_v24 = vadd.f32 %v4849_v17, %v952_v62  ;;  %v1595_v12 = vrot.slane %v5249_v35, 2 }
 0x123   : > { %3634 = vmatmul.mubr.msk.f32.gmra.mxu0 %vm4692_vm3, %v5143_v44  ;;  %2197 = vmatmul.mubr.f32.gmra.mxu1 %v5274_v51  ;;  %v5345_v62 = vsel %vm1440_vm2, %v1482_v41, %v1484_v1 }
 0x124   : > { %1981 = vmatprep.mubr.f32.mxu0 %v5284_v39  ;;  %3666 = vmatprep.mubr.msk.f32.mxu1 %vm4692_vm3, %v5210_v45  ;;  %v5310_v39 = vsel %vm1263_vm1, %v5271_v3, %v1292_v20  ;;  %v5336_v51 = vsel %vm1553_vm4, %v1590_v32, %v1592_v46  ;;  %6594 = vst [vmem:[#allocation31_spill] sm:$0xff] %v5345_v62  ;;  %v5351_v32 = vsel %vm1263_vm1, %v1292_v20, 0.0  ;;  %v5357_v46 = vpop.f32.mrf.mxu0 }
 0x125   : > { %2545 = vmatprep.subr.mxu1 %v6586_v25  ;;  %6592 = vst [vmem:[#allocation29_spill] sm:$0xff] %v5310_v39  ;;  %v1487_v44 = vrot.slane %v5310_v39, 1  ;;  %6593 = vst [vmem:[#allocation30_spill] sm:$0xff] %v5336_v51 }
 0x126   : > { %2546 = vmatpush1.msra.mxu1 %v1795_v33  ;;  %v1295_v33 = vrot.slane %v1022_v50, 7  ;;  %v1825_v50 = vld [vmem:[%s6482_s6 + $0x3f8] sm:$0xff] }
 0x127   : > { %1982 = vmatmul.mubr.f32.gmra.mxu0 %v5181_v2  ;;  %2202 = vmatmul.mubr.f32.gmra.mxu1 %v5305_v49  ;;  %v5330_v2 = vrot.slane %v1021_v7, 7  ;;  %v1486_v49 = vrot.slane %v5314_v42, 1  ;;  %v1023_v7 = vmax.f32 %v991_v24, 0.0  ;;  %v1597_v24 = vrot.slane %v5290_v54, 2 }
 0x128   : > { %1986 = vmatprep.mubr.f32.mxu0 %v5301_v63  ;;  %2206 = vmatprep.mubr.f32.mxu1 %v5249_v35  ;;  %v1594_v63 = vrot.slane %v5253_v58, 2  ;;  %v1024_v58 = vmax.f32 %v992_v19, 0.0 }
 0x129   : > { %2547 = vmatprep.subr.mxu1 %v6586_v25  ;;  %v5360_v41 = vsel %vm1440_vm2, %v1486_v49, %v1487_v44  ;;  %v5364_v1 = vsel %vm1263_vm1, %v5330_v2, %v1295_v33  ;;  %v5368_v20 = vsel %vm1263_vm1, 0.0, %v5330_v2  ;;  %v955_v49 = vmul.f32 %v5192_v28, %v4843_v15 }
 0x12a   : > { %2548 = vmatpush1.msra.mxu1 %v1794_v23  ;;  %6595 = vst [vmem:[#allocation32_spill] sm:$0xff] %v5360_v41  ;;  %6596 = vst [vmem:[#allocation33_spill] sm:$0xff] %v5364_v1  ;;  %v954_v23 = vmul.f32 %v4843_v15, %v5214_v40  ;;  %v5374_v19 = vsel %vm1553_vm4, %v1594_v63, %v1595_v12  ;;  %v1824_v40 = vld [vmem:[%s6482_s6 + $0x3f0] sm:$0xff]  ;;  %v1298_v54 = vrot.slane %v1024_v58, 7  ;;  %v5389_v63 = vrot.slane %v1023_v7, 7 }
 0x12b   : > { %3636 = vmatmul.mubr.msk.f32.gmra.mxu0 %vm4692_vm3, %v5210_v45  ;;  %2207 = vmatmul.mubr.f32.gmra.mxu1 %v5336_v51  ;;  %6597 = vst [vmem:[#allocation34_spill] sm:$0xff] %v5374_v19  ;;  %v1489_v45 = vrot.slane %v5351_v32, 1  ;;  %v1491_v28 = vrot.slane %v5368_v20, 1  ;;  %v1599_v51 = vrot.slane %v5314_v42, 2  ;;  %v994_v52 = vadd.f32 %v4849_v17, %v955_v49  ;;  %v1823_v42 = vld [vmem:[%s6482_s6 + $0x3e8] sm:$0xff] }
 0x12c   : > { %1991 = vmatprep.mubr.f32.mxu0 %v5345_v62  ;;  %3668 = vmatprep.mubr.msk.f32.mxu1 %vm4692_vm3, %v5271_v3  ;;  %v5379_v62 = vpop.f32.mrf.mxu0  ;;  %v957_v49 = vmul.f32 %v5236_v21, %v4843_v15  ;;  %v1822_v21 = vld [vmem:[%s6482_s6 + $0x3e0] sm:$0xff] }
 0x12d   : > { %2549 = vmatprep.subr.mxu1 %v6586_v25  ;;  %v5408_v7 = vsel %vm1440_vm2, %v1487_v44, %v1489_v45  ;;  %v5425_v45 = vsel %vm1263_vm1, %v5389_v63, %v1298_v54 }
 0x12e   : > { %2550 = vmatpush2.msra.mxu1 %v1825_v50  ;;  %v1492_v50 = vrot.slane %v5364_v1, 1  ;;  %v5401_v58 = vpop.f32.mrf.mxu0  ;;  %6599 = vst [vmem:[#allocation36_spill] sm:$0xff] %v5408_v7  ;;  %6601 = vst [vmem:[#allocation38_spill] sm:$0xff] %v5425_v45 }
 0x12f   : > { %1992 = vmatmul.mubr.f32.gmra.mxu0 %v5249_v35  ;;  %2212 = vmatmul.mubr.f32.gmra.mxu1 %v5374_v19  ;;  %v993_v35 = vadd.f32 %v4849_v17, %v954_v23  ;;  %v5396_v19 = vsel %vm1553_vm4, %v1595_v12, %v1597_v24  ;;  %v5414_v12 = vsel %vm1263_vm1, %v1295_v33, 0.0  ;;  %v5431_v33 = vsel %vm1263_vm1, 0.0, %v5389_v63 }
 0x130   : > { %1996 = vmatprep.mubr.f32.mxu0 %v5360_v41  ;;  %2216 = vmatprep.mubr.f32.mxu1 %v5310_v39  ;;  %6598 = vst [vmem:[#allocation35_spill] sm:$0xff] %v5396_v19  ;;  %v1600_v41 = vrot.slane %v5310_v39, 2  ;;  %v5421_v23 = vsel %vm1440_vm2, %v1491_v28, %v1492_v50 }
 0x131   : > { %2551 = vmatprep.subr.mxu1 %v6586_v25  ;;  %6600 = vst [vmem:[#allocation37_spill] sm:$0xff] %v5421_v23  ;;  %v5427_v44 = vpop.f32.mrf.mxu0  ;;  %v1025_v24 = vmax.f32 %v993_v35, 0.0 }
 0x132   : > { %2552 = vmatpush2.msra.mxu1 %v1824_v40  ;;  %6602 = vst [vmem:[#allocation39_spill] sm:$0xff] %v5427_v44  ;;  %v956_v40 = vmul.f32 %v4843_v15, %v5264_v34  ;;  %v5439_v28 = vsel %vm1553_vm4, %v1599_v51, %v1600_v41  ;;  %v1494_v44 = vrot.slane %v5414_v12, 1  ;;  %v1497_v51 = vrot.slane %v5425_v45, 1 }
 0x133   : > { %3638 = vmatmul.mubr.msk.f32.gmra.mxu0 %vm4692_vm3, %v5271_v3  ;;  %2217 = vmatmul.mubr.f32.gmra.mxu1 %v5396_v19  ;;  %6603 = vst [vmem:[#allocation40_spill] sm:$0xff] %v5439_v28  ;;  %v1602_v3 = vrot.slane %v5351_v32, 2  ;;  %v1910_v35 = vpop.f32.mrf.mxu0  ;;  %v5454_v32 = vrot.slane %v1025_v24, 7  ;;  %v1605_v19 = vrot.slane %v5364_v1, 2 }
 0x134   : > { %2001 = vmatprep.mubr.f32.mxu0 %v5408_v7  ;;  %3670 = vmatprep.mubr.msk.f32.mxu1 %vm4692_vm3, %v5330_v2  ;;  %v1026_v7 = vmax.f32 %v994_v52, 0.0  ;;  %v1496_v52 = vrot.slane %v5431_v33, 1  ;;  %v995_v35 = vadd.f32 %v4849_v17, %v956_v40  ;;  %v5469_v24 = vsel %vm1440_vm2, %v1492_v50, %v1494_v44 }
 0x135   : > { %2553 = vmatprep.subr.mxu1 %v6586_v25  ;;  %v5452_v34 = vpop.f32.mrf.mxu0  ;;  %v5484_v50 = vsel %vm1263_vm1, 0.0, %v5454_v32  ;;  %v959_v44 = vmul.f32 %v5277_v59, %v4843_v15 }
 0x136   : > { %2554 = vmatpush2.msra.mxu1 %v1823_v42  ;;  %6604 = vst [vmem:[#allocation41_spill] sm:$0xff] %v5452_v34  ;;  %v996_v42 = vadd.f32 %v4849_v17, %v957_v49  ;;  %v1607_v49 = vrot.slane %v5414_v12, 2  ;;  %v1609_v12 = vrot.slane %v5431_v33, 2 }
 0x137   : > { %2002 = vmatmul.mubr.f32.gmra.mxu0 %v5310_v39  ;;  %2222 = vmatmul.mubr.f32.gmra.mxu1 %v5439_v28  ;;  %v1301_v39 = vrot.slane %v1026_v7, 7  ;;  %v5460_v28 = vsel %vm1553_vm4, %v1600_v41, %v1602_v3  ;;  %v1915_v36 = vpop.f32.mrf.mxu0  ;;  %v1821_v3 = vld [vmem:[%s6482_s6 + $0x3d8] sm:$0xff]  ;;  %v1401_v41 = vsel %vm1263_vm1, %v1298_v54, 0.0  ;;  %v1027_v7 = vmax.f32 %v995_v35, 0.0 }
 0x138   : > { %2006 = vmatprep.mubr.f32.mxu0 %v5421_v23  ;;  %2226 = vmatprep.mubr.f32.mxu1 %v5364_v1  ;;  %v1604_v23 = vrot.slane %v5368_v20, 2  ;;  %v5480_v36 = vsel %vm1440_vm2, %v1496_v52, %v1497_v51  ;;  %v1028_v20 = vmax.f32 %v996_v42, 0.0  ;;  %v1499_v59 = vrot.slane %v1401_v41, 1 }
 0x139   : > { %2555 = vmatprep.subr.mxu1 %v6586_v25  ;;  %6605 = vst [vmem:[#allocation42_spill] sm:$0xff] %v5480_v36  ;;  %v5495_v40 = vsel %vm1263_vm1, %v5454_v32, %v1301_v39  ;;  %v1610_v52 = vrot.slane %v5425_v45, 2  ;;  %v5509_v35 = vrot.slane %v1027_v7, 7  ;;  %v998_v34 = vadd.f32 %v4849_v17, %v959_v44 }
 0x13a   : > { %2556 = vmatpush2.msra.mxu1 %v1822_v21  ;;  %v5490_v54 = vsel %vm1553_vm4, %v1604_v23, %v1605_v19  ;;  %6606 = vst [vmem:[#allocation43_spill] sm:$0xff] %v5495_v40  ;;  %v958_v21 = vmul.f32 %v4843_v15, %v5316_v13  ;;  %v1820_v23 = vld [vmem:[%s6482_s6 + $0x3d0] sm:$0xff]  ;;  %v1501_v13 = vrot.slane %v5484_v50, 1  ;;  %v1304_v42 = vrot.slane %v1028_v20, 7  ;;  %v1819_v20 = vld [vmem:[%s6482_s6 + $0x3c8] sm:$0xff] }
 0x13b   : > { %3640 = vmatmul.mubr.msk.f32.gmra.mxu0 %vm4692_vm3, %v5330_v2  ;;  %2227 = vmatmul.mubr.f32.gmra.mxu1 %v5460_v28  ;;  %6607 = vst [vmem:[#allocation44_spill] sm:$0xff] %v5509_v35  ;;  %v5523_v33 = vsel %vm1440_vm2, %v1497_v51, %v1499_v59  ;;  %v1402_v7 = vsel %vm1263_vm1, %v1301_v39, 0.0  ;;  %v1030_v51 = vmax.f32 %v998_v34, 0.0  ;;  %v5546_v59 = vsel %vm1263_vm1, 0.0, %v5509_v35 }
 0x13c   : > { %2011 = vmatprep.mubr.f32.mxu0 %v5469_v24  ;;  %3672 = vmatprep.mubr.msk.f32.mxu1 %vm4692_vm3, %v5389_v63  ;;  %6608 = vst [vmem:[#allocation45_spill] sm:$0xff] %v5523_v33  ;;  %v1504_v34 = vrot.slane %v1402_v7, 1 }
 0x13d   : > { %2557 = vmatprep.subr.mxu1 %v6586_v25 }
 0x13e   : > { %2558 = vmatpush2.msra.mxu1 %v1821_v3  ;;  %v1502_v3 = vrot.slane %v5495_v40, 1 }
 0x13f   : > { %2012 = vmatmul.mubr.f32.gmra.mxu0 %v5364_v1  ;;  %2232 = vmatmul.mubr.f32.gmra.mxu1 %v5490_v54  ;;  %v5515_v1 = vsel %vm1553_vm4, %v1605_v19, %v1607_v49  ;;  %v5534_v19 = vsel %vm1553_vm4, %v1609_v12, %v1610_v52  ;;  %v1612_v49 = vrot.slane %v1401_v41, 2  ;;  %v960_v12 = vmul.f32 %v4843_v15, %v5357_v46  ;;  %v1818_v41 = vld [vmem:[%s6482_s6 + $0x3c0] sm:$0xff] }
 0x140   : > { %2016 = vmatprep.mubr.f32.mxu0 %v5480_v36  ;;  %2236 = vmatprep.mubr.f32.mxu1 %v5425_v45  ;;  %v997_v36 = vadd.f32 %v4849_v17, %v958_v21  ;;  %v5537_v44 = vsel %vm1440_vm2, %v1501_v13, %v1502_v3  ;;  %v5541_v21 = vsel %vm1263_vm1, %v5509_v35, %v1304_v42  ;;  %v1506_v46 = vrot.slane %v5546_v59, 1 }
 0x141   : > { %2559 = vmatprep.subr.mxu1 %v6586_v25  ;;  %6609 = vst [vmem:[#allocation46_spill] sm:$0xff] %v5537_v44  ;;  %6610 = vst [vmem:[#allocation47_spill] sm:$0xff] %v5541_v21  ;;  %v1507_v13 = vrot.slane %v5541_v21, 1 }
 0x142   : > { %2560 = vmatpush2.msra.mxu1 %v1820_v23  ;;  %v1029_v39 = vmax.f32 %v997_v36, 0.0  ;;  %v961_v23 = vmul.f32 %v5328_v9, %v4843_v15  ;;  %v1614_v36 = vrot.slane %v5484_v50, 2  ;;  %v5561_v9 = vsel %vm1553_vm4, %v1610_v52, %v1612_v49  ;;  %v1817_v52 = vld [vmem:[%s6482_s6 + $0x3b8] sm:$0xff] }
 0x143   : > { %3642 = vmatmul.mubr.msk.f32.gmra.mxu0 %vm4692_vm3, %v5389_v63  ;;  %2237 = vmatmul.mubr.f32.gmra.mxu1 %v5515_v1  ;;  %v1615_v15 = vrot.slane %v5495_v40, 2  ;;  %v5576_v50 = vsel %vm1440_vm2, %v1502_v3, %v1504_v34  ;;  %v5590_v49 = vsel %vm1440_vm2, %v1506_v46, %v1507_v13  ;;  %v1617_v3 = vrot.slane %v1402_v7, 2  ;;  %v1816_v7 = vld [vmem:[%s6482_s6 + $0x3b0] sm:$0xff] }
 0x144   : > { %2021 = vmatprep.mubr.f32.mxu0 %v5523_v33  ;;  %3674 = vmatprep.mubr.msk.f32.mxu1 %vm4692_vm3, %v5454_v32  ;;  %v999_v33 = vadd.f32 %v4849_v17, %v960_v12 }
 0x145   : > { %2561 = vmatprep.subr.mxu1 %v6586_v25 }
 0x146   : > { %2562 = vmatpush2.msra.mxu1 %v1819_v20  ;;  %v1307_v20 = vrot.slane %v1030_v51, 7  ;;  %v1403_v51 = vsel %vm1263_vm1, %v1304_v42, 0.0 }
 0x147   : > { %2022 = vmatmul.mubr.f32.gmra.mxu0 %v5425_v45  ;;  %2242 = vmatmul.mubr.f32.gmra.mxu1 %v5534_v19  ;;  %v5567_v45 = vrot.slane %v1029_v39, 7  ;;  %v1509_v34 = vrot.slane %v1403_v51, 1 }
 0x148   : > { %2026 = vmatprep.mubr.f32.mxu0 %v5537_v44  ;;  %2246 = vmatprep.mubr.f32.mxu1 %v5495_v40  ;;  %v1000_v44 = vadd.f32 %v4849_v17, %v961_v23  ;;  %v5587_v17 = vsel %vm1553_vm4, %v1614_v36, %v1615_v15  ;;  %v1031_v23 = vmax.f32 %v999_v33, 0.0  ;;  %v1619_v33 = vrot.slane %v5546_v59, 2 }
 0x149   : > { %2563 = vmatprep.subr.mxu1 %v6586_v25  ;;  %v5595_v42 = vsel %vm1263_vm1, %v5567_v45, %v1307_v20  ;;  %v5599_v12 = vsel %vm1263_vm1, 0.0, %v5567_v45  ;;  %v5623_v59 = vsel %vm1440_vm2, %v1507_v13, %v1509_v34 }
 0x14a   : > { %2564 = vmatpush2.msra.mxu1 %v1818_v41  ;;  %v1032_v39 = vmax.f32 %v1000_v44, 0.0  ;;  %v1511_v44 = vrot.slane %v5599_v12, 1  ;;  %v1512_v41 = vrot.slane %v5595_v42, 1  ;;  %v5612_v46 = vrot.slane %v1031_v23, 7  ;;  %6611 = vst [vmem:[#allocation48_spill] sm:$0xff] %v5623_v59 }
 0x14b   : > { %3644 = vmatmul.mubr.msk.f32.gmra.mxu0 %vm4692_vm3, %v5454_v32  ;;  %2247 = vmatmul.mubr.f32.gmra.mxu1 %v5561_v9  ;;  %v1404_v23 = vsel %vm1263_vm1, %v1307_v20, 0.0 }
 0x14c   : > { %2031 = vmatprep.mubr.f32.mxu0 %v5576_v50  ;;  %3676 = vmatprep.mubr.msk.f32.mxu1 %vm4692_vm3, %v5509_v35  ;;  %v1310_v36 = vrot.slane %v1032_v39, 7  ;;  %v1815_v39 = vld [vmem:[%s6482_s6 + $0x3a8] sm:$0xff]  ;;  %v5638_v13 = vsel %vm1440_vm2, %v1511_v44, %v1512_v41 }
 0x14d   : > { %2565 = vmatprep.subr.mxu1 %v6586_v25  ;;  %6612 = vst [vmem:[#allocation49_spill] sm:$0xff] %v5638_v13 }
 0x14e   : > { %2566 = vmatpush2.msra.mxu1 %v1817_v52  ;;  %v5615_v52 = vsel %vm1553_vm4, %v1615_v15, %v1617_v3  ;;  %v4143_v15 = vld [vmem:[%s6480_s4] ss:$0 sm:$0xff] }
 0x14f   : > { %2032 = vmatmul.mubr.f32.gmra.mxu0 %v5495_v40  ;;  %2252 = vmatmul.mubr.f32.gmra.mxu1 %v5587_v17  ;;  %v1620_v40 = vrot.slane %v5541_v21, 2  ;;  %v962_v3 = vmul.f32 %v4143_v15, %v5401_v58  ;;  %v963_v34 = vmul.f32 %v4143_v15, %v5379_v62  ;;  %v1514_v58 = vrot.slane %v1404_v23, 1  ;;  %v1814_v62 = vld [vmem:[%s6482_s6 + $0x3a0] sm:$0xff] }
 0x150   : > { %2036 = vmatprep.mubr.f32.mxu0 %v5590_v49  ;;  %2256 = vmatprep.mubr.f32.mxu1 %v5541_v21 }
 0x151   : > { %2567 = vmatprep.subr.mxu1 %v6586_v25  ;;  %v5643_v20 = vsel %vm1553_vm4, %v1619_v33, %v1620_v40 }
 0x152   : > { %2568 = vmatpush2.msra.mxu1 %v1816_v7  ;;  %6613 = vst [vmem:[#allocation50_spill] sm:$0xff] %v5643_v20  ;;  %v1622_v7 = vrot.slane %v1403_v51, 2  ;;  %v4144_v51 = vld [vmem:[%s6481_s5] ss:$0 sm:$0xff] }
 0x153   : > { %3646 = vmatmul.mubr.msk.f32.gmra.mxu0 %vm4692_vm3, %v5509_v35  ;;  %2257 = vmatmul.mubr.f32.gmra.mxu1 %v5615_v52  ;;  %v1387_v35 = vsel %vm1263_vm1, 0.0, %v5612_v46  ;;  %v1001_v33 = vadd.f32 %v4144_v51, %v962_v3  ;;  %v1002_v44 = vadd.f32 %v4144_v51, %v963_v34  ;;  %v5673_v3 = vsel %vm1440_vm2, %v1512_v41, %v1514_v58  ;;  %v1813_v34 = vld [vmem:[%s6482_s6 + $0x398] sm:$0xff]  ;;  %v1812_v51 = vld [vmem:[%s6482_s6 + $0x390] sm:$0xff] }
 0x154   : > { %2041 = vmatprep.mubr.f32.mxu0 %v5623_v59  ;;  %3678 = vmatprep.mubr.msk.f32.mxu1 %vm4692_vm3, %v5567_v45  ;;  %v5647_v59 = vsel %vm1263_vm1, %v5612_v46, %v1310_v36  ;;  %v1627_v58 = vrot.slane %v1404_v23, 2 }
 0x155   : > { %2569 = vmatprep.subr.mxu1 %v6586_v25  ;;  %v1517_v15 = vrot.slane %v5647_v59, 1 }
 0x156   : > { %2570 = vmatpush2.msra.mxu1 %v1815_v39  ;;  %v1516_v39 = vrot.slane %v1387_v35, 1 }
 0x157   : > { %2042 = vmatmul.mubr.f32.gmra.mxu0 %v5541_v21  ;;  %2262 = vmatmul.mubr.f32.gmra.mxu1 %v5643_v20  ;;  %v5664_v21 = vsel %vm1553_vm4, %v1620_v40, %v1622_v7  ;;  %v1624_v20 = vrot.slane %v5599_v12, 2  ;;  %v1405_v40 = vsel %vm1263_vm1, %v1310_v36, 0.0  ;;  %v1033_v12 = vmax.f32 %v1001_v33, 0.0 }
 0x158   : > { %2046 = vmatprep.mubr.f32.mxu0 %v5638_v13  ;;  %2266 = vmatprep.mubr.f32.mxu1 %v5595_v42  ;;  %v1625_v13 = vrot.slane %v5595_v42, 2  ;;  %v1034_v7 = vmax.f32 %v1002_v44, 0.0  ;;  %v1519_v36 = vrot.slane %v1405_v40, 1 }
 0x159   : > { %2571 = vmatprep.subr.mxu1 %v6586_v25  ;;  %v5695_v33 = vrot.slane %v1033_v12, 7  ;;  %v1811_v12 = vld [vmem:[%s6482_s6 + $0x388] sm:$0xff] }
 0x15a   : > { %2572 = vmatpush2.msra.mxu1 %v1814_v62  ;;  %v5684_v62 = vsel %vm1440_vm2, %v1516_v39, %v1517_v15  ;;  %v5688_v41 = vsel %vm1553_vm4, %v1624_v20, %v1625_v13  ;;  %v5699_v44 = vrot.slane %v1034_v7, 7  ;;  %v5703_v23 = vsel %vm1553_vm4, %v1625_v13, %v1627_v58  ;;  %v1810_v7 = vld [vmem:[%s6482_s6 + $0x380] sm:$0xff] }
 0x15b   : > { %3648 = vmatmul.mubr.msk.f32.gmra.mxu0 %vm4692_vm3, %v5567_v45  ;;  %2267 = vmatmul.mubr.f32.gmra.mxu1 %v5664_v21  ;;  %v1629_v20 = vrot.slane %v1387_v35, 2  ;;  %v1630_v39 = vrot.slane %v5647_v59, 2 }
 0x15c   : > { %2051 = vmatprep.mubr.f32.mxu0 %v5673_v3  ;;  %3680 = vmatprep.mubr.msk.f32.mxu1 %vm4692_vm3, %v5612_v46  ;;  %v5723_v35 = vsel %vm1263_vm1, %v5695_v33, %v5699_v44 }
 0x15d   : > { %2573 = vmatprep.subr.mxu1 %v6586_v25  ;;  %v5727_v13 = vsel %vm1553_vm4, %v1629_v20, %v1630_v39  ;;  %v6624_v20 = vld [vmem:[#allocation28_spill] sm:$0xff] }
 0x15e   : > { %2574 = vmatpush2.msra.mxu1 %v1813_v34  ;;  %v5711_v34 = vsel %vm1440_vm2, %v1517_v15, %v1519_v36  ;;  %v1632_v15 = vrot.slane %v1405_v40, 2  ;;  %v1840_v40 = vld [vmem:[%s6482_s6 + $0x470] sm:$0xff]  ;;  %v1829_v36 = vld [vmem:[%s6482_s6 + $0x418] sm:$0xff] }
 0x15f   : > { %2052 = vmatmul.mubr.f32.gmra.mxu0 %v5595_v42  ;;  %2272 = vmatmul.mubr.f32.gmra.mxu1 %v5688_v41 }
 0x160   : > { %2056 = vmatprep.mubr.f32.mxu0 %v5684_v62  ;;  %2276 = vmatprep.mubr.f32.mxu1 %v5647_v59  ;;  %v5738_v58 = vsel %vm1553_vm4, %v1630_v39, %v1632_v15  ;;  %v6625_v39 = vld [vmem:[#allocation26_spill] sm:$0xff]  ;;  %v6626_v15 = vld [vmem:[#allocation17_spill] sm:$0xff] }
 0x161   : > { %2575 = vmatprep.subr.mxu1 %v6586_v25 }
 0x162   : > { %2576 = vmatpush2.msra.mxu1 %v1812_v51  ;;  %v6623_v51 = vld [vmem:[#allocation15_spill] sm:$0xff] }
 0x163   : > { %3650 = vmatmul.mubr.msk.f32.gmra.mxu0 %vm4692_vm3, %v5612_v46  ;;  %2277 = vmatmul.mubr.f32.gmra.mxu1 %v5703_v23 }
 0x164   : > { %2061 = vmatprep.mubr.f32.mxu0 %v5711_v34  ;;  %3682 = vmatprep.mubr.msk.f32.mxu1 %vm4692_vm3, %v5695_v33 }
 0x165   : > { %2577 = vmatprep.subr.mxu1 %v6586_v25 }
 0x166   : > { %2578 = vmatpush2.msra.mxu1 %v1811_v12  ;;  %v1828_v12 = vld [vmem:[%s6482_s6 + $0x410] sm:$0xff] }
 0x167   : > { %2062 = vmatmul.mubr.f32.gmra.mxu0 %v5647_v59  ;;  %2282 = vmatmul.mubr.f32.gmra.mxu1 %v5727_v13 }
 0x168   : > { %2356 = vmatprep.mubr.f32.mxu0 %v4942_v30  ;;  %2286 = vmatprep.mubr.f32.mxu1 %v5723_v35  ;;  %v4145_v30 = vld [vmem:[%s6482_s6 + $0x478] sm:$0xff] }
 0x169   : > { %2579 = vmatprep.subr.mxu1 %v6586_v25  ;;  %v1839_v25 = vld [vmem:[%s6482_s6 + $0x468] sm:$0xff] }
 0x16a   : > { %2580 = vmatpush2.msra.mxu1 %v1810_v7  ;;  %v6627_v7 = vld [vmem:[#allocation30_spill] sm:$0xff] }
 0x16b   : > { %2287 = vmatmul.mubr.f32.gmra.mxu1 %v5738_v58  ;;  %2357 = vmatmul.mubr.f32.vlgmr.msra.gmra.mxu0 %v4906_v5  ;;  %v1838_v5 = vld [vmem:[%s6482_s6 + $0x460] sm:$0xff] }
 0x16c   : > { %3926 = vmatpush3.msra.mxu0 %v4145_v30  ;;  %2361 = vmatprep.mubr.f32.mxu0 %v4973_v56  ;;  %v6615_v56 = vld [vmem:[#allocation18_spill] sm:$0xff]  ;;  %v1827_v30 = vld [vmem:[%s6482_s6 + $0x408] sm:$0xff] }
 0x16d   : > { %2581 = vmatprep.mubr.f32.mxu1 %v4938_v27  ;;  %3927 = vmatprep.subr.mxu0 %v1840_v40 }
 0x16e   : > { %3928 = vmatpush3.msra.mxu0 %v1840_v40  ;;  %v6628_v40 = vld [vmem:[#allocation27_spill] sm:$0xff] }
 0x16f   : > { %2362 = vmatmul.mubr.f32.gmra.mxu0 %v4913_v10  ;;  %3684 = vmatmul.mubr.msk.f32.vlgmr.msra.gmra.mxu1 %vm4692_vm3, %v4901_v0  ;;  %v1837_v0 = vld [vmem:[%s6482_s6 + $0x458] sm:$0xff]  ;;  %v1836_v10 = vld [vmem:[%s6482_s6 + $0x450] sm:$0xff] }
 0x170   : > { %2366 = vmatprep.mubr.f32.mxu0 %v4993_v60  ;;  %2586 = vmatprep.mubr.f32.mxu1 %v4980_v47 }
 0x171   : > { %3929 = vmatprep.subr.mxu0 %v1839_v25 }
 0x172   : > { %3930 = vmatpush3.msra.mxu0 %v1839_v25  ;;  %v6629_v25 = vld [vmem:[#allocation19_spill] sm:$0xff] }
 0x173   : > { %2367 = vmatmul.mubr.f32.gmra.mxu0 %v4938_v27  ;;  %2587 = vmatmul.mubr.f32.gmra.mxu1 %v4917_v11  ;;  %v1835_v11 = vld [vmem:[%s6482_s6 + $0x448] sm:$0xff]  ;;  %v1833_v27 = vld [vmem:[%s6482_s6 + $0x438] sm:$0xff] }
 0x174   : > { %2371 = vmatprep.mubr.f32.mxu0 %v5022_v16  ;;  %2591 = vmatprep.mubr.f32.mxu1 %v4996_v61 }
 0x175   : > { %3931 = vmatprep.subr.mxu0 %v1838_v5 }
 0x176   : > { %3932 = vmatpush3.msra.mxu0 %v1838_v5  ;;  %v6630_v5 = vld [vmem:[#allocation34_spill] sm:$0xff] }
 0x177   : > { %2372 = vmatmul.mubr.f32.gmra.mxu0 %v4980_v47  ;;  %3686 = vmatmul.mubr.msk.f32.gmra.mxu1 %vm4692_vm3, %v4935_v26  ;;  %v1834_v26 = vld [vmem:[%s6482_s6 + $0x440] sm:$0xff]  ;;  %v6616_v47 = vld [vmem:[#allocation16_spill] sm:$0xff] }
 0x178   : > { %2376 = vmatprep.mubr.f32.mxu0 %v5053_v37  ;;  %2596 = vmatprep.mubr.f32.mxu1 %v5037_v31 }
 0x179   : > { %3933 = vmatprep.subr.mxu0 %v1837_v0 }
 0x17a   : > { %3934 = vmatpush3.msra.mxu0 %v1837_v0  ;;  %v6631_v0 = vld [vmem:[#allocation31_spill] sm:$0xff] }
 0x17b   : > { %2377 = vmatmul.mubr.f32.gmra.mxu0 %v4996_v61  ;;  %2597 = vmatmul.mubr.f32.gmra.mxu1 %v4950_v29  ;;  %v1832_v29 = vld [vmem:[%s6482_s6 + $0x430] sm:$0xff]  ;;  %v1831_v61 = vld [vmem:[%s6482_s6 + $0x428] sm:$0xff] }
 0x17c   : > { %2381 = vmatprep.mubr.f32.mxu0 %v5089_v4  ;;  %2601 = vmatprep.mubr.f32.mxu1 %v5056_v38 }
 0x17d   : > { %3935 = vmatprep.subr.mxu0 %v1836_v10 }
 0x17e   : > { %3936 = vmatpush3.msra.mxu0 %v1836_v10  ;;  %v1826_v10 = vld [vmem:[%s6482_s6 + $0x400] sm:$0xff] }
 0x17f   : > { %2382 = vmatmul.mubr.f32.gmra.mxu0 %v5037_v31  ;;  %3688 = vmatmul.mubr.msk.f32.gmra.mxu1 %vm4692_vm3, %v4970_v55  ;;  %v6614_v55 = vld [vmem:[#allocation12_spill] sm:$0xff] }
 0x180   : > { %2386 = vmatprep.mubr.f32.mxu0 %v5111_v14  ;;  %2606 = vmatprep.mubr.f32.mxu1 %v5098_v8  ;;  %v6619_v31 = vld [vmem:[#allocation20_spill] sm:$0xff] }
 0x181   : > { %3937 = vmatprep.subr.mxu0 %v1835_v11 }
 0x182   : > { %3938 = vmatpush3.msra.mxu0 %v1835_v11  ;;  %v6632_v11 = vld [vmem:[#allocation23_spill] sm:$0xff] }
 0x183   : > { %2387 = vmatmul.mubr.f32.gmra.mxu0 %v5056_v38  ;;  %2607 = vmatmul.mubr.f32.gmra.mxu1 %v5002_v6  ;;  %v6617_v6 = vld [vmem:[#allocation13_spill] sm:$0xff]  ;;  %v1830_v38 = vld [vmem:[%s6482_s6 + $0x420] sm:$0xff] }
 0x184   : > { %2391 = vmatprep.mubr.f32.mxu0 %v5150_v53  ;;  %2611 = vmatprep.mubr.f32.mxu1 %v5114_v18 }
 0x185   : > { %3939 = vmatprep.subr.mxu0 %v1834_v26 }
 0x186   : > { %3940 = vmatpush3.msra.mxu0 %v1834_v26  ;;  %v6633_v26 = vld [vmem:[#allocation35_spill] sm:$0xff] }
 0x187   : > { %2392 = vmatmul.mubr.f32.gmra.mxu0 %v5098_v8  ;;  %3690 = vmatmul.mubr.msk.f32.gmra.mxu1 %vm4692_vm3, %v5028_v22  ;;  %v6618_v22 = vld [vmem:[#allocation21_spill] sm:$0xff]  ;;  %v6620_v8 = vld [vmem:[#allocation14_spill] sm:$0xff] }
 0x188   : > { %2396 = vmatprep.mubr.f32.mxu0 %v5171_v57  ;;  %2616 = vmatprep.mubr.f32.mxu1 %v5158_v48 }
 0x189   : > { %3941 = vmatprep.subr.mxu0 %v1833_v27 }
 0x18a   : > { %3942 = vmatpush3.msra.mxu0 %v1833_v27  ;;  %v6634_v27 = vld [vmem:[#allocation32_spill] sm:$0xff] }
 0x18b   : > { %2397 = vmatmul.mubr.f32.gmra.mxu0 %v5114_v18  ;;  %2617 = vmatmul.mubr.f32.gmra.mxu1 %v6614_v55  ;;  %v6621_v18 = vld [vmem:[#allocation25_spill] sm:$0xff]  ;;  %v6636_v55 = vld [vmem:[#allocation40_spill] sm:$0xff] }
 0x18c   : > { %2401 = vmatprep.mubr.f32.mxu0 %v6615_v56  ;;  %2621 = vmatprep.mubr.f32.mxu1 %v6616_v47 }
 0x18d   : > { %3943 = vmatprep.subr.mxu0 %v1832_v29 }
 0x18e   : > { %3944 = vmatpush3.msra.mxu0 %v1832_v29  ;;  %v6635_v29 = vld [vmem:[#allocation24_spill] sm:$0xff] }
 0x18f   : > { %2402 = vmatmul.mubr.f32.gmra.mxu0 %v5158_v48  ;;  %3692 = vmatmul.mubr.msk.f32.gmra.mxu1 %vm4692_vm3, %v6617_v6  ;;  %v6622_v48 = vld [vmem:[#allocation22_spill] sm:$0xff]  ;;  %v6639_v6 = vld [vmem:[#allocation37_spill] sm:$0xff] }
 0x190   : > { %2406 = vmatprep.mubr.f32.mxu0 %v6618_v22  ;;  %2626 = vmatprep.mubr.f32.mxu1 %v6619_v31 }
 0x191   : > { %3945 = vmatprep.subr.mxu0 %v1831_v61 }
 0x192   : > { %3946 = vmatpush3.msra.mxu0 %v1831_v61  ;;  %v6638_v61 = vld [vmem:[#allocation29_spill] sm:$0xff] }
 0x193   : > { %2407 = vmatmul.mubr.f32.gmra.mxu0 %v6616_v47  ;;  %2627 = vmatmul.mubr.f32.gmra.mxu1 %v6620_v8  ;;  %v6637_v47 = vld [vmem:[#allocation36_spill] sm:$0xff] }
 0x194   : > { %2411 = vmatprep.mubr.f32.mxu0 %v6621_v18  ;;  %2631 = vmatprep.mubr.f32.mxu1 %v6622_v48 }
 0x195   : > { %3947 = vmatprep.subr.mxu0 %v1830_v38 }
 0x196   : > { %3948 = vmatpush3.msra.mxu0 %v1830_v38 }
 0x197   : > { %2412 = vmatmul.mubr.f32.gmra.mxu0 %v6619_v31  ;;  %3694 = vmatmul.mubr.msk.f32.gmra.mxu1 %vm4692_vm3, %v6623_v51  ;;  %v6641_v51 = vld [vmem:[#allocation42_spill] sm:$0xff] }
 0x198   : > { %2416 = vmatprep.mubr.f32.mxu0 %v6624_v20  ;;  %2636 = vmatprep.mubr.f32.mxu1 %v6625_v39 }
 0x199   : > { %3949 = vmatprep.subr.mxu0 %v1829_v36 }
 0x19a   : > { %3950 = vmatpush3.msra.mxu0 %v1829_v36  ;;  %v6640_v36 = vld [vmem:[#allocation33_spill] sm:$0xff] }
 0x19b   : > { %2417 = vmatmul.mubr.f32.gmra.mxu0 %v6622_v48  ;;  %2637 = vmatmul.mubr.f32.gmra.mxu1 %v6626_v15 }
 0x19c   : > { %2421 = vmatprep.mubr.f32.mxu0 %v6627_v7  ;;  %2641 = vmatprep.mubr.f32.mxu1 %v6628_v40 }
 0x19d   : > { %3951 = vmatprep.subr.mxu0 %v1828_v12 }
 0x19e   : > { %3952 = vmatpush3.msra.mxu0 %v1828_v12 }
 0x19f   : > { %2422 = vmatmul.mubr.f32.gmra.mxu0 %v6625_v39  ;;  %3696 = vmatmul.mubr.msk.f32.gmra.mxu1 %vm4692_vm3, %v6629_v25  ;;  %v6642_v25 = vld [vmem:[#allocation45_spill] sm:$0xff] }
 0x1a0   : > { %2426 = vmatprep.mubr.f32.mxu0 %v6630_v5  ;;  %2646 = vmatprep.mubr.f32.mxu1 %v6631_v0 }
 0x1a1   : > { %3953 = vmatprep.subr.mxu0 %v1827_v30 }
 0x1a2   : > { %3954 = vmatpush3.msra.mxu0 %v1827_v30 }
 0x1a3   : > { %2427 = vmatmul.mubr.f32.gmra.mxu0 %v6628_v40  ;;  %2647 = vmatmul.mubr.f32.gmra.mxu1 %v6632_v11 }
 0x1a4   : > { %2431 = vmatprep.mubr.f32.mxu0 %v6633_v26  ;;  %2651 = vmatprep.mubr.f32.mxu1 %v6634_v27 }
 0x1a5   : > { %3955 = vmatprep.subr.mxu0 %v1826_v10 }
 0x1a6   : > { %3956 = vmatpush3.msra.mxu0 %v1826_v10 }
 0x1a7   : > { %2432 = vmatmul.mubr.f32.gmra.mxu0 %v6631_v0  ;;  %3698 = vmatmul.mubr.msk.f32.gmra.mxu1 %vm4692_vm3, %v6635_v29  ;;  %v6643_v29 = vld [vmem:[#allocation38_spill] sm:$0xff] }
 0x1a8   : > { %2436 = vmatprep.mubr.f32.mxu0 %v6636_v55  ;;  %2656 = vmatprep.mubr.f32.mxu1 %v6637_v47 }
 0x1ab   : > { %2437 = vmatmul.mubr.f32.gmra.mxu0 %v6634_v27  ;;  %2657 = vmatmul.mubr.f32.gmra.mxu1 %v6638_v61 }
 0x1ac   : > { %2441 = vmatprep.mubr.f32.mxu0 %v5460_v28  ;;  %2661 = vmatprep.mubr.f32.mxu1 %v6639_v6 }
 0x1af   : > { %v5872_v31 = vpop.f32.mrf.mxu1  ;;  %2442 = vmatmul.mubr.f32.gmra.mxu0 %v6637_v47  ;;  %3700 = vmatmul.mubr.msk.f32.gmra.mxu1 %vm4692_vm3, %v5330_v2  ;;  %v3092_v2 = vld [vmem:[%s6485_s9 + $0x78] sm:$0xff] }
 0x1b0   : > { %2446 = vmatprep.mubr.f32.mxu0 %v5490_v54  ;;  %2666 = vmatprep.mubr.f32.mxu1 %v5469_v24 }
 0x1b1   : > { %v2135_v38 = vpop.f32.mrf.mxu1  ;;  %4005 = vmatprep.subr.mxu1 %v3092_v2 }
 0x1b2   : > { %4006 = vmatpush3.msra.mxu1 %v3092_v2 }
 0x1b3   : > { %v1918_v8 = vpop.f32.mrf.mxu0  ;;  %v5880_v48 = vpop.f32.mrf.mxu1  ;;  %2447 = vmatmul.mubr.f32.gmra.mxu0 %v6639_v6  ;;  %2667 = vmatmul.mubr.f32.gmra.mxu1 %v6640_v36  ;;  %v3091_v6 = vld [vmem:[%s6485_s9 + $0x70] sm:$0xff] }
 0x1b4   : > { %2451 = vmatprep.mubr.f32.mxu0 %v5515_v1  ;;  %2671 = vmatprep.mubr.f32.mxu1 %v6641_v51 }
 0x1b5   : > { %v1920_v39 = vpop.f32.mrf.mxu0  ;;  %v2140_v12 = vpop.f32.mrf.mxu1  ;;  %4007 = vmatprep.subr.mxu1 %v3091_v6 }
 0x1b6   : > { %4008 = vmatpush3.msra.mxu1 %v3091_v6 }
 0x1b7   : > { %v1923_v15 = vpop.f32.mrf.mxu0  ;;  %v2143_v40 = vpop.f32.mrf.mxu1  ;;  %2452 = vmatmul.mubr.f32.gmra.mxu0 %v5469_v24  ;;  %3702 = vmatmul.mubr.msk.f32.gmra.mxu1 %vm4692_vm3, %v5389_v63  ;;  %v6644_v63 = vld [vmem:[#allocation46_spill] sm:$0xff] }
 0x1b8   : > { %v5893_v30 = vadd.f32 %v2143_v40, %v1918_v8  ;;  %2456 = vmatprep.mubr.f32.mxu0 %v5534_v19  ;;  %2676 = vmatprep.mubr.f32.mxu1 %v6642_v25 }
 0x1b9   : > { %v1925_v0 = vpop.f32.mrf.mxu0  ;;  %v2145_v10 = vpop.f32.mrf.mxu1 }
 0x1ba   : > { %v3090_v0 = vld [vmem:[%s6485_s9 + $0x68] sm:$0xff] }
 0x1bb   : > { %v1928_v11 = vpop.f32.mrf.mxu0  ;;  %v2148_v27 = vpop.f32.mrf.mxu1  ;;  %2457 = vmatmul.mubr.f32.gmra.mxu0 %v6641_v51  ;;  %2677 = vmatmul.mubr.f32.gmra.mxu1 %v6643_v29 }
 0x1bc   : > { %v5899_v24 = vadd.f32 %v2148_v27, %v1923_v15  ;;  %2461 = vmatprep.mubr.f32.mxu0 %v5561_v9  ;;  %2681 = vmatprep.mubr.f32.mxu1 %v6644_v63  ;;  %v6645_v15 = vld [vmem:[#allocation43_spill] sm:$0xff]  ;;  %v6646_v27 = vld [vmem:[#allocation44_spill] sm:$0xff] }
 0x1bd   : > { %v1930_v47 = vpop.f32.mrf.mxu0  ;;  %v2150_v61 = vpop.f32.mrf.mxu1  ;;  %4009 = vmatprep.subr.mxu1 %v3090_v0 }
 0x1be   : > { %v6648_v47 = vld [vmem:[#allocation48_spill] sm:$0xff]  ;;  %4010 = vmatpush3.msra.mxu1 %v3090_v0 }
 0x1bf   : > { %v1933_v38 = vpop.f32.mrf.mxu0  ;;  %v2153_v8 = vpop.f32.mrf.mxu1  ;;  %2462 = vmatmul.mubr.f32.gmra.mxu0 %v6642_v25  ;;  %3704 = vmatmul.mubr.msk.f32.gmra.mxu1 %vm4692_vm3, %v5454_v32 }
 0x1c0   : > { %v5910_v36 = vadd.f32 %v2153_v8, %v1928_v11  ;;  %2466 = vmatprep.mubr.f32.mxu0 %v5587_v17  ;;  %2686 = vmatprep.mubr.f32.mxu1 %v5576_v50 }
 0x1c1   : > { %v1935_v51 = vpop.f32.mrf.mxu0  ;;  %v2155_v39 = vpop.f32.mrf.mxu1 }
 0x1c2   : > { %v6649_v51 = vld [vmem:[#allocation47_spill] sm:$0xff]  ;;  %v6650_v39 = vld [vmem:[#allocation49_spill] sm:$0xff] }
 0x1c3   : > { %v1938_v12 = vpop.f32.mrf.mxu0  ;;  %v2158_v2 = vpop.f32.mrf.mxu1  ;;  %2467 = vmatmul.mubr.f32.gmra.mxu0 %v6644_v63  ;;  %2687 = vmatmul.mubr.f32.gmra.mxu1 %v6645_v15  ;;  %v6647_v63 = vld [vmem:[#allocation50_spill] sm:$0xff]  ;;  %v3089_v15 = vld [vmem:[%s6485_s9 + $0x60] sm:$0xff] }
 0x1c4   : > { %v5916_v40 = vadd.f32 %v2158_v2, %v1933_v38  ;;  %2471 = vmatprep.mubr.f32.mxu0 %v5615_v52  ;;  %2691 = vmatprep.mubr.f32.mxu1 %v5590_v49 }
 0x1c5   : > { %v1940_v32 = vpop.f32.mrf.mxu0  ;;  %v2160_v25 = vpop.f32.mrf.mxu1  ;;  %4011 = vmatprep.subr.mxu1 %v3089_v15 }
 0x1c6   : > { %4012 = vmatpush3.msra.mxu1 %v3089_v15 }
 0x1c7   : > { %v1943_v10 = vpop.f32.mrf.mxu0  ;;  %v2163_v11 = vpop.f32.mrf.mxu1  ;;  %2472 = vmatmul.mubr.f32.gmra.mxu0 %v5576_v50  ;;  %3706 = vmatmul.mubr.msk.f32.gmra.mxu1 %vm4692_vm3, %v6646_v27 }
 0x1c8   : > { %v5927_v29 = vadd.f32 %v2163_v11, %v1938_v12  ;;  %2476 = vmatprep.mubr.f32.mxu0 %v6647_v63  ;;  %2696 = vmatprep.mubr.f32.mxu1 %v6648_v47 }
 0x1c9   : > { %v1945_v61 = vpop.f32.mrf.mxu0  ;;  %v2165_v6 = vpop.f32.mrf.mxu1 }
 0x1cb   : > { %v1948_v38 = vpop.f32.mrf.mxu0  ;;  %v2168_v8 = vpop.f32.mrf.mxu1  ;;  %2477 = vmatmul.mubr.f32.gmra.mxu0 %v5590_v49  ;;  %2697 = vmatmul.mubr.f32.gmra.mxu1 %v6649_v51 }
 0x1cc   : > { %v5933_v50 = vadd.f32 %v2168_v8, %v1943_v10  ;;  %2481 = vmatprep.mubr.f32.mxu0 %v5664_v21  ;;  %2701 = vmatprep.mubr.f32.mxu1 %v6650_v39 }
 0x1cd   : > { %v1950_v12 = vpop.f32.mrf.mxu0  ;;  %v2170_v2 = vpop.f32.mrf.mxu1 }
 0x1ce   : > { %v1406_v12 = vsel %vm1263_vm1, %v5699_v44, 0.0  ;;  %v1676_v44 = vrot.slane %v5723_v35, 2 }
 0x1cf   : > { %v1953_v32 = vpop.f32.mrf.mxu0  ;;  %v2173_v25 = vpop.f32.mrf.mxu1  ;;  %2482 = vmatmul.mubr.f32.gmra.mxu0 %v6648_v47  ;;  %3708 = vmatmul.mubr.msk.f32.gmra.mxu1 %vm4692_vm3, %v5567_v45  ;;  %v1388_v45 = vsel %vm1263_vm1, 0.0, %v5695_v33 }
 0x1d0   : > { %v5944_v49 = vadd.f32 %v2173_v25, %v1948_v38  ;;  %2486 = vmatprep.mubr.f32.mxu0 %v5688_v41  ;;  %2706 = vmatprep.mubr.f32.mxu1 %v5673_v3  ;;  %v3088_v38 = vld [vmem:[%s6485_s9 + $0x58] sm:$0xff] }
 0x1d1   : > { %v1955_v0 = vpop.f32.mrf.mxu0  ;;  %v2175_v10 = vpop.f32.mrf.mxu1  ;;  %4013 = vmatprep.subr.mxu1 %v3088_v38 }
 0x1d2   : > { %4014 = vmatpush3.msra.mxu1 %v3088_v38  ;;  %v1675_v0 = vrot.slane %v1388_v45, 2  ;;  %v1671_v10 = vrot.slane %v1406_v12, 1 }
 0x1d3   : > { %v1958_v11 = vpop.f32.mrf.mxu0  ;;  %v2178_v27 = vpop.f32.mrf.mxu1  ;;  %2487 = vmatmul.mubr.f32.gmra.mxu0 %v6650_v39  ;;  %2707 = vmatmul.mubr.f32.gmra.mxu1 %v5595_v42  ;;  %v1668_v42 = vrot.slane %v1388_v45, 1  ;;  %v1669_v39 = vrot.slane %v5723_v35, 1 }
 0x1d4   : > { %v5950_v47 = vadd.f32 %v2178_v27, %v1953_v32  ;;  %2491 = vmatprep.mubr.f32.mxu0 %v5703_v23  ;;  %2711 = vmatprep.mubr.f32.mxu1 %v5684_v62  ;;  %v5985_v45 = vsel %vm1553_vm4, %v1675_v0, %v1676_v44  ;;  %v3086_v0 = vld [vmem:[%s6485_s9 + $0x48] sm:$0xff] }
 0x1d5   : > { %v1960_v61 = vpop.f32.mrf.mxu0  ;;  %v2180_v6 = vpop.f32.mrf.mxu1  ;;  %v1672_v38 = vsel %vm1440_vm2, %v1669_v39, %v1671_v10 }
 0x1d6   : > { %v3087_v6 = vld [vmem:[%s6485_s9 + $0x50] sm:$0xff] }
 0x1d7   : > { %v1963_v8 = vpop.f32.mrf.mxu0  ;;  %v2183_v51 = vpop.f32.mrf.mxu1  ;;  %2492 = vmatmul.mubr.f32.gmra.mxu0 %v5673_v3  ;;  %3710 = vmatmul.mubr.msk.f32.gmra.mxu1 %vm4692_vm3, %v5612_v46  ;;  %v1670_v46 = vsel %vm1440_vm2, %v1668_v42, %v1669_v39  ;;  %v6651_v39 = vld [vmem:[#allocation8_spill] sm:$0xff] }
 0x1d8   : > { %v5966_v2 = vadd.f32 %v2183_v51, %v1958_v11  ;;  %2496 = vmatprep.mubr.f32.mxu0 %v5727_v13  ;;  %2716 = vmatprep.mubr.f32.mxu1 %v5711_v34 }
 0x1d9   : > { %v1965_v15 = vpop.f32.mrf.mxu0  ;;  %v2185_v32 = vpop.f32.mrf.mxu1  ;;  %4015 = vmatprep.subr.mxu1 %v3087_v6 }
 0x1da   : > { %4016 = vmatpush3.msra.mxu1 %v3087_v6 }
 0x1db   : > { %v1968_v3 = vpop.f32.mrf.mxu0  ;;  %v2188_v25 = vpop.f32.mrf.mxu1  ;;  %2497 = vmatmul.mubr.f32.gmra.mxu0 %v5684_v62  ;;  %2717 = vmatmul.mubr.f32.gmra.mxu1 %v5647_v59 }
 0x1dc   : > { %v5974_v11 = vadd.f32 %v2188_v25, %v1963_v8  ;;  %2501 = vmatprep.mubr.f32.mxu0 %v5738_v58  ;;  %2721 = vmatprep.mubr.f32.mxu1 %v1670_v46  ;;  %v1678_v8 = vrot.slane %v1406_v12, 2 }
 0x1dd   : > { %v1970_v27 = vpop.f32.mrf.mxu0  ;;  %v2190_v61 = vpop.f32.mrf.mxu1  ;;  %4017 = vmatprep.subr.mxu1 %v3086_v0 }
 0x1de   : > { %v6653_v27 = vld [vmem:[#allocation9_spill] sm:$0xff]  ;;  %4018 = vmatpush3.msra.mxu1 %v3086_v0 }
 0x1df   : > { %v1973_v62 = vpop.f32.mrf.mxu0  ;;  %v2193_v59 = vpop.f32.mrf.mxu1  ;;  %2502 = vmatmul.mubr.f32.gmra.mxu0 %v5711_v34  ;;  %3712 = vmatmul.mubr.msk.f32.gmra.mxu1 %vm4692_vm3, %v5695_v33  ;;  %v5993_v33 = vsel %vm1553_vm4, %v1676_v44, %v1678_v8 }
 0x1e0   : > { %v5988_v51 = vadd.f32 %v2193_v59, %v1968_v3  ;;  %2506 = vmatprep.mubr.f32.mxu0 %v5985_v45  ;;  %2726 = vmatprep.mubr.f32.mxu1 %v1672_v38 }
 0x1e1   : > { %v1975_v42 = vpop.f32.mrf.mxu0  ;;  %v2195_v15 = vpop.f32.mrf.mxu1 }
 0x1e3   : > { %v1978_v32 = vpop.f32.mrf.mxu0  ;;  %v2198_v34 = vpop.f32.mrf.mxu1  ;;  %2507 = vmatmul.mubr.f32.gmra.mxu0 %v1670_v46  ;;  %2727 = vmatmul.mubr.f32.gmra.mxu1 %v5723_v35  ;;  %v6652_v35 = vld [vmem:[#allocation7_spill] sm:$0xff] }
 0x1e4   : > { %v5995_v25 = vadd.f32 %v2198_v34, %v1973_v62  ;;  %2511 = vmatprep.mubr.f32.mxu0 %v5993_v33  ;;  %2731 = vmatprep.mubr.f32.mxu1 %v6651_v39 }
 0x1e5   : > { %v1980_v12 = vpop.f32.mrf.mxu0  ;;  %v2200_v3 = vpop.f32.mrf.mxu1 }
 0x1e7   : > { %v1983_v10 = vpop.f32.mrf.mxu0  ;;  %v2203_v46 = vpop.f32.mrf.mxu1  ;;  %2512 = vmatmul.mubr.f32.gmra.mxu0 %v1672_v38  ;;  %3714 = vmatmul.mubr.msk.f32.gmra.mxu1 %vm4692_vm3, %v6652_v35 }
 0x1e8   : > { %v6005_v44 = vadd.f32 %v2203_v46, %v1978_v32  ;;  %3957 = vmatprep.mubr.f32.mxu0 %v4993_v60  ;;  %2736 = vmatprep.mubr.f32.mxu1 %v6653_v27  ;;  %v3085_v60 = vld [vmem:[%s6485_s9 + $0x40] sm:$0xff] }
 0x1e9   : > { %v1985_v61 = vpop.f32.mrf.mxu0  ;;  %v2205_v6 = vpop.f32.mrf.mxu1  ;;  %4019 = vmatprep.subr.mxu1 %v3085_v60 }
 0x1ea   : > { %4020 = vmatpush3.msra.mxu1 %v3085_v60 }
 0x1eb   : > { %v1988_v62 = vpop.f32.mrf.mxu0  ;;  %v2208_v59 = vpop.f32.mrf.mxu1  ;;  %2737 = vmatmul.mubr.f32.gmra.mxu1 %v6652_v35  ;;  %3958 = vmatmul.mubr.f32.vlgmr.msra.gmra.mxu0 %v5022_v16 }
 0x1ec   : > { %v6011_v38 = vadd.f32 %v2208_v59, %v1983_v10  ;;  %3960 = vmatprep.mubr.f32.mxu0 %v5053_v37 }
 0x1ed   : > { %v1990_v43 = vpop.f32.mrf.mxu0  ;;  %v2210_v8 = vpop.f32.mrf.mxu1 }
 0x1ef   : > { %v1993_v42 = vpop.f32.mrf.mxu0  ;;  %v2213_v15 = vpop.f32.mrf.mxu1  ;;  %3961 = vmatmul.mubr.f32.gmra.mxu0 %v5089_v4  ;;  %v3084_v4 = vld [vmem:[%s6485_s9 + $0x38] sm:$0xff] }
 0x1f0   : > { %v6018_v32 = vadd.f32 %v2213_v15, %v1988_v62  ;;  %3963 = vmatprep.mubr.f32.mxu0 %v5111_v14  ;;  %4021 = vmatprep.subr.mxu1 %v3084_v4 }
 0x1f1   : > { %v1995_v16 = vpop.f32.mrf.mxu0  ;;  %v2215_v34 = vpop.f32.mrf.mxu1  ;;  %4022 = vmatpush3.msra.mxu1 %v3084_v4 }
 0x1f3   : > { %v1998_v39 = vpop.f32.mrf.mxu0  ;;  %v2218_v37 = vpop.f32.mrf.mxu1  ;;  %3964 = vmatmul.mubr.f32.gmra.mxu0 %v5150_v53 }
 0x1f4   : > { %v6022_v12 = vadd.f32 %v2218_v37, %v1993_v42  ;;  %3966 = vmatprep.mubr.f32.mxu0 %v5171_v57 }
 0x1f5   : > { %v2000_v3 = vpop.f32.mrf.mxu0  ;;  %v2220_v0 = vpop.f32.mrf.mxu1 }
 0x1f7   : > { %v2003_v10 = vpop.f32.mrf.mxu0  ;;  %v2223_v46 = vpop.f32.mrf.mxu1  ;;  %3967 = vmatmul.mubr.f32.gmra.mxu0 %v6615_v56  ;;  %v3083_v56 = vld [vmem:[%s6485_s9 + $0x30] sm:$0xff] }
 0x1f8   : > { %v6029_v14 = vadd.f32 %v2223_v46, %v1998_v39  ;;  %3969 = vmatprep.mubr.f32.mxu0 %v6618_v22  ;;  %4023 = vmatprep.subr.mxu1 %v3083_v56 }
 0x1f9   : > { %v2005_v53 = vpop.f32.mrf.mxu0  ;;  %v2225_v35 = vpop.f32.mrf.mxu1  ;;  %4024 = vmatpush3.msra.mxu1 %v3083_v56 }
 0x1fb   : > { %v2008_v27 = vpop.f32.mrf.mxu0  ;;  %v2228_v57 = vpop.f32.mrf.mxu1  ;;  %3970 = vmatmul.mubr.f32.gmra.mxu0 %v6621_v18 }
 0x1fc   : > { %v6033_v61 = vadd.f32 %v2228_v57, %v2003_v10  ;;  %3972 = vmatprep.mubr.f32.mxu0 %v6624_v20 }
 0x1fd   : > { %v2010_v6 = vpop.f32.mrf.mxu0  ;;  %v2230_v62 = vpop.f32.mrf.mxu1 }
 0x1ff   : > { %v2013_v59 = vpop.f32.mrf.mxu0  ;;  %v2233_v43 = vpop.f32.mrf.mxu1  ;;  %3973 = vmatmul.mubr.f32.gmra.mxu0 %v6627_v7  ;;  %v3082_v7 = vld [vmem:[%s6485_s9 + $0x28] sm:$0xff] }
 0x200   : > { %v6040_v22 = vadd.f32 %v2233_v43, %v2008_v27  ;;  %3975 = vmatprep.mubr.f32.mxu0 %v6630_v5  ;;  %4025 = vmatprep.subr.mxu1 %v3082_v7 }
 0x201   : > { %v2015_v18 = vpop.f32.mrf.mxu0  ;;  %v2235_v8 = vpop.f32.mrf.mxu1  ;;  %4026 = vmatpush3.msra.mxu1 %v3082_v7 }
 0x203   : > { %v2018_v60 = vpop.f32.mrf.mxu0  ;;  %v2238_v20 = vpop.f32.mrf.mxu1  ;;  %3976 = vmatmul.mubr.f32.gmra.mxu0 %v6633_v26 }
 0x204   : > { %v6044_v42 = vadd.f32 %v2238_v20, %v2013_v59  ;;  %3978 = vmatprep.mubr.f32.mxu0 %v6636_v55 }
 0x205   : > { %v2020_v15 = vpop.f32.mrf.mxu0  ;;  %v2240_v16 = vpop.f32.mrf.mxu1 }
 0x207   : > { %v2023_v34 = vpop.f32.mrf.mxu0  ;;  %v2243_v39 = vpop.f32.mrf.mxu1  ;;  %3979 = vmatmul.mubr.f32.gmra.mxu0 %v5460_v28  ;;  %v3081_v28 = vld [vmem:[%s6485_s9 + $0x20] sm:$0xff] }
 0x208   : > { %v6051_v5 = vadd.f32 %v2243_v39, %v2018_v60  ;;  %3981 = vmatprep.mubr.f32.mxu0 %v5490_v54  ;;  %4027 = vmatprep.subr.mxu1 %v3081_v28 }
 0x209   : > { %v2025_v26 = vpop.f32.mrf.mxu0  ;;  %v2245_v37 = vpop.f32.mrf.mxu1  ;;  %4028 = vmatpush3.msra.mxu1 %v3081_v28 }
 0x20a   : > { %v6654_v26 = vld [vmem:[#allocation10_spill] sm:$0xff] }
 0x20b   : > { %v2028_v3 = vpop.f32.mrf.mxu0  ;;  %v2248_v55 = vpop.f32.mrf.mxu1  ;;  %3982 = vmatmul.mubr.f32.gmra.mxu0 %v5515_v1 }
 0x20c   : > { %v6055_v0 = vadd.f32 %v2248_v55, %v2023_v34  ;;  %3984 = vmatprep.mubr.f32.mxu0 %v5534_v19 }
 0x20d   : > { %v2030_v4 = vpop.f32.mrf.mxu0  ;;  %v2250_v10 = vpop.f32.mrf.mxu1 }
 0x20f   : > { %v2033_v46 = vpop.f32.mrf.mxu0  ;;  %v2253_v53 = vpop.f32.mrf.mxu1  ;;  %3985 = vmatmul.mubr.f32.gmra.mxu0 %v5561_v9  ;;  %v3080_v9 = vld [vmem:[%s6485_s9 + $0x18] sm:$0xff] }
 0x210   : > { %v6062_v54 = vadd.f32 %v2253_v53, %v2028_v3  ;;  %3987 = vmatprep.mubr.f32.mxu0 %v5587_v17  ;;  %4029 = vmatprep.subr.mxu1 %v3080_v9 }
 0x211   : > { %v2035_v1 = vpop.f32.mrf.mxu0  ;;  %v2255_v35 = vpop.f32.mrf.mxu1  ;;  %4030 = vmatpush3.msra.mxu1 %v3080_v9  ;;  %v6657_v9 = vld [vmem:[#allocation41_spill] sm:$0xff] }
 0x213   : > { %v2038_v27 = vpop.f32.mrf.mxu0  ;;  %v2258_v19 = vpop.f32.mrf.mxu1  ;;  %3988 = vmatmul.mubr.f32.gmra.mxu0 %v5615_v52 }
 0x214   : > { %v6066_v57 = vadd.f32 %v2258_v19, %v2033_v46  ;;  %3990 = vmatprep.mubr.f32.mxu0 %v6647_v63  ;;  %v6656_v46 = vld [vmem:[#allocation39_spill] sm:$0xff] }
 0x215   : > { %v2040_v6 = vpop.f32.mrf.mxu0  ;;  %v2260_v62 = vpop.f32.mrf.mxu1  ;;  %v2134_v53 = vadd.f32 %v5872_v31, %v6656_v46  ;;  %v3077_v31 = vld [vmem:[%s6485_s9] sm:$0xff] }
 0x217   : > { %v2043_v56 = vpop.f32.mrf.mxu0  ;;  %v2263_v59 = vpop.f32.mrf.mxu1  ;;  %3991 = vmatmul.mubr.f32.gmra.mxu0 %v5664_v21  ;;  %v3079_v21 = vld [vmem:[%s6485_s9 + $0x10] sm:$0xff] }
 0x218   : > { %v6073_v17 = vadd.f32 %v2263_v59, %v2038_v27  ;;  %3993 = vmatprep.mubr.f32.mxu0 %v5688_v41  ;;  %4031 = vmatprep.subr.mxu1 %v3079_v21 }
 0x219   : > { %v2045_v52 = vpop.f32.mrf.mxu0  ;;  %v2265_v43 = vpop.f32.mrf.mxu1  ;;  %4032 = vmatpush3.msra.mxu1 %v3079_v21 }
 0x21b   : > { %v2048_v18 = vpop.f32.mrf.mxu0  ;;  %v2268_v63 = vpop.f32.mrf.mxu1  ;;  %3994 = vmatmul.mubr.f32.gmra.mxu0 %v5703_v23 }
 0x21c   : > { %v6077_v8 = vadd.f32 %v2268_v63, %v2043_v56  ;;  %3996 = vmatprep.mubr.f32.mxu0 %v5727_v13  ;;  %v2139_v56 = vadd.f32 %v5880_v48, %v6657_v9 }
 0x21d   : > { %v2050_v60 = vpop.f32.mrf.mxu0  ;;  %v2270_v20 = vpop.f32.mrf.mxu1 }
 0x21f   : > { %v2053_v15 = vpop.f32.mrf.mxu0  ;;  %v2273_v16 = vpop.f32.mrf.mxu1  ;;  %3997 = vmatmul.mubr.f32.gmra.mxu0 %v5738_v58  ;;  %v3078_v58 = vld [vmem:[%s6485_s9 + $0x8] sm:$0xff] }
 0x220   : > { %v6084_v41 = vadd.f32 %v2273_v16, %v2048_v18  ;;  %3999 = vmatprep.mubr.f32.mxu0 %v5985_v45  ;;  %4033 = vmatprep.subr.mxu1 %v3078_v58  ;;  %v6655_v45 = vld [vmem:[#allocation11_spill] sm:$0xff] }
 0x221   : > { %v2055_v23 = vpop.f32.mrf.mxu0  ;;  %v2275_v7 = vpop.f32.mrf.mxu1  ;;  %4034 = vmatpush3.msra.mxu1 %v3078_v58 }
 0x222   : > { %4035 = vmatprep.subr.mxu1 %v3077_v31 }
 0x223   : > { %v2058_v34 = vpop.f32.mrf.mxu0  ;;  %v2278_v13 = vpop.f32.mrf.mxu1  ;;  %4000 = vmatmul.mubr.f32.gmra.mxu0 %v5993_v33  ;;  %4036 = vmatpush3.msra.mxu1 %v3077_v31 }
 0x224   : > { %v6088_v39 = vadd.f32 %v2278_v13, %v2053_v15  ;;  %4002 = vmatprep.mubr.f32.mxu0 %v6654_v26 }
 0x225   : > { %v2060_v37 = vpop.f32.mrf.mxu0  ;;  %v2280_v3 = vpop.f32.mrf.mxu1 }
 0x227   : > { %v2063_v55 = vpop.f32.mrf.mxu0  ;;  %v2283_v4 = vpop.f32.mrf.mxu1  ;;  %4003 = vmatmul.mubr.f32.gmra.mxu0 %v6655_v45 }
 0x228   : > { %v6095_v10 = vadd.f32 %v2283_v4, %v2058_v34 }
 0x229   : > { %v2065_v28 = vpop.f32.mrf.mxu0  ;;  %v2285_v33 = vpop.f32.mrf.mxu1 }
 0x22b   : > { %v2288_v1 = vpop.f32.mrf.mxu1  ;;  %v2358_v35 = vpop.f32.mrf.mxu0 }
 0x22c   : > { %v6099_v27 = vadd.f32 %v2288_v1, %v2063_v55  ;;  %v2359_v19 = vadd.f32 %v2358_v35, %v2134_v53 }
 0x22d   : > { %v2290_v6 = vpop.f32.mrf.mxu1  ;;  %v2360_v62 = vpop.f32.mrf.mxu0 }
 0x22f   : > { %v2363_v59 = vpop.f32.mrf.mxu0  ;;  %v2583_v52 = vpop.f32.mrf.mxu1 }
 0x230   : > { %v2364_v43 = vadd.f32 %v2363_v59, %v2139_v56  ;;  %v6103_v18 = vadd.f32 %v2583_v52, %v2359_v19 }
 0x231   : > { %v2365_v63 = vpop.f32.mrf.mxu0  ;;  %v2585_v60 = vpop.f32.mrf.mxu1 }
 0x233   : > { %v2368_v20 = vpop.f32.mrf.mxu0  ;;  %v2588_v21 = vpop.f32.mrf.mxu1 }
 0x234   : > { %v2369_v15 = vadd.f32 %v2368_v20, %v5893_v30  ;;  %v6109_v16 = vadd.f32 %v2588_v21, %v2364_v43 }
 0x235   : > { %v2370_v48 = vpop.f32.mrf.mxu0  ;;  %v2590_v23 = vpop.f32.mrf.mxu1 }
 0x237   : > { %v2373_v7 = vpop.f32.mrf.mxu0  ;;  %v2593_v34 = vpop.f32.mrf.mxu1 }
 0x238   : > { %v2374_v13 = vadd.f32 %v2373_v7, %v5899_v24  ;;  %v6112_v26 = vadd.f32 %v2593_v34, %v2369_v15 }
 0x239   : > { %v2375_v37 = vpop.f32.mrf.mxu0  ;;  %v2595_v3 = vpop.f32.mrf.mxu1 }
 0x23b   : > { %v2378_v58 = vpop.f32.mrf.mxu0  ;;  %v2598_v55 = vpop.f32.mrf.mxu1 }
 0x23c   : > { %v2379_v4 = vadd.f32 %v2378_v58, %v5910_v36  ;;  %v6115_v45 = vadd.f32 %v2598_v55, %v2374_v13 }
 0x23d   : > { %v2380_v30 = vpop.f32.mrf.mxu0  ;;  %v2600_v28 = vpop.f32.mrf.mxu1 }
 0x23f   : > { %v2383_v33 = vpop.f32.mrf.mxu0  ;;  %v2603_v46 = vpop.f32.mrf.mxu1 }
 0x240   : > { %v2384_v53 = vadd.f32 %v2383_v33, %v5916_v40  ;;  %v6118_v1 = vadd.f32 %v2603_v46, %v2379_v4 }
 0x241   : > { %v2385_v35 = vpop.f32.mrf.mxu0  ;;  %v2605_v24 = vpop.f32.mrf.mxu1 }
 0x243   : > { %v2388_v19 = vpop.f32.mrf.mxu0  ;;  %v2608_v6 = vpop.f32.mrf.mxu1 }
 0x244   : > { %v2389_v62 = vadd.f32 %v2388_v19, %v5927_v29  ;;  %v6121_v9 = vadd.f32 %v2608_v6, %v2384_v53 }
 0x245   : > { %v2390_v56 = vpop.f32.mrf.mxu0  ;;  %v2610_v36 = vpop.f32.mrf.mxu1 }
 0x247   : > { %v2393_v59 = vpop.f32.mrf.mxu0  ;;  %v2613_v52 = vpop.f32.mrf.mxu1 }
 0x248   : > { %v2394_v43 = vadd.f32 %v2393_v59, %v5933_v50  ;;  %v6124_v63 = vadd.f32 %v2613_v52, %v2389_v62 }
 0x249   : > { %v2395_v60 = vpop.f32.mrf.mxu0  ;;  %v2615_v40 = vpop.f32.mrf.mxu1 }
 0x24b   : > { %v2398_v31 = vpop.f32.mrf.mxu0  ;;  %v2618_v20 = vpop.f32.mrf.mxu1 }
 0x24c   : > { %v2399_v21 = vadd.f32 %v2398_v31, %v5944_v49  ;;  %v6127_v15 = vadd.f32 %v2618_v20, %v2394_v43 }
 0x24d   : > { %v2400_v48 = vpop.f32.mrf.mxu0  ;;  %v2620_v29 = vpop.f32.mrf.mxu1 }
 0x24f   : > { %v2403_v23 = vpop.f32.mrf.mxu0  ;;  %v2623_v7 = vpop.f32.mrf.mxu1 }
 0x250   : > { %v2404_v34 = vadd.f32 %v2403_v23, %v5950_v47  ;;  %v6130_v13 = vadd.f32 %v2623_v7, %v2399_v21 }
 0x251   : > { %v2405_v37 = vpop.f32.mrf.mxu0  ;;  %v2625_v50 = vpop.f32.mrf.mxu1 }
 0x253   : > { %v2408_v3 = vpop.f32.mrf.mxu0  ;;  %v2628_v58 = vpop.f32.mrf.mxu1 }
 0x254   : > { %v2409_v55 = vadd.f32 %v2408_v3, %v5966_v2  ;;  %v6133_v4 = vadd.f32 %v2628_v58, %v2404_v34 }
 0x255   : > { %v2410_v30 = vpop.f32.mrf.mxu0  ;;  %v2630_v49 = vpop.f32.mrf.mxu1 }
 0x257   : > { %v2413_v28 = vpop.f32.mrf.mxu0  ;;  %v2633_v33 = vpop.f32.mrf.mxu1 }
 0x258   : > { %v2414_v46 = vadd.f32 %v2413_v28, %v5974_v11  ;;  %v6136_v53 = vadd.f32 %v2633_v33, %v2409_v55 }
 0x259   : > { %v2415_v35 = vpop.f32.mrf.mxu0  ;;  %v2635_v47 = vpop.f32.mrf.mxu1 }
 0x25b   : > { %v2418_v24 = vpop.f32.mrf.mxu0  ;;  %v2638_v19 = vpop.f32.mrf.mxu1 }
 0x25c   : > { %v2419_v6 = vadd.f32 %v2418_v24, %v5988_v51  ;;  %v6139_v62 = vadd.f32 %v2638_v19, %v2414_v46 }
 0x25d   : > { %v2420_v56 = vpop.f32.mrf.mxu0  ;;  %v2640_v2 = vpop.f32.mrf.mxu1 }
 0x25f   : > { %v2423_v36 = vpop.f32.mrf.mxu0  ;;  %v2643_v59 = vpop.f32.mrf.mxu1 }
 0x260   : > { %v2424_v52 = vadd.f32 %v2423_v36, %v5995_v25  ;;  %v6142_v43 = vadd.f32 %v2643_v59, %v2419_v6 }
 0x261   : > { %v2425_v60 = vpop.f32.mrf.mxu0  ;;  %v2645_v11 = vpop.f32.mrf.mxu1 }
 0x263   : > { %v2428_v40 = vpop.f32.mrf.mxu0  ;;  %v2648_v31 = vpop.f32.mrf.mxu1 }
 0x264   : > { %v2429_v20 = vadd.f32 %v2428_v40, %v6005_v44  ;;  %v6145_v21 = vadd.f32 %v2648_v31, %v2424_v52 }
 0x265   : > { %v2430_v48 = vpop.f32.mrf.mxu0  ;;  %v2650_v51 = vpop.f32.mrf.mxu1 }
 0x267   : > { %v2433_v29 = vpop.f32.mrf.mxu0  ;;  %v2653_v23 = vpop.f32.mrf.mxu1 }
 0x268   : > { %v2434_v7 = vadd.f32 %v2433_v29, %v6011_v38  ;;  %v6148_v34 = vadd.f32 %v2653_v23, %v2429_v20 }
 0x269   : > { %v2435_v37 = vpop.f32.mrf.mxu0  ;;  %v2655_v25 = vpop.f32.mrf.mxu1 }
 0x26b   : > { %v2438_v50 = vpop.f32.mrf.mxu0  ;;  %v2658_v3 = vpop.f32.mrf.mxu1 }
 0x26c   : > { %v2439_v58 = vadd.f32 %v2438_v50, %v6018_v32  ;;  %v6151_v55 = vadd.f32 %v2658_v3, %v2434_v7 }
 0x26d   : > { %v2440_v30 = vpop.f32.mrf.mxu0  ;;  %v2660_v44 = vpop.f32.mrf.mxu1 }
 0x26f   : > { %v2443_v49 = vpop.f32.mrf.mxu0  ;;  %v2663_v28 = vpop.f32.mrf.mxu1 }
 0x270   : > { %v2444_v33 = vadd.f32 %v2443_v49, %v6022_v12  ;;  %v6154_v46 = vadd.f32 %v2663_v28, %v2439_v58 }
 0x271   : > { %v2445_v35 = vpop.f32.mrf.mxu0  ;;  %v2665_v38 = vpop.f32.mrf.mxu1 }
 0x273   : > { %v2448_v47 = vpop.f32.mrf.mxu0  ;;  %v2668_v24 = vpop.f32.mrf.mxu1 }
 0x274   : > { %v2449_v19 = vadd.f32 %v2448_v47, %v6029_v14  ;;  %v6157_v6 = vadd.f32 %v2668_v24, %v2444_v33 }
 0x275   : > { %v2450_v56 = vpop.f32.mrf.mxu0  ;;  %v2670_v32 = vpop.f32.mrf.mxu1 }
 0x277   : > { %v2453_v2 = vpop.f32.mrf.mxu0  ;;  %v2673_v36 = vpop.f32.mrf.mxu1 }
 0x278   : > { %v2454_v59 = vadd.f32 %v2453_v2, %v6033_v61  ;;  %v6160_v52 = vadd.f32 %v2673_v36, %v2449_v19 }
 0x279   : > { %v2455_v60 = vpop.f32.mrf.mxu0  ;;  %v2675_v12 = vpop.f32.mrf.mxu1 }
 0x27b   : > { %v2458_v11 = vpop.f32.mrf.mxu0  ;;  %v2678_v40 = vpop.f32.mrf.mxu1 }
 0x27c   : > { %v2459_v31 = vadd.f32 %v2458_v11, %v6040_v22  ;;  %v6163_v20 = vadd.f32 %v2678_v40, %v2454_v59 }
 0x27d   : > { %v2460_v48 = vpop.f32.mrf.mxu0  ;;  %v2680_v14 = vpop.f32.mrf.mxu1 }
 0x27f   : > { %v2463_v51 = vpop.f32.mrf.mxu0  ;;  %v2683_v29 = vpop.f32.mrf.mxu1 }
 0x280   : > { %v2464_v23 = vadd.f32 %v2463_v51, %v6044_v42  ;;  %v6166_v7 = vadd.f32 %v2683_v29, %v2459_v31 }
 0x281   : > { %v2465_v37 = vpop.f32.mrf.mxu0  ;;  %v2685_v61 = vpop.f32.mrf.mxu1 }
 0x283   : > { %v2468_v25 = vpop.f32.mrf.mxu0  ;;  %v2688_v50 = vpop.f32.mrf.mxu1 }
 0x284   : > { %v2469_v3 = vadd.f32 %v2468_v25, %v6051_v5  ;;  %v6169_v58 = vadd.f32 %v2688_v50, %v2464_v23 }
 0x285   : > { %v2470_v30 = vpop.f32.mrf.mxu0  ;;  %v2690_v22 = vpop.f32.mrf.mxu1 }
 0x287   : > { %v2473_v44 = vpop.f32.mrf.mxu0  ;;  %v2693_v49 = vpop.f32.mrf.mxu1 }
 0x288   : > { %v2474_v28 = vadd.f32 %v2473_v44, %v6055_v0  ;;  %v6172_v33 = vadd.f32 %v2693_v49, %v2469_v3 }
 0x289   : > { %v2475_v35 = vpop.f32.mrf.mxu0  ;;  %v2695_v42 = vpop.f32.mrf.mxu1 }
 0x28b   : > { %v2478_v38 = vpop.f32.mrf.mxu0  ;;  %v2698_v47 = vpop.f32.mrf.mxu1 }
 0x28c   : > { %v2479_v24 = vadd.f32 %v2478_v38, %v6062_v54  ;;  %v6175_v19 = vadd.f32 %v2698_v47, %v2474_v28 }
 0x28d   : > { %v2480_v56 = vpop.f32.mrf.mxu0  ;;  %v2700_v5 = vpop.f32.mrf.mxu1 }
 0x28f   : > { %v2483_v32 = vpop.f32.mrf.mxu0  ;;  %v2703_v2 = vpop.f32.mrf.mxu1 }
 0x290   : > { %v2484_v36 = vadd.f32 %v2483_v32, %v6066_v57  ;;  %v6178_v59 = vadd.f32 %v2703_v2, %v2479_v24 }
 0x291   : > { %v2485_v60 = vpop.f32.mrf.mxu0  ;;  %v2705_v0 = vpop.f32.mrf.mxu1 }
 0x293   : > { %v2488_v12 = vpop.f32.mrf.mxu0  ;;  %v2708_v11 = vpop.f32.mrf.mxu1 }
 0x294   : > { %v2489_v40 = vadd.f32 %v2488_v12, %v6073_v17  ;;  %v6181_v31 = vadd.f32 %v2708_v11, %v2484_v36  ;;  %v6204_v12 = vld [vmem:[%s6483_s7] ss:$0 sm:$0xff] }
 0x295   : > { %v2490_v48 = vpop.f32.mrf.mxu0  ;;  %v2710_v54 = vpop.f32.mrf.mxu1 }
 0x296   : > { %v6211_v54 = vld [vmem:[%s6484_s8] ss:$0 sm:$0xff] }
 0x297   : > { %v2493_v14 = vpop.f32.mrf.mxu0  ;;  %v2713_v51 = vpop.f32.mrf.mxu1 }
 0x298   : > { %v2494_v29 = vadd.f32 %v2493_v14, %v6077_v8  ;;  %v6184_v23 = vadd.f32 %v2713_v51, %v2489_v40 }
 0x299   : > { %v2495_v37 = vpop.f32.mrf.mxu0  ;;  %v2715_v57 = vpop.f32.mrf.mxu1 }
 0x29b   : > { %v2498_v61 = vpop.f32.mrf.mxu0  ;;  %v2718_v25 = vpop.f32.mrf.mxu1 }
 0x29c   : > { %v2499_v50 = vadd.f32 %v2498_v61, %v6084_v41  ;;  %v6187_v3 = vadd.f32 %v2718_v25, %v2494_v29 }
 0x29d   : > { %v2500_v30 = vpop.f32.mrf.mxu0  ;;  %v2720_v17 = vpop.f32.mrf.mxu1 }
 0x29f   : > { %v2503_v22 = vpop.f32.mrf.mxu0  ;;  %v2723_v44 = vpop.f32.mrf.mxu1 }
 0x2a0   : > { %v2504_v49 = vadd.f32 %v2503_v22, %v6088_v39  ;;  %v6190_v28 = vadd.f32 %v2723_v44, %v2499_v50 }
 0x2a1   : > { %v2505_v35 = vpop.f32.mrf.mxu0  ;;  %v2725_v8 = vpop.f32.mrf.mxu1 }
 0x2a3   : > { %v2508_v42 = vpop.f32.mrf.mxu0  ;;  %v2728_v38 = vpop.f32.mrf.mxu1 }
 0x2a4   : > { %v2509_v47 = vadd.f32 %v2508_v42, %v6095_v10  ;;  %v6193_v24 = vadd.f32 %v2728_v38, %v2504_v49 }
 0x2a5   : > { %v2510_v56 = vpop.f32.mrf.mxu0  ;;  %v2730_v41 = vpop.f32.mrf.mxu1 }
 0x2a7   : > { %v6195_v5 = vpop.f32.mrf.mxu0  ;;  %v2733_v32 = vpop.f32.mrf.mxu1 }
 0x2a8   : > { %v6197_v2 = vadd.f32 %v2733_v32, %v2509_v47 }
 0x2a9   : > { %v2515_v36 = vpop.f32.mrf.mxu0  ;;  %v2735_v60 = vpop.f32.mrf.mxu1 }
 0x2ab   : > { %v6199_v39 = vpop.f32.mrf.mxu1  ;;  %v3959_v0 = vpop.f32.mrf.mxu0 }
 0x2ac   : > { %v2814_v10 = vadd.f32 %v3959_v0, %v6109_v16 }
 0x2ad   : > { %v2808_v11 = vpop.f32.mrf.mxu0  ;;  %v2740_v40 = vpop.f32.mrf.mxu1 }
 0x2ae   : > { %v2975_v48 = vmul.f32 %v6204_v12, %v2814_v10  ;;  %v2809_v14 = vadd.f32 %v2808_v11, %v6103_v18 }
 0x2af   : > { %v3962_v51 = vpop.f32.mrf.mxu0 }
 0x2b0   : > { %v2974_v29 = vmul.f32 %v6204_v12, %v2809_v14  ;;  %v2824_v37 = vadd.f32 %v3962_v51, %v6115_v45  ;;  %v3014_v57 = vadd.f32 %v6211_v54, %v2975_v48 }
 0x2b1   : > { %v2818_v61 = vpop.f32.mrf.mxu0 }
 0x2b2   : > { %v2977_v16 = vmul.f32 %v6204_v12, %v2824_v37  ;;  %v2819_v25 = vadd.f32 %v2818_v61, %v6112_v26  ;;  %v3013_v50 = vadd.f32 %v6211_v54, %v2974_v29  ;;  %v3046_v44 = vmax.f32 %v3014_v57, 0.0 }
 0x2b3   : > { %v3965_v30 = vpop.f32.mrf.mxu0 }
 0x2b4   : > { %v2976_v17 = vmul.f32 %v6204_v12, %v2819_v25  ;;  %v2834_v22 = vadd.f32 %v3965_v30, %v6121_v9  ;;  %v3045_v18 = vmax.f32 %v3013_v50, 0.0  ;;  %v3016_v49 = vadd.f32 %v6211_v54, %v2977_v16 }
 0x2b5   : > { %v2828_v35 = vpop.f32.mrf.mxu0 }
 0x2b6   : > { %v2979_v45 = vmul.f32 %v6204_v12, %v2834_v22  ;;  %v2829_v8 = vadd.f32 %v2828_v35, %v6118_v1  ;;  %4037 = vmatprep.mubr.f32.mxu1 %v3045_v18  ;;  %v3015_v42 = vadd.f32 %v6211_v54, %v2976_v17  ;;  %v3048_v9 = vmax.f32 %v3016_v49, 0.0 }
 0x2b7   : > { %v3968_v26 = vpop.f32.mrf.mxu0  ;;  %4038 = vmatmul.mubr.f32.vlgmr.msra.gmra.mxu1 %v3046_v44 }
 0x2b8   : > { %v2978_v38 = vmul.f32 %v6204_v12, %v2829_v8  ;;  %v2844_v47 = vadd.f32 %v3968_v26, %v6127_v15  ;;  %v3047_v56 = vmax.f32 %v3015_v42, 0.0  ;;  %v3018_v41 = vadd.f32 %v6211_v54, %v2979_v45 }
 0x2b9   : > { %v2838_v32 = vpop.f32.mrf.mxu0 }
 0x2ba   : > { %v2981_v36 = vmul.f32 %v6204_v12, %v2844_v47  ;;  %v2839_v60 = vadd.f32 %v2838_v32, %v6124_v63  ;;  %4040 = vmatprep.mubr.f32.mxu1 %v3047_v56  ;;  %v3017_v1 = vadd.f32 %v6211_v54, %v2978_v38  ;;  %v3050_v15 = vmax.f32 %v3018_v41, 0.0 }
 0x2bb   : > { %v3971_v0 = vpop.f32.mrf.mxu0  ;;  %4041 = vmatmul.mubr.f32.gmra.mxu1 %v3048_v9 }
 0x2bc   : > { %v2980_v10 = vmul.f32 %v6204_v12, %v2839_v60  ;;  %v2854_v11 = vadd.f32 %v3971_v0, %v6133_v4  ;;  %v3049_v40 = vmax.f32 %v3017_v1, 0.0  ;;  %v3020_v48 = vadd.f32 %v6211_v54, %v2981_v36 }
 0x2bd   : > { %v2848_v14 = vpop.f32.mrf.mxu0 }
 0x2be   : > { %v2983_v51 = vmul.f32 %v6204_v12, %v2854_v11  ;;  %v2849_v29 = vadd.f32 %v2848_v14, %v6130_v13  ;;  %4043 = vmatprep.mubr.f32.mxu1 %v3049_v40  ;;  %v3019_v63 = vadd.f32 %v6211_v54, %v2980_v10  ;;  %v3052_v4 = vmax.f32 %v3020_v48, 0.0 }
 0x2bf   : > { %v3974_v37 = vpop.f32.mrf.mxu0  ;;  %4044 = vmatmul.mubr.f32.gmra.mxu1 %v3050_v15 }
 0x2c0   : > { %v2982_v57 = vmul.f32 %v6204_v12, %v2849_v29  ;;  %v2864_v61 = vadd.f32 %v3974_v37, %v6139_v62  ;;  %v3051_v16 = vmax.f32 %v3019_v63, 0.0  ;;  %v3022_v25 = vadd.f32 %v6211_v54, %v2983_v51 }
 0x2c1   : > { %v2858_v50 = vpop.f32.mrf.mxu0 }
 0x2c2   : > { %v2985_v30 = vmul.f32 %v6204_v12, %v2864_v61  ;;  %v2859_v17 = vadd.f32 %v2858_v50, %v6136_v53  ;;  %4046 = vmatprep.mubr.f32.mxu1 %v3051_v16  ;;  %v3021_v13 = vadd.f32 %v6211_v54, %v2982_v57  ;;  %v3054_v62 = vmax.f32 %v3022_v25, 0.0 }
 0x2c3   : > { %v3977_v22 = vpop.f32.mrf.mxu0  ;;  %4047 = vmatmul.mubr.f32.gmra.mxu1 %v3052_v4 }
 0x2c4   : > { %v2984_v18 = vmul.f32 %v6204_v12, %v2859_v17  ;;  %v2874_v44 = vadd.f32 %v3977_v22, %v6145_v21  ;;  %v3053_v49 = vmax.f32 %v3021_v13, 0.0  ;;  %v3024_v35 = vadd.f32 %v6211_v54, %v2985_v30 }
 0x2c5   : > { %v2868_v45 = vpop.f32.mrf.mxu0 }
 0x2c6   : > { %v2987_v8 = vmul.f32 %v6204_v12, %v2874_v44  ;;  %v2869_v42 = vadd.f32 %v2868_v45, %v6142_v43  ;;  %4049 = vmatprep.mubr.f32.mxu1 %v3053_v49  ;;  %v3023_v53 = vadd.f32 %v6211_v54, %v2984_v18  ;;  %v3056_v21 = vmax.f32 %v3024_v35, 0.0 }
 0x2c7   : > { %v3980_v26 = vpop.f32.mrf.mxu0  ;;  %4050 = vmatmul.mubr.f32.gmra.mxu1 %v3054_v62 }
 0x2c8   : > { %v2986_v38 = vmul.f32 %v6204_v12, %v2869_v42  ;;  %v2884_v47 = vadd.f32 %v3980_v26, %v6151_v55  ;;  %v3055_v56 = vmax.f32 %v3023_v53, 0.0  ;;  %v3026_v9 = vadd.f32 %v6211_v54, %v2987_v8 }
 0x2c9   : > { %v2878_v41 = vpop.f32.mrf.mxu0 }
 0x2ca   : > { %v2989_v32 = vmul.f32 %v6204_v12, %v2884_v47  ;;  %v2879_v36 = vadd.f32 %v2878_v41, %v6148_v34  ;;  %4052 = vmatprep.mubr.f32.mxu1 %v3055_v56  ;;  %v3025_v43 = vadd.f32 %v6211_v54, %v2986_v38  ;;  %v3058_v55 = vmax.f32 %v3026_v9, 0.0 }
 0x2cb   : > { %v3983_v60 = vpop.f32.mrf.mxu0  ;;  %4053 = vmatmul.mubr.f32.gmra.mxu1 %v3056_v21 }
 0x2cc   : > { %v2988_v1 = vmul.f32 %v6204_v12, %v2879_v36  ;;  %v2894_v0 = vadd.f32 %v3983_v60, %v6157_v6  ;;  %v3057_v10 = vmax.f32 %v3025_v43, 0.0  ;;  %v3028_v11 = vadd.f32 %v6211_v54, %v2989_v32 }
 0x2cd   : > { %v2888_v40 = vpop.f32.mrf.mxu0 }
 0x2ce   : > { %v2991_v15 = vmul.f32 %v6204_v12, %v2894_v0  ;;  %v2889_v48 = vadd.f32 %v2888_v40, %v6154_v46  ;;  %4055 = vmatprep.mubr.f32.mxu1 %v3057_v10  ;;  %v3027_v34 = vadd.f32 %v6211_v54, %v2988_v1  ;;  %v3060_v6 = vmax.f32 %v3028_v11, 0.0 }
 0x2cf   : > { %v3986_v14 = vpop.f32.mrf.mxu0  ;;  %4056 = vmatmul.mubr.f32.gmra.mxu1 %v3058_v55 }
 0x2d0   : > { %v2990_v51 = vmul.f32 %v6204_v12, %v2889_v48  ;;  %v2904_v29 = vadd.f32 %v3986_v14, %v6163_v20  ;;  %v3059_v63 = vmax.f32 %v3027_v34, 0.0  ;;  %v3030_v37 = vadd.f32 %v6211_v54, %v2991_v15 }
 0x2d1   : > { %v2898_v57 = vpop.f32.mrf.mxu0  ;;  %v2514_v15 = vadd.f32 %v6195_v5, %v6099_v27 }
 0x2d2   : > { %v2993_v61 = vmul.f32 %v6204_v12, %v2904_v29  ;;  %v2899_v16 = vadd.f32 %v2898_v57, %v6160_v52  ;;  %4058 = vmatprep.mubr.f32.mxu1 %v3059_v63  ;;  %v3029_v46 = vadd.f32 %v6211_v54, %v2990_v51  ;;  %v3062_v20 = vmax.f32 %v3030_v37, 0.0 }
 0x2d3   : > { %v3989_v4 = vpop.f32.mrf.mxu0  ;;  %4059 = vmatmul.mubr.f32.gmra.mxu1 %v3060_v6  ;;  %v2739_v63 = vadd.f32 %v6199_v39, %v2514_v15 }
 0x2d4   : > { %v2992_v25 = vmul.f32 %v6204_v12, %v2899_v16  ;;  %v2914_v50 = vadd.f32 %v3989_v4, %v6169_v58  ;;  %v3061_v30 = vmax.f32 %v3029_v46, 0.0  ;;  %v3032_v17 = vadd.f32 %v6211_v54, %v2993_v61 }
 0x2d5   : > { %v2908_v13 = vpop.f32.mrf.mxu0 }
 0x2d6   : > { %v2995_v22 = vmul.f32 %v6204_v12, %v2914_v50  ;;  %v2909_v18 = vadd.f32 %v2908_v13, %v6166_v7  ;;  %4061 = vmatprep.mubr.f32.mxu1 %v3061_v30  ;;  %v3031_v52 = vadd.f32 %v6211_v54, %v2992_v25  ;;  %v3064_v58 = vmax.f32 %v3032_v17, 0.0 }
 0x2d7   : > { %v3992_v44 = vpop.f32.mrf.mxu0  ;;  %4062 = vmatmul.mubr.f32.gmra.mxu1 %v3062_v20 }
 0x2d8   : > { %v2994_v49 = vmul.f32 %v6204_v12, %v2909_v18  ;;  %v2924_v62 = vadd.f32 %v3992_v44, %v6175_v19  ;;  %v3063_v35 = vmax.f32 %v3031_v52, 0.0  ;;  %v3034_v45 = vadd.f32 %v6211_v54, %v2995_v22  ;;  %v6320_v18 = vld [vmem:[%s6487_s11] ss:$0 sm:$0xff] }
 0x2d9   : > { %v2918_v8 = vpop.f32.mrf.mxu0 }
 0x2da   : > { %v2997_v42 = vmul.f32 %v6204_v12, %v2924_v62  ;;  %v2919_v53 = vadd.f32 %v2918_v8, %v6172_v33  ;;  %4064 = vmatprep.mubr.f32.mxu1 %v3063_v35  ;;  %v3033_v7 = vadd.f32 %v6211_v54, %v2994_v49  ;;  %v3066_v19 = vmax.f32 %v3034_v45, 0.0 }
 0x2db   : > { %v3995_v26 = vpop.f32.mrf.mxu0  ;;  %4065 = vmatmul.mubr.f32.gmra.mxu1 %v3064_v58 }
 0x2dc   : > { %v2996_v38 = vmul.f32 %v6204_v12, %v2919_v53  ;;  %v2934_v47 = vadd.f32 %v3995_v26, %v6181_v31  ;;  %v3065_v56 = vmax.f32 %v3033_v7, 0.0  ;;  %v3036_v21 = vadd.f32 %v6211_v54, %v2997_v42 }
 0x2dd   : > { %v2928_v9 = vpop.f32.mrf.mxu0 }
 0x2de   : > { %v2999_v41 = vmul.f32 %v6204_v12, %v2934_v47  ;;  %v2929_v32 = vadd.f32 %v2928_v9, %v6178_v59  ;;  %4067 = vmatprep.mubr.f32.mxu1 %v3065_v56  ;;  %v3035_v33 = vadd.f32 %v6211_v54, %v2996_v38  ;;  %v3068_v31 = vmax.f32 %v3036_v21, 0.0 }
 0x2df   : > { %v3998_v36 = vpop.f32.mrf.mxu0  ;;  %4068 = vmatmul.mubr.f32.gmra.mxu1 %v3066_v19 }
 0x2e0   : > { %v2998_v43 = vmul.f32 %v6204_v12, %v2929_v32  ;;  %v2944_v60 = vadd.f32 %v3998_v36, %v6187_v3  ;;  %v3067_v1 = vmax.f32 %v3035_v33, 0.0  ;;  %v3038_v0 = vadd.f32 %v6211_v54, %v2999_v41 }
 0x2e1   : > { %v2938_v10 = vpop.f32.mrf.mxu0 }
 0x2e2   : > { %v3001_v55 = vmul.f32 %v6204_v12, %v2944_v60  ;;  %v2939_v11 = vadd.f32 %v2938_v10, %v6184_v23  ;;  %4070 = vmatprep.mubr.f32.mxu1 %v3067_v1  ;;  %v3037_v59 = vadd.f32 %v6211_v54, %v2998_v43  ;;  %v3070_v14 = vmax.f32 %v3038_v0, 0.0 }
 0x2e3   : > { %v4001_v40 = vpop.f32.mrf.mxu0  ;;  %4071 = vmatmul.mubr.f32.gmra.mxu1 %v3068_v31 }
 0x2e4   : > { %v3000_v48 = vmul.f32 %v6204_v12, %v2939_v11  ;;  %v2954_v3 = vadd.f32 %v4001_v40, %v6193_v24  ;;  %v3069_v34 = vmax.f32 %v3037_v59, 0.0  ;;  %v3040_v51 = vadd.f32 %v6211_v54, %v3001_v55 }
 0x2e5   : > { %v2948_v29 = vpop.f32.mrf.mxu0 }
 0x2e6   : > { %v3003_v23 = vmul.f32 %v6204_v12, %v2954_v3  ;;  %v2949_v6 = vadd.f32 %v2948_v29, %v6190_v28  ;;  %4073 = vmatprep.mubr.f32.mxu1 %v3069_v34  ;;  %v3039_v37 = vadd.f32 %v6211_v54, %v3000_v48  ;;  %v3072_v61 = vmax.f32 %v3040_v51, 0.0 }
 0x2e7   : > { %v4004_v57 = vpop.f32.mrf.mxu0  ;;  %4074 = vmatmul.mubr.f32.gmra.mxu1 %v3070_v14 }
 0x2e8   : > { %v3002_v27 = vmul.f32 %v6204_v12, %v2949_v6  ;;  %v2964_v5 = vadd.f32 %v4004_v57, %v2739_v63  ;;  %v3071_v24 = vmax.f32 %v3039_v37, 0.0  ;;  %v3042_v16 = vadd.f32 %v6211_v54, %v3003_v23 }
 0x2e9   : > { %v2958_v46 = vpop.f32.mrf.mxu0 }
 0x2ea   : > { %v3005_v4 = vmul.f32 %v6204_v12, %v2964_v5  ;;  %v2959_v39 = vadd.f32 %v2958_v46, %v6197_v2  ;;  %4076 = vmatprep.mubr.f32.mxu1 %v3071_v24  ;;  %v3041_v28 = vadd.f32 %v6211_v54, %v3002_v27  ;;  %v3074_v30 = vmax.f32 %v3042_v16, 0.0  ;;  %v6313_v2 = vld [vmem:[%s6486_s10] ss:$0 sm:$0xff] }
 0x2eb   : > { %4077 = vmatmul.mubr.f32.gmra.mxu1 %v3072_v61 }
 0x2ec   : > { %v3004_v25 = vmul.f32 %v6204_v12, %v2959_v39  ;;  %v3073_v50 = vmax.f32 %v3041_v28, 0.0  ;;  %v3044_v20 = vadd.f32 %v6211_v54, %v3005_v4 }
 0x2ee   : > { %4079 = vmatprep.mubr.f32.mxu1 %v3073_v50  ;;  %v3043_v17 = vadd.f32 %v6211_v54, %v3004_v25  ;;  %v3076_v22 = vmax.f32 %v3044_v20, 0.0 }
 0x2ef   : > { %4080 = vmatmul.mubr.f32.gmra.mxu1 %v3074_v30 }
 0x2f0   : > { %v3075_v13 = vmax.f32 %v3043_v17, 0.0 }
 0x2f2   : > { %4082 = vmatprep.mubr.f32.mxu1 %v3075_v13 }
 0x2f3   : > { %4083 = vmatmul.mubr.f32.gmra.mxu1 %v3076_v22 }
 0x377   : > { %v4039_v12 = vpop.f32.mrf.mxu1 }
 0x378   : > { %v3326_v54 = vmul.f32 %v4039_v12, %v6313_v2 }
 0x379   : > { %v3159_v52 = vpop.f32.mrf.mxu1 }
 0x37a   : > { %v3365_v44 = vadd.f32 %v6320_v18, %v3326_v54  ;;  %v3325_v49 = vmul.f32 %v6313_v2, %v3159_v52 }
 0x37b   : > { %v4042_v62 = vpop.f32.mrf.mxu1 }
 0x37c   : > { %3397 = vst [vmem:[%s6325_s0 + $0x8] sm:$0xff] %v3365_v44  ;;  %v3364_v35 = vadd.f32 %v6320_v18, %v3325_v49  ;;  %v3328_v58 = vmul.f32 %v4042_v62, %v6313_v2 }
 0x37d   : > { %v3169_v45 = vpop.f32.mrf.mxu1 }
 0x37e   : > { %3396 = vst [vmem:[%s6325_s0] sm:$0xff] %v3364_v35  ;;  %v3367_v8 = vadd.f32 %v6320_v18, %v3328_v58  ;;  %v3327_v42 = vmul.f32 %v6313_v2, %v3169_v45 }
 0x37f   : > { %v4045_v53 = vpop.f32.mrf.mxu1 }
 0x380   : > { %3399 = vst [vmem:[%s6325_s0 + $0x18] sm:$0xff] %v3367_v8  ;;  %v3366_v7 = vadd.f32 %v6320_v18, %v3327_v42  ;;  %v3330_v26 = vmul.f32 %v4045_v53, %v6313_v2 }
 0x381   : > { %v3179_v38 = vpop.f32.mrf.mxu1 }
 0x382   : > { %3398 = vst [vmem:[%s6325_s0 + $0x10] sm:$0xff] %v3366_v7  ;;  %v3369_v47 = vadd.f32 %v6320_v18, %v3330_v26  ;;  %v3329_v56 = vmul.f32 %v6313_v2, %v3179_v38 }
 0x383   : > { %v4048_v19 = vpop.f32.mrf.mxu1 }
 0x384   : > { %3401 = vst [vmem:[%s6325_s0 + $0x28] sm:$0xff] %v3369_v47  ;;  %v3368_v21 = vadd.f32 %v6320_v18, %v3329_v56  ;;  %v3332_v9 = vmul.f32 %v4048_v19, %v6313_v2 }
 0x385   : > { %v3189_v41 = vpop.f32.mrf.mxu1 }
 0x386   : > { %3400 = vst [vmem:[%s6325_s0 + $0x20] sm:$0xff] %v3368_v21  ;;  %v3371_v32 = vadd.f32 %v6320_v18, %v3332_v9  ;;  %v3331_v33 = vmul.f32 %v6313_v2, %v3189_v41 }
 0x387   : > { %v4051_v36 = vpop.f32.mrf.mxu1 }
 0x388   : > { %3403 = vst [vmem:[%s6325_s0 + $0x38] sm:$0xff] %v3371_v32  ;;  %v3370_v43 = vadd.f32 %v6320_v18, %v3331_v33  ;;  %v3334_v60 = vmul.f32 %v4051_v36, %v6313_v2 }
 0x389   : > { %v3199_v1 = vpop.f32.mrf.mxu1 }
 0x38a   : > { %3402 = vst [vmem:[%s6325_s0 + $0x30] sm:$0xff] %v3370_v43  ;;  %v3373_v31 = vadd.f32 %v6320_v18, %v3334_v60  ;;  %v3333_v0 = vmul.f32 %v6313_v2, %v3199_v1 }
 0x38b   : > { %v4054_v10 = vpop.f32.mrf.mxu1 }
 0x38c   : > { %3405 = vst [vmem:[%s6325_s0 + $0x48] sm:$0xff] %v3373_v31  ;;  %v3372_v55 = vadd.f32 %v6320_v18, %v3333_v0  ;;  %v3336_v11 = vmul.f32 %v4054_v10, %v6313_v2 }
 0x38d   : > { %v3209_v59 = vpop.f32.mrf.mxu1 }
 0x38e   : > { %3404 = vst [vmem:[%s6325_s0 + $0x40] sm:$0xff] %v3372_v55  ;;  %v3375_v40 = vadd.f32 %v6320_v18, %v3336_v11  ;;  %v3335_v15 = vmul.f32 %v6313_v2, %v3209_v59 }
 0x38f   : > { %v4057_v48 = vpop.f32.mrf.mxu1 }
 0x390   : > { %3407 = vst [vmem:[%s6325_s0 + $0x58] sm:$0xff] %v3375_v40  ;;  %v3374_v3 = vadd.f32 %v6320_v18, %v3335_v15  ;;  %v3338_v34 = vmul.f32 %v4057_v48, %v6313_v2 }
 0x391   : > { %v3219_v14 = vpop.f32.mrf.mxu1 }
 0x392   : > { %3406 = vst [vmem:[%s6325_s0 + $0x50] sm:$0xff] %v3374_v3  ;;  %v3377_v51 = vadd.f32 %v6320_v18, %v3338_v34  ;;  %v3337_v29 = vmul.f32 %v6313_v2, %v3219_v14 }
 0x393   : > { %v4060_v63 = vpop.f32.mrf.mxu1 }
 0x394   : > { %3409 = vst [vmem:[%s6325_s0 + $0x68] sm:$0xff] %v3377_v51  ;;  %v3376_v23 = vadd.f32 %v6320_v18, %v3337_v29  ;;  %v3340_v6 = vmul.f32 %v4060_v63, %v6313_v2 }
 0x395   : > { %v3229_v37 = vpop.f32.mrf.mxu1 }
 0x396   : > { %3408 = vst [vmem:[%s6325_s0 + $0x60] sm:$0xff] %v3376_v23  ;;  %v3379_v57 = vadd.f32 %v6320_v18, %v3340_v6  ;;  %v3339_v27 = vmul.f32 %v6313_v2, %v3229_v37 }
 0x397   : > { %v4063_v5 = vpop.f32.mrf.mxu1 }
 0x398   : > { %3411 = vst [vmem:[%s6325_s0 + $0x78] sm:$0xff] %v3379_v57  ;;  %v3378_v24 = vadd.f32 %v6320_v18, %v3339_v27  ;;  %v3342_v61 = vmul.f32 %v4063_v5, %v6313_v2 }
 0x399   : > { %v3239_v16 = vpop.f32.mrf.mxu1 }
 0x39a   : > { %3410 = vst [vmem:[%s6325_s0 + $0x70] sm:$0xff] %v3378_v24  ;;  %v3381_v46 = vadd.f32 %v6320_v18, %v3342_v61  ;;  %v3341_v4 = vmul.f32 %v6313_v2, %v3239_v16 }
 0x39b   : > { %v4066_v39 = vpop.f32.mrf.mxu1 }
 0x39c   : > { %3413 = vst [vmem:[%s6325_s0 + $0x88] sm:$0xff] %v3381_v46  ;;  %v3380_v28 = vadd.f32 %v6320_v18, %v3341_v4  ;;  %v3344_v25 = vmul.f32 %v4066_v39, %v6313_v2 }
 0x39d   : > { %v3249_v50 = vpop.f32.mrf.mxu1 }
 0x39e   : > { %3412 = vst [vmem:[%s6325_s0 + $0x80] sm:$0xff] %v3380_v28  ;;  %v3383_v30 = vadd.f32 %v6320_v18, %v3344_v25  ;;  %v3343_v20 = vmul.f32 %v6313_v2, %v3249_v50 }
 0x39f   : > { %v4069_v17 = vpop.f32.mrf.mxu1 }
 0x3a0   : > { %3415 = vst [vmem:[%s6325_s0 + $0x98] sm:$0xff] %v3383_v30  ;;  %v3382_v13 = vadd.f32 %v6320_v18, %v3343_v20  ;;  %v3346_v22 = vmul.f32 %v4069_v17, %v6313_v2 }
 0x3a1   : > { %v3259_v12 = vpop.f32.mrf.mxu1 }
 0x3a2   : > { %3414 = vst [vmem:[%s6325_s0 + $0x90] sm:$0xff] %v3382_v13  ;;  %v3385_v54 = vadd.f32 %v6320_v18, %v3346_v22  ;;  %v3345_v52 = vmul.f32 %v6313_v2, %v3259_v12 }
 0x3a3   : > { %v4072_v44 = vpop.f32.mrf.mxu1 }
 0x3a4   : > { %3417 = vst [vmem:[%s6325_s0 + $0xa8] sm:$0xff] %v3385_v54  ;;  %v3384_v49 = vadd.f32 %v6320_v18, %v3345_v52  ;;  %v3348_v62 = vmul.f32 %v4072_v44, %v6313_v2 }
 0x3a5   : > { %v3269_v35 = vpop.f32.mrf.mxu1 }
 0x3a6   : > { %3416 = vst [vmem:[%s6325_s0 + $0xa0] sm:$0xff] %v3384_v49  ;;  %v3387_v58 = vadd.f32 %v6320_v18, %v3348_v62  ;;  %v3347_v45 = vmul.f32 %v6313_v2, %v3269_v35 }
 0x3a7   : > { %v4075_v8 = vpop.f32.mrf.mxu1 }
 0x3a8   : > { %3419 = vst [vmem:[%s6325_s0 + $0xb8] sm:$0xff] %v3387_v58  ;;  %v3386_v42 = vadd.f32 %v6320_v18, %v3347_v45  ;;  %v3350_v53 = vmul.f32 %v4075_v8, %v6313_v2 }
 0x3a9   : > { %v3279_v7 = vpop.f32.mrf.mxu1 }
 0x3aa   : > { %3418 = vst [vmem:[%s6325_s0 + $0xb0] sm:$0xff] %v3386_v42  ;;  %v3389_v26 = vadd.f32 %v6320_v18, %v3350_v53  ;;  %v3349_v38 = vmul.f32 %v6313_v2, %v3279_v7 }
 0x3ab   : > { %v4078_v47 = vpop.f32.mrf.mxu1 }
 0x3ac   : > { %3421 = vst [vmem:[%s6325_s0 + $0xc8] sm:$0xff] %v3389_v26  ;;  %v3388_v56 = vadd.f32 %v6320_v18, %v3349_v38  ;;  %v3352_v19 = vmul.f32 %v4078_v47, %v6313_v2 }
 0x3ad   : > { %v3289_v21 = vpop.f32.mrf.mxu1 }
 0x3ae   : > { %3420 = vst [vmem:[%s6325_s0 + $0xc0] sm:$0xff] %v3388_v56  ;;  %v3391_v9 = vadd.f32 %v6320_v18, %v3352_v19  ;;  %v3351_v41 = vmul.f32 %v6313_v2, %v3289_v21 }
 0x3af   : > { %v4081_v32 = vpop.f32.mrf.mxu1 }
 0x3b0   : > { %3423 = vst [vmem:[%s6325_s0 + $0xd8] sm:$0xff] %v3391_v9  ;;  %v3390_v33 = vadd.f32 %v6320_v18, %v3351_v41  ;;  %v3354_v36 = vmul.f32 %v4081_v32, %v6313_v2 }
 0x3b1   : > { %v3299_v43 = vpop.f32.mrf.mxu1 }
 0x3b2   : > { %3422 = vst [vmem:[%s6325_s0 + $0xd0] sm:$0xff] %v3390_v33  ;;  %v3393_v60 = vadd.f32 %v6320_v18, %v3354_v36  ;;  %v3353_v1 = vmul.f32 %v6313_v2, %v3299_v43 }
 0x3b3   : > { %v4084_v31 = vpop.f32.mrf.mxu1 }
 0x3b4   : > { %3425 = vst [vmem:[%s6325_s0 + $0xe8] sm:$0xff] %v3393_v60  ;;  %v3392_v0 = vadd.f32 %v6320_v18, %v3353_v1  ;;  %v3356_v10 = vmul.f32 %v4084_v31, %v6313_v2 }
 0x3b5   : > { %v3309_v55 = vpop.f32.mrf.mxu1 }
 0x3b6   : > { %3424 = vst [vmem:[%s6325_s0 + $0xe0] sm:$0xff] %v3392_v0  ;;  %v3395_v11 = vadd.f32 %v6320_v18, %v3356_v10  ;;  %v3355_v59 = vmul.f32 %v6313_v2, %v3309_v55 }
 0x3b8   : > { %3427 = vst [vmem:[%s6325_s0 + $0xf8] sm:$0xff] %v3395_v11  ;;  %v3394_v40 = vadd.f32 %v6320_v18, %v3355_v59 }
 0x3ba   : > { %3426 = vst [vmem:[%s6325_s0 + $0xf0] sm:$0xff] %v3394_v40 }
 0x3bb   : > { %4159 = shalt.err (!%p4156_p5)
}
 0x3bc   : > { %s4160_s18 = scalar_lea.hbm %s6422_s14, 4096  ;;  %s4164_s3 = scalar_lea.hbm %s6488_s12, 8192 }
 0x3bd   : > { %p4161_p6 = scmp.ne.s32.totalorder %s6422_s14, %s4160_s18  ;;  %p4165_p10 = scmp.lt.s32.totalorder %s6422_s14, %s6488_s12 }
 0x3be   : > { %p4166_p11 = scmp.lt.s32.totalorder %s4164_s3, %s4160_s18 }
 0x3bf   : > { %p4162_p7 = pnand %p4161_p6, %p4333_p4 }
 0x3c0   : > { %p4167_p12 = por %p4166_p11, %p4165_p10 }
 0x3c1   : > { %p4163_p9 = pneg %p4162_p7 }
 0x3c3   : > { %p4168_p13 = pnand %p4167_p12, %p4163_p9 }
 0x3c5   : > { %4171 = shalt.err (!%p4168_p13)
}
 0x3c6   : > { %s4226_s19 = smov 128   ;;  %s4227_s27 = smov 8  }
 0x3c7   : > { %4085 = dma.vmem_to_hbm [thread:$0]  (%p4333_p4), %s6424_s25, 4096, %s6422_s14, %s6431_s24, %s4226_s19, %s4226_s19, %s4227_s27  }
 0x3c8 PF: > { %p4091_p0 = scmp.ge.s32.totalorder %s4222_s26, 2  ;;  %s3460_s28 = sand.u32 1, %s4202_s21  }
 0x3c9   : > { %s3461_s30 = scalar_lea.sflag [#allocation3], %s3460_s28 }
 0x3ca   : > { %p4088_p1 = pnand %p4091_p0, %p4340_p8 }
 0x3cc   : > { %p4089_p2 = pneg %p4088_p1 }
 0x3ce   : > { %4197 = dma.done.wait (%p4089_p2), %s3461_s30, 4096  }
 0x3cf   : > { %4199 = vsyncadd (%p4089_p2), %s3461_s30, 4294963200  ;;  %s25_s26 = sadd.s32 1, %s4222_s26   ;;  %s6658_s24 = sld [smem:[#allocation5_spill]] }
 0x3d0   : > { %p22_p3 = scmp.ge.s32.totalorder %s25_s26, 4   ;;  %s6659_s25 = sld [smem:[#allocation6_spill]] }
 0x3d1   : > { %s6660_s21 = smov %s4206_s22  ;;  %s6661_s22 = smov %s4210_s23 }
 0x3d2   : > { %s6662_s23 = smov %s4346_s16  ;;  %24 = sbr.rel (!%p22_p3) target bundleno = 7 (0x7), region = 109 }
 0x3d7   :  { %3466 = vsyncpa [#allocation3], 1 }
 0x3d8   :  { %3468 = vsyncpa [#allocation3 + $0x1], 1 }

</bundles_post_ra>
